<compile_context>
chip_gen: v6e
topology: v6e:2x2x1
jax: 0.10.0
libtpu: 0.0.40
codegen_flags: <defaults>
</compile_context>

<pallas_src>
import functools

import jax
import jax.numpy as jnp
from jax.experimental import pallas as pl
from jax.experimental.pallas import tpu as pltpu

_BATCH_TILE = 32   # images per grid step (keep >=2 grid steps on v7x batches)


# ----------------------------------------------------------------------------
# Fused kernel
# ----------------------------------------------------------------------------
def _lenet5_kernel(x_ref, m1_ref, b1_ref, m2_ref, b2_ref,
                   wf1_ref, bf1_ref, wf2_ref, bf2_ref, out_ref, *, T):
    f32 = jnp.float32
    bf16 = jnp.bfloat16

    # ---- conv1 + ReLU: ONE fused MXU dot ------------------------------------
    # x_ref block: (1, 24*T, 256) bf16.  Rows ordered (r, y1h, b) where conv1
    # output row y = 4*y1h + r; lanes kh*28 + j hold input row y+kh, col j
    # (lanes 140..255 are zero pad).
    # m1: (256, 512) bf16, lane = x2*256 + x1*20 + o with output col x=2*x1+x2.
    xs = x_ref[0]                                                  # (24T, 256)
    o1 = jnp.dot(xs, m1_ref[...], preferred_element_type=f32)     # (24T, 512)
    o1 = jnp.maximum(o1 + b1_ref[...], 0.0)

    # ---- pool1 (2x2 max): max over y2 (row groups r = 2a + y2) and x2 -------
    n1 = 6 * T
    pool1 = []
    for a in range(2):
        ya = o1[(2 * a) * n1:(2 * a + 1) * n1, :]
        yb = o1[(2 * a + 1) * n1:(2 * a + 2) * n1, :]
        pool1.append(jnp.maximum(jnp.maximum(ya[:, :256], ya[:, 256:]),
                                 jnp.maximum(yb[:, :256], yb[:, 256:])))
    # pool1[a]: (6T, 256) f32, rows (y1h, b), lanes x1*20 + c.

    # Pre-cast the 6 distinct conv2 input row-slabs to bf16 once (m = c2+kh).
    xs2 = [pool1[m % 2][(m // 2) * T:(m // 2 + 4) * T, :].astype(bf16)
           for m in range(6)]                                      # (4T, 256)

    # ---- conv2 + ReLU --------------------------------------------------------
    # Output row u = 2*s + c2; per row group c2: rows (s, b), lanes
    # d2*256 + t*50 + o2 (output col v = 2*t + d2).
    b2 = b2_ref[...]
    o2 = []
    for c2 in range(2):
        acc = None
        for kh in range(5):
            d = jnp.dot(xs2[c2 + kh], m2_ref[kh], preferred_element_type=f32)
            acc = d if acc is None else acc + d
        o2.append(jnp.maximum(acc + b2, 0.0))                      # (4T, 512)

    # ---- pool2 (2x2 max) -----------------------------------------------------
    pool2 = jnp.maximum(jnp.maximum(o2[0][:, :256], o2[0][:, 256:]),
                        jnp.maximum(o2[1][:, :256], o2[1][:, 256:]))
    # (4T, 256) f32, rows (s, b), lanes t*50 + c.

    # ---- fc1 + ReLU ----------------------------------------------------------
    # Weights pre-permuted to the (s, t, c) activation order; cols >=500 pad.
    h = None
    for s in range(4):
        xf = pool2[s * T:(s + 1) * T, :].astype(bf16)
        d = jnp.dot(xf, wf1_ref[s], preferred_element_type=f32)
        h = d if h is None else h + d
    h = jnp.maximum(h + bf1_ref[...], 0.0)                         # (T, 512)

    # ---- fc2 -----------------------------------------------------------------
    out = jnp.dot(h.astype(bf16), wf2_ref[...], preferred_element_type=f32)
    out_ref[...] = out + bf2_ref[...]                              # (T, 128)


# ----------------------------------------------------------------------------
# One-time parameter preparation (banded conv matrices, padded FC weights)
# ----------------------------------------------------------------------------
def prepare_params(params):
    f32 = jnp.float32
    bf16 = jnp.bfloat16
    w1 = params["conv1_w"].astype(f32)   # (20, 1, 5, 5)
    b1 = params["conv1_b"].astype(f32)   # (20,)
    w2 = params["conv2_w"].astype(f32)   # (50, 20, 5, 5)
    b2 = params["conv2_b"].astype(f32)   # (50,)
    fw1 = params["fc1_w"].astype(f32)    # (500, 800)
    fb1 = params["fc1_b"].astype(f32)    # (500,)
    fw2 = params["fc2_w"].astype(f32)    # (10, 500)
    fb2 = params["fc2_b"].astype(f32)    # (10,)

    kw = jnp.arange(5)
    x1 = jnp.arange(12)

    # conv1 banded matrix, kh-stacked (matches the wrapper's H im2col):
    # m1[kh*28 + j, x2*256 + x1*20 + o] = w1[o, 0, kh, j - (2*x1 + x2)]
    j = jnp.arange(28)
    x2 = jnp.arange(2)
    s1 = (j[None, :, None, None] ==
          (kw[:, None, None, None] + x2[None, None, :, None]
           + 2 * x1[None, None, None, :])).astype(f32)          # (5,28,2,12)
    w1r = w1[:, 0].transpose(1, 2, 0)                           # (kh,kw,o)
    m1 = jnp.einsum('wjab,hwo->hjabo', s1, w1r)                 # (5,28,2,12,20)
    m1 = m1.reshape(5, 28, 2, 240)
    m1 = jnp.pad(m1, ((0, 0), (0, 0), (0, 0), (0, 16))).reshape(140, 512)
    m1 = jnp.pad(m1, ((0, 116), (0, 0)))                        # (256, 512)
    blk1 = jnp.concatenate([jnp.tile(b1, 12), jnp.zeros((16,), f32)])
    b1m = jnp.concatenate([blk1, blk1]).reshape(1, 512)

    # conv2 banded matrices:
    # m2[kh, x1*20 + c, d2*256 + t*50 + o2] = w2[o2, c, kh, x1 - (2*t + d2)]
    t = jnp.arange(4)
    d2 = jnp.arange(2)
    s2 = (x1[None, :, None, None] ==
          (kw[:, None, None, None] + d2[None, None, :, None]
           + 2 * t[None, None, None, :])).astype(f32)           # (5,12,2,4)
    w2r = w2.transpose(2, 3, 1, 0)                              # (kh,kw,c,o)
    m2 = jnp.einsum('wxdt,hwco->hxcdto', s2, w2r)               # (5,12,20,2,4,50)
    m2 = m2.reshape(5, 240, 2, 4, 50)
    m2 = jnp.pad(m2, ((0, 0), (0, 16), (0, 0), (0, 0), (0, 0)))  # (5,256,2,4,50)
    m2 = m2.reshape(5, 256, 2, 200)
    m2 = jnp.pad(m2, ((0, 0), (0, 0), (0, 0), (0, 56))).reshape(5, 256, 512)
    blk2 = jnp.concatenate([jnp.tile(b2, 4), jnp.zeros((56,), f32)])
    b2m = jnp.concatenate([blk2, blk2]).reshape(1, 512)

    # fc1: wf1[s, t*50 + c, n] = fc1_w[n, c*16 + s*4 + t]   (PyTorch C,H,W flat)
    wf1 = fw1.reshape(500, 50, 4, 4).transpose(2, 3, 1, 0)      # (s,t,c,n)
    wf1 = wf1.reshape(4, 200, 500)
    wf1 = jnp.pad(wf1, ((0, 0), (0, 56), (0, 12)))              # (4,256,512)
    bf1 = jnp.pad(fb1, (0, 12)).reshape(1, 512)

    # fc2: (512, 128), rows >=500 and cols >=10 are zero padding
    wf2 = jnp.zeros((512, 128), f32).at[:500, :10].set(fw2.T)
    bf2 = jnp.pad(fb2, (0, 118)).reshape(1, 128)

    # MXU operands in bf16 (f32 accumulate in-kernel); biases stay f32.
    return {"m1": m1.astype(bf16), "b1": b1m,
            "m2": m2.astype(bf16), "b2": b2m,
            "wf1": wf1.astype(bf16), "bf1": bf1,
            "wf2": wf2.astype(bf16), "bf2": bf2}


# ----------------------------------------------------------------------------
# Forward wrapper
# ----------------------------------------------------------------------------
@jax.jit
def lenet5_forward(prep, img):
    # img: (B, 1, 28, 28) float32
    B = img.shape[0]
    T = min(_BATCH_TILE, ((B + 7) // 8) * 8)   # batch tile (multiple of 8)
    nb = (B + T - 1) // T
    Bp = nb * T

    x = img.reshape(B, 28, 28).astype(jnp.bfloat16)
    if Bp != B:
        x = jnp.pad(x, ((0, Bp - B), (0, 0), (0, 0)))

    # H-direction im2col of the (tiny) raw input: row y holds input rows
    # y..y+4 concatenated (140 lanes, padded to 256) so conv1 is one dense dot.
    xc = jnp.stack([x[:, kh:kh + 24, :] for kh in range(5)], axis=2)  # (Bp,24,5,28)
    xc = xc.reshape(Bp, 24, 140)
    xc = jnp.pad(xc, ((0, 0), (0, 0), (0, 116)))                      # (Bp,24,256)
    # Rows reordered to (r, y1h, b) inside each batch tile (y = 4*y1h + r).
    xc = xc.reshape(Bp, 6, 4, 256).transpose(0, 2, 1, 3)              # (Bp,4,6,256)
    xim = (xc.reshape(nb, T, 4, 6, 256)
             .transpose(0, 2, 3, 1, 4)
             .reshape(nb, 24 * T, 256))                               # (nb,24T,256)

    kernel = functools.partial(_lenet5_kernel, T=T)
    out = pl.pallas_call(
        kernel,
        out_shape=jax.ShapeDtypeStruct((Bp, 128), jnp.float32),
        grid=(nb,),
        in_specs=[
            pl.BlockSpec((1, 24 * T, 256), lambda i: (i, 0, 0)),
            pl.BlockSpec((256, 512), lambda i: (0, 0)),
            pl.BlockSpec((1, 512), lambda i: (0, 0)),
            pl.BlockSpec((5, 256, 512), lambda i: (0, 0, 0)),
            pl.BlockSpec((1, 512), lambda i: (0, 0)),
            pl.BlockSpec((4, 256, 512), lambda i: (0, 0, 0)),
            pl.BlockSpec((1, 512), lambda i: (0, 0)),
            pl.BlockSpec((512, 128), lambda i: (0, 0)),
            pl.BlockSpec((1, 128), lambda i: (0, 0)),
        ],
        out_specs=pl.BlockSpec((T, 128), lambda i: (i, 0)),
        compiler_params=pltpu.CompilerParams(
            dimension_semantics=("parallel",),
            vmem_limit_bytes=32 * 1024 * 1024,   # ~10 MB used at T=32; v7x-safe
        ),
    )(xim, prep["m1"], prep["b1"], prep["m2"], prep["b2"],
      prep["wf1"], prep["bf1"], prep["wf2"], prep["bf2"])

    return out[:B, :10]


# ----------------------------------------------------------------------------
# Plain-JAX f32 reference (numerical sanity check) and init
# ----------------------------------------------------------------------------
def reference_forward(params, img):
    dn = ("NCHW", "OIHW", "NCHW")
    x = jax.lax.conv_general_dilated(img, params["conv1_w"], (1, 1), "VALID",
                                     dimension_numbers=dn)
    x = jax.nn.relu(x + params["conv1_b"][None, :, None, None])
    x = jax.lax.reduce_window(x, -jnp.inf, jax.lax.max,
                              (1, 1, 2, 2), (1, 1, 2, 2), "VALID")
    x = jax.lax.conv_general_dilated(x, params["conv2_w"], (1, 1), "VALID",
                                     dimension_numbers=dn)
    x = jax.nn.relu(x + params["conv2_b"][None, :, None, None])
    x = jax.lax.reduce_window(x, -jnp.inf, jax.lax.max,
                              (1, 1, 2, 2), (1, 1, 2, 2), "VALID")
    x = x.reshape(x.shape[0], -1)
    x = jax.nn.relu(x @ params["fc1_w"].T + params["fc1_b"])
    return x @ params["fc2_w"].T + params["fc2_b"]


def init_params(key):
    ks = jax.random.split(key, 8)

    def u(k, shape, fan_in):
        bound = 1.0 / jnp.sqrt(fan_in)
        return jax.random.uniform(k, shape, jnp.float32, -bound, bound)

    return {
        "conv1_w": u(ks[0], (20, 1, 5, 5), 1 * 5 * 5),
        "conv1_b": u(ks[1], (20,), 1 * 5 * 5),
        "conv2_w": u(ks[2], (50, 20, 5, 5), 20 * 5 * 5),
        "conv2_b": u(ks[3], (50,), 20 * 5 * 5),
        "fc1_w": u(ks[4], (500, 800), 800),   # PyTorch Linear layout (out, in)
        "fc1_b": u(ks[5], (500,), 800),
        "fc2_w": u(ks[6], (10, 500), 500),
        "fc2_b": u(ks[7], (10,), 500),
    }


if __name__ == "__main__":
    key = jax.random.PRNGKey(0)
    k_param, k_img = jax.random.split(key)
    params = init_params(k_param)
    prep = prepare_params(params)              # one-time weight transform

    # LeNet5's fc1 (4*4*50 inputs) implies 28x28 spatial input.
    img = jax.random.normal(k_img, (2, 1, 28, 28), dtype=jnp.float32)

    out = jax.block_until_ready(lenet5_forward(prep, img))

    assert out.shape == (2, 10), out.shape
    assert bool(jnp.all(jnp.isfinite(out)))

    ref = reference_forward(params, img)
    max_err = float(jnp.max(jnp.abs(out - ref)))
    # bf16 MXU operands with f32 accumulation: ~1e-2 scale tolerance.
    assert bool(jnp.allclose(out, ref, rtol=2e-2, atol=2e-2)), max_err

    print("KERNEL_OK")
</pallas_src>

<mosaic_0001>
module attributes {stable_mosaic.version = 11 : i64} {
  func.func @_lenet5_kernel(%arg0: i32, %arg1: memref<1x192x256xbf16, #tpu.memory_space<vmem>>, %arg2: memref<256x512xbf16, #tpu.memory_space<vmem>>, %arg3: memref<1x512xf32, #tpu.memory_space<vmem>>, %arg4: memref<5x256x512xbf16, #tpu.memory_space<vmem>>, %arg5: memref<1x512xf32, #tpu.memory_space<vmem>>, %arg6: memref<4x256x512xbf16, #tpu.memory_space<vmem>>, %arg7: memref<1x512xf32, #tpu.memory_space<vmem>>, %arg8: memref<512x128xbf16, #tpu.memory_space<vmem>>, %arg9: memref<1x128xf32, #tpu.memory_space<vmem>>, %arg10: memref<8x128xf32, #tpu.memory_space<vmem>>) attributes {dimension_semantics = [#tpu.dimension_semantics<parallel>], iteration_bounds = array<i64: 1>, scalar_prefetch = 0 : i64, scratch_operands = 0 : i64, tpu.core_type = #tpu.core_type<tc>, window_params = [{transform_indices = @transform_0, window_bounds = array<i64: 1, 192, 256>}, {pipeline_mode = #tpu.pipeline_mode<synchronous>, transform_indices = @transform_1, window_bounds = array<i64: 256, 512>}, {pipeline_mode = #tpu.pipeline_mode<synchronous>, transform_indices = @transform_2, window_bounds = array<i64: 1, 512>}, {pipeline_mode = #tpu.pipeline_mode<synchronous>, transform_indices = @transform_3, window_bounds = array<i64: 5, 256, 512>}, {pipeline_mode = #tpu.pipeline_mode<synchronous>, transform_indices = @transform_4, window_bounds = array<i64: 1, 512>}, {pipeline_mode = #tpu.pipeline_mode<synchronous>, transform_indices = @transform_5, window_bounds = array<i64: 4, 256, 512>}, {pipeline_mode = #tpu.pipeline_mode<synchronous>, transform_indices = @transform_6, window_bounds = array<i64: 1, 512>}, {pipeline_mode = #tpu.pipeline_mode<synchronous>, transform_indices = @transform_7, window_bounds = array<i64: 512, 128>}, {pipeline_mode = #tpu.pipeline_mode<synchronous>, transform_indices = @transform_8, window_bounds = array<i64: 1, 128>}, {transform_indices = @transform_9, window_bounds = array<i64: 8, 128>}]} {
    %c0 = arith.constant 0 : index
    %c0_0 = arith.constant 0 : index
    %c0_1 = arith.constant 0 : index
    %0 = vector.load %arg1[%c0, %c0_0, %c0_1] : memref<1x192x256xbf16, #tpu.memory_space<vmem>>, vector<1x192x256xbf16>
    %1 = vector.shape_cast %0 : vector<1x192x256xbf16> to vector<192x256xbf16>
    %c0_2 = arith.constant 0 : index
    %c0_3 = arith.constant 0 : index
    %2 = vector.load %arg2[%c0_2, %c0_3] : memref<256x512xbf16, #tpu.memory_space<vmem>>, vector<256x512xbf16>
    %cst = arith.constant dense<0.000000e+00> : vector<192x512xf32>
    %3 = tpu.matmul %1, %2, %cst {dimension_numbers = #tpu.dot_dimension_numbers<[1], [0], [0], [1], [0, 0, 1, 1], [], []>} : vector<192x256xbf16>, vector<256x512xbf16>, vector<192x512xf32> -> vector<192x512xf32>
    %c0_4 = arith.constant 0 : index
    %c0_5 = arith.constant 0 : index
    %4 = vector.load %arg3[%c0_4, %c0_5] : memref<1x512xf32, #tpu.memory_space<vmem>>, vector<1x512xf32>
    %5 = vector.broadcast %4 : vector<1x512xf32> to vector<192x512xf32>
    %6 = arith.addf %3, %5 : vector<192x512xf32>
    %cst_6 = arith.constant 0.000000e+00 : f32
    %7 = vector.broadcast %cst_6 : f32 to vector<192x512xf32>
    %8 = arith.maximumf %6, %7 : vector<192x512xf32>
    %9 = vector.extract_strided_slice %8 {offsets = [0, 0], sizes = [48, 512], strides = [1, 1]} : vector<192x512xf32> to vector<48x512xf32>
    %10 = vector.extract_strided_slice %8 {offsets = [48, 0], sizes = [48, 512], strides = [1, 1]} : vector<192x512xf32> to vector<48x512xf32>
    %11 = vector.extract_strided_slice %9 {offsets = [0, 0], sizes = [48, 256], strides = [1, 1]} : vector<48x512xf32> to vector<48x256xf32>
    %12 = vector.extract_strided_slice %9 {offsets = [0, 256], sizes = [48, 256], strides = [1, 1]} : vector<48x512xf32> to vector<48x256xf32>
    %13 = arith.maximumf %11, %12 : vector<48x256xf32>
    %14 = vector.extract_strided_slice %10 {offsets = [0, 0], sizes = [48, 256], strides = [1, 1]} : vector<48x512xf32> to vector<48x256xf32>
    %15 = vector.extract_strided_slice %10 {offsets = [0, 256], sizes = [48, 256], strides = [1, 1]} : vector<48x512xf32> to vector<48x256xf32>
    %16 = arith.maximumf %14, %15 : vector<48x256xf32>
    %17 = arith.maximumf %13, %16 : vector<48x256xf32>
    %18 = vector.extract_strided_slice %8 {offsets = [96, 0], sizes = [48, 512], strides = [1, 1]} : vector<192x512xf32> to vector<48x512xf32>
    %19 = vector.extract_strided_slice %8 {offsets = [144, 0], sizes = [48, 512], strides = [1, 1]} : vector<192x512xf32> to vector<48x512xf32>
    %20 = vector.extract_strided_slice %18 {offsets = [0, 0], sizes = [48, 256], strides = [1, 1]} : vector<48x512xf32> to vector<48x256xf32>
    %21 = vector.extract_strided_slice %18 {offsets = [0, 256], sizes = [48, 256], strides = [1, 1]} : vector<48x512xf32> to vector<48x256xf32>
    %22 = arith.maximumf %20, %21 : vector<48x256xf32>
    %23 = vector.extract_strided_slice %19 {offsets = [0, 0], sizes = [48, 256], strides = [1, 1]} : vector<48x512xf32> to vector<48x256xf32>
    %24 = vector.extract_strided_slice %19 {offsets = [0, 256], sizes = [48, 256], strides = [1, 1]} : vector<48x512xf32> to vector<48x256xf32>
    %25 = arith.maximumf %23, %24 : vector<48x256xf32>
    %26 = arith.maximumf %22, %25 : vector<48x256xf32>
    %27 = vector.extract_strided_slice %17 {offsets = [0, 0], sizes = [32, 256], strides = [1, 1]} : vector<48x256xf32> to vector<32x256xf32>
    %28 = arith.truncf %27 : vector<32x256xf32> to vector<32x256xbf16>
    %29 = vector.extract_strided_slice %26 {offsets = [0, 0], sizes = [32, 256], strides = [1, 1]} : vector<48x256xf32> to vector<32x256xf32>
    %30 = arith.truncf %29 : vector<32x256xf32> to vector<32x256xbf16>
    %31 = vector.extract_strided_slice %17 {offsets = [8, 0], sizes = [32, 256], strides = [1, 1]} : vector<48x256xf32> to vector<32x256xf32>
    %32 = arith.truncf %31 : vector<32x256xf32> to vector<32x256xbf16>
    %33 = vector.extract_strided_slice %26 {offsets = [8, 0], sizes = [32, 256], strides = [1, 1]} : vector<48x256xf32> to vector<32x256xf32>
    %34 = arith.truncf %33 : vector<32x256xf32> to vector<32x256xbf16>
    %35 = vector.extract_strided_slice %17 {offsets = [16, 0], sizes = [32, 256], strides = [1, 1]} : vector<48x256xf32> to vector<32x256xf32>
    %36 = arith.truncf %35 : vector<32x256xf32> to vector<32x256xbf16>
    %37 = vector.extract_strided_slice %26 {offsets = [16, 0], sizes = [32, 256], strides = [1, 1]} : vector<48x256xf32> to vector<32x256xf32>
    %38 = arith.truncf %37 : vector<32x256xf32> to vector<32x256xbf16>
    %c0_7 = arith.constant 0 : index
    %c0_8 = arith.constant 0 : index
    %39 = vector.load %arg5[%c0_7, %c0_8] : memref<1x512xf32, #tpu.memory_space<vmem>>, vector<1x512xf32>
    %c0_9 = arith.constant 0 : index
    %c0_10 = arith.constant 0 : index
    %c0_11 = arith.constant 0 : index
    %40 = vector.load %arg4[%c0_9, %c0_10, %c0_11] : memref<5x256x512xbf16, #tpu.memory_space<vmem>>, vector<1x256x512xbf16>
    %41 = vector.shape_cast %40 : vector<1x256x512xbf16> to vector<256x512xbf16>
    %cst_12 = arith.constant dense<0.000000e+00> : vector<32x512xf32>
    %42 = tpu.matmul %28, %41, %cst_12 {dimension_numbers = #tpu.dot_dimension_numbers<[1], [0], [0], [1], [0, 0, 1, 1], [], []>} : vector<32x256xbf16>, vector<256x512xbf16>, vector<32x512xf32> -> vector<32x512xf32>
    %c1 = arith.constant 1 : index
    %c0_13 = arith.constant 0 : index
    %c0_14 = arith.constant 0 : index
    %43 = vector.load %arg4[%c1, %c0_13, %c0_14] : memref<5x256x512xbf16, #tpu.memory_space<vmem>>, vector<1x256x512xbf16>
    %44 = vector.shape_cast %43 : vector<1x256x512xbf16> to vector<256x512xbf16>
    %cst_15 = arith.constant dense<0.000000e+00> : vector<32x512xf32>
    %45 = tpu.matmul %30, %44, %cst_15 {dimension_numbers = #tpu.dot_dimension_numbers<[1], [0], [0], [1], [0, 0, 1, 1], [], []>} : vector<32x256xbf16>, vector<256x512xbf16>, vector<32x512xf32> -> vector<32x512xf32>
    %46 = arith.addf %42, %45 : vector<32x512xf32>
    %c2 = arith.constant 2 : index
    %c0_16 = arith.constant 0 : index
    %c0_17 = arith.constant 0 : index
    %47 = vector.load %arg4[%c2, %c0_16, %c0_17] : memref<5x256x512xbf16, #tpu.memory_space<vmem>>, vector<1x256x512xbf16>
    %48 = vector.shape_cast %47 : vector<1x256x512xbf16> to vector<256x512xbf16>
    %cst_18 = arith.constant dense<0.000000e+00> : vector<32x512xf32>
    %49 = tpu.matmul %32, %48, %cst_18 {dimension_numbers = #tpu.dot_dimension_numbers<[1], [0], [0], [1], [0, 0, 1, 1], [], []>} : vector<32x256xbf16>, vector<256x512xbf16>, vector<32x512xf32> -> vector<32x512xf32>
    %50 = arith.addf %46, %49 : vector<32x512xf32>
    %c3 = arith.constant 3 : index
    %c0_19 = arith.constant 0 : index
    %c0_20 = arith.constant 0 : index
    %51 = vector.load %arg4[%c3, %c0_19, %c0_20] : memref<5x256x512xbf16, #tpu.memory_space<vmem>>, vector<1x256x512xbf16>
    %52 = vector.shape_cast %51 : vector<1x256x512xbf16> to vector<256x512xbf16>
    %cst_21 = arith.constant dense<0.000000e+00> : vector<32x512xf32>
    %53 = tpu.matmul %34, %52, %cst_21 {dimension_numbers = #tpu.dot_dimension_numbers<[1], [0], [0], [1], [0, 0, 1, 1], [], []>} : vector<32x256xbf16>, vector<256x512xbf16>, vector<32x512xf32> -> vector<32x512xf32>
    %54 = arith.addf %50, %53 : vector<32x512xf32>
    %c4 = arith.constant 4 : index
    %c0_22 = arith.constant 0 : index
    %c0_23 = arith.constant 0 : index
    %55 = vector.load %arg4[%c4, %c0_22, %c0_23] : memref<5x256x512xbf16, #tpu.memory_space<vmem>>, vector<1x256x512xbf16>
    %56 = vector.shape_cast %55 : vector<1x256x512xbf16> to vector<256x512xbf16>
    %cst_24 = arith.constant dense<0.000000e+00> : vector<32x512xf32>
    %57 = tpu.matmul %36, %56, %cst_24 {dimension_numbers = #tpu.dot_dimension_numbers<[1], [0], [0], [1], [0, 0, 1, 1], [], []>} : vector<32x256xbf16>, vector<256x512xbf16>, vector<32x512xf32> -> vector<32x512xf32>
    %58 = arith.addf %54, %57 : vector<32x512xf32>
    %59 = vector.broadcast %39 : vector<1x512xf32> to vector<32x512xf32>
    %60 = arith.addf %58, %59 : vector<32x512xf32>
    %cst_25 = arith.constant 0.000000e+00 : f32
    %61 = vector.broadcast %cst_25 : f32 to vector<32x512xf32>
    %62 = arith.maximumf %60, %61 : vector<32x512xf32>
    %c0_26 = arith.constant 0 : index
    %c0_27 = arith.constant 0 : index
    %c0_28 = arith.constant 0 : index
    %63 = vector.load %arg4[%c0_26, %c0_27, %c0_28] : memref<5x256x512xbf16, #tpu.memory_space<vmem>>, vector<1x256x512xbf16>
    %64 = vector.shape_cast %63 : vector<1x256x512xbf16> to vector<256x512xbf16>
    %cst_29 = arith.constant dense<0.000000e+00> : vector<32x512xf32>
    %65 = tpu.matmul %30, %64, %cst_29 {dimension_numbers = #tpu.dot_dimension_numbers<[1], [0], [0], [1], [0, 0, 1, 1], [], []>} : vector<32x256xbf16>, vector<256x512xbf16>, vector<32x512xf32> -> vector<32x512xf32>
    %c1_30 = arith.constant 1 : index
    %c0_31 = arith.constant 0 : index
    %c0_32 = arith.constant 0 : index
    %66 = vector.load %arg4[%c1_30, %c0_31, %c0_32] : memref<5x256x512xbf16, #tpu.memory_space<vmem>>, vector<1x256x512xbf16>
    %67 = vector.shape_cast %66 : vector<1x256x512xbf16> to vector<256x512xbf16>
    %cst_33 = arith.constant dense<0.000000e+00> : vector<32x512xf32>
    %68 = tpu.matmul %32, %67, %cst_33 {dimension_numbers = #tpu.dot_dimension_numbers<[1], [0], [0], [1], [0, 0, 1, 1], [], []>} : vector<32x256xbf16>, vector<256x512xbf16>, vector<32x512xf32> -> vector<32x512xf32>
    %69 = arith.addf %65, %68 : vector<32x512xf32>
    %c2_34 = arith.constant 2 : index
    %c0_35 = arith.constant 0 : index
    %c0_36 = arith.constant 0 : index
    %70 = vector.load %arg4[%c2_34, %c0_35, %c0_36] : memref<5x256x512xbf16, #tpu.memory_space<vmem>>, vector<1x256x512xbf16>
    %71 = vector.shape_cast %70 : vector<1x256x512xbf16> to vector<256x512xbf16>
    %cst_37 = arith.constant dense<0.000000e+00> : vector<32x512xf32>
    %72 = tpu.matmul %34, %71, %cst_37 {dimension_numbers = #tpu.dot_dimension_numbers<[1], [0], [0], [1], [0, 0, 1, 1], [], []>} : vector<32x256xbf16>, vector<256x512xbf16>, vector<32x512xf32> -> vector<32x512xf32>
    %73 = arith.addf %69, %72 : vector<32x512xf32>
    %c3_38 = arith.constant 3 : index
    %c0_39 = arith.constant 0 : index
    %c0_40 = arith.constant 0 : index
    %74 = vector.load %arg4[%c3_38, %c0_39, %c0_40] : memref<5x256x512xbf16, #tpu.memory_space<vmem>>, vector<1x256x512xbf16>
    %75 = vector.shape_cast %74 : vector<1x256x512xbf16> to vector<256x512xbf16>
    %cst_41 = arith.constant dense<0.000000e+00> : vector<32x512xf32>
    %76 = tpu.matmul %36, %75, %cst_41 {dimension_numbers = #tpu.dot_dimension_numbers<[1], [0], [0], [1], [0, 0, 1, 1], [], []>} : vector<32x256xbf16>, vector<256x512xbf16>, vector<32x512xf32> -> vector<32x512xf32>
    %77 = arith.addf %73, %76 : vector<32x512xf32>
    %c4_42 = arith.constant 4 : index
    %c0_43 = arith.constant 0 : index
    %c0_44 = arith.constant 0 : index
    %78 = vector.load %arg4[%c4_42, %c0_43, %c0_44] : memref<5x256x512xbf16, #tpu.memory_space<vmem>>, vector<1x256x512xbf16>
    %79 = vector.shape_cast %78 : vector<1x256x512xbf16> to vector<256x512xbf16>
    %cst_45 = arith.constant dense<0.000000e+00> : vector<32x512xf32>
    %80 = tpu.matmul %38, %79, %cst_45 {dimension_numbers = #tpu.dot_dimension_numbers<[1], [0], [0], [1], [0, 0, 1, 1], [], []>} : vector<32x256xbf16>, vector<256x512xbf16>, vector<32x512xf32> -> vector<32x512xf32>
    %81 = arith.addf %77, %80 : vector<32x512xf32>
    %82 = vector.broadcast %39 : vector<1x512xf32> to vector<32x512xf32>
    %83 = arith.addf %81, %82 : vector<32x512xf32>
    %cst_46 = arith.constant 0.000000e+00 : f32
    %84 = vector.broadcast %cst_46 : f32 to vector<32x512xf32>
    %85 = arith.maximumf %83, %84 : vector<32x512xf32>
    %86 = vector.extract_strided_slice %62 {offsets = [0, 0], sizes = [32, 256], strides = [1, 1]} : vector<32x512xf32> to vector<32x256xf32>
    %87 = vector.extract_strided_slice %62 {offsets = [0, 256], sizes = [32, 256], strides = [1, 1]} : vector<32x512xf32> to vector<32x256xf32>
    %88 = arith.maximumf %86, %87 : vector<32x256xf32>
    %89 = vector.extract_strided_slice %85 {offsets = [0, 0], sizes = [32, 256], strides = [1, 1]} : vector<32x512xf32> to vector<32x256xf32>
    %90 = vector.extract_strided_slice %85 {offsets = [0, 256], sizes = [32, 256], strides = [1, 1]} : vector<32x512xf32> to vector<32x256xf32>
    %91 = arith.maximumf %89, %90 : vector<32x256xf32>
    %92 = arith.maximumf %88, %91 : vector<32x256xf32>
    %93 = vector.extract_strided_slice %92 {offsets = [0, 0], sizes = [8, 256], strides = [1, 1]} : vector<32x256xf32> to vector<8x256xf32>
    %94 = arith.truncf %93 : vector<8x256xf32> to vector<8x256xbf16>
    %c0_47 = arith.constant 0 : index
    %c0_48 = arith.constant 0 : index
    %c0_49 = arith.constant 0 : index
    %95 = vector.load %arg6[%c0_47, %c0_48, %c0_49] : memref<4x256x512xbf16, #tpu.memory_space<vmem>>, vector<1x256x512xbf16>
    %96 = vector.shape_cast %95 : vector<1x256x512xbf16> to vector<256x512xbf16>
    %cst_50 = arith.constant dense<0.000000e+00> : vector<8x512xf32>
    %97 = tpu.matmul %94, %96, %cst_50 {dimension_numbers = #tpu.dot_dimension_numbers<[1], [0], [0], [1], [0, 0, 1, 1], [], []>} : vector<8x256xbf16>, vector<256x512xbf16>, vector<8x512xf32> -> vector<8x512xf32>
    %98 = vector.extract_strided_slice %92 {offsets = [8, 0], sizes = [8, 256], strides = [1, 1]} : vector<32x256xf32> to vector<8x256xf32>
    %99 = arith.truncf %98 : vector<8x256xf32> to vector<8x256xbf16>
    %c1_51 = arith.constant 1 : index
    %c0_52 = arith.constant 0 : index
    %c0_53 = arith.constant 0 : index
    %100 = vector.load %arg6[%c1_51, %c0_52, %c0_53] : memref<4x256x512xbf16, #tpu.memory_space<vmem>>, vector<1x256x512xbf16>
    %101 = vector.shape_cast %100 : vector<1x256x512xbf16> to vector<256x512xbf16>
    %cst_54 = arith.constant dense<0.000000e+00> : vector<8x512xf32>
    %102 = tpu.matmul %99, %101, %cst_54 {dimension_numbers = #tpu.dot_dimension_numbers<[1], [0], [0], [1], [0, 0, 1, 1], [], []>} : vector<8x256xbf16>, vector<256x512xbf16>, vector<8x512xf32> -> vector<8x512xf32>
    %103 = arith.addf %97, %102 : vector<8x512xf32>
    %104 = vector.extract_strided_slice %92 {offsets = [16, 0], sizes = [8, 256], strides = [1, 1]} : vector<32x256xf32> to vector<8x256xf32>
    %105 = arith.truncf %104 : vector<8x256xf32> to vector<8x256xbf16>
    %c2_55 = arith.constant 2 : index
    %c0_56 = arith.constant 0 : index
    %c0_57 = arith.constant 0 : index
    %106 = vector.load %arg6[%c2_55, %c0_56, %c0_57] : memref<4x256x512xbf16, #tpu.memory_space<vmem>>, vector<1x256x512xbf16>
    %107 = vector.shape_cast %106 : vector<1x256x512xbf16> to vector<256x512xbf16>
    %cst_58 = arith.constant dense<0.000000e+00> : vector<8x512xf32>
    %108 = tpu.matmul %105, %107, %cst_58 {dimension_numbers = #tpu.dot_dimension_numbers<[1], [0], [0], [1], [0, 0, 1, 1], [], []>} : vector<8x256xbf16>, vector<256x512xbf16>, vector<8x512xf32> -> vector<8x512xf32>
    %109 = arith.addf %103, %108 : vector<8x512xf32>
    %110 = vector.extract_strided_slice %92 {offsets = [24, 0], sizes = [8, 256], strides = [1, 1]} : vector<32x256xf32> to vector<8x256xf32>
    %111 = arith.truncf %110 : vector<8x256xf32> to vector<8x256xbf16>
    %c3_59 = arith.constant 3 : index
    %c0_60 = arith.constant 0 : index
    %c0_61 = arith.constant 0 : index
    %112 = vector.load %arg6[%c3_59, %c0_60, %c0_61] : memref<4x256x512xbf16, #tpu.memory_space<vmem>>, vector<1x256x512xbf16>
    %113 = vector.shape_cast %112 : vector<1x256x512xbf16> to vector<256x512xbf16>
    %cst_62 = arith.constant dense<0.000000e+00> : vector<8x512xf32>
    %114 = tpu.matmul %111, %113, %cst_62 {dimension_numbers = #tpu.dot_dimension_numbers<[1], [0], [0], [1], [0, 0, 1, 1], [], []>} : vector<8x256xbf16>, vector<256x512xbf16>, vector<8x512xf32> -> vector<8x512xf32>
    %115 = arith.addf %109, %114 : vector<8x512xf32>
    %c0_63 = arith.constant 0 : index
    %c0_64 = arith.constant 0 : index
    %116 = vector.load %arg7[%c0_63, %c0_64] : memref<1x512xf32, #tpu.memory_space<vmem>>, vector<1x512xf32>
    %117 = vector.broadcast %116 : vector<1x512xf32> to vector<8x512xf32>
    %118 = arith.addf %115, %117 : vector<8x512xf32>
    %cst_65 = arith.constant 0.000000e+00 : f32
    %119 = vector.broadcast %cst_65 : f32 to vector<8x512xf32>
    %120 = arith.maximumf %118, %119 : vector<8x512xf32>
    %121 = arith.truncf %120 : vector<8x512xf32> to vector<8x512xbf16>
    %c0_66 = arith.constant 0 : index
    %c0_67 = arith.constant 0 : index
    %122 = vector.load %arg8[%c0_66, %c0_67] : memref<512x128xbf16, #tpu.memory_space<vmem>>, vector<512x128xbf16>
    %cst_68 = arith.constant dense<0.000000e+00> : vector<8x128xf32>
    %123 = tpu.matmul %121, %122, %cst_68 {dimension_numbers = #tpu.dot_dimension_numbers<[1], [0], [0], [1], [0, 0, 1, 1], [], []>} : vector<8x512xbf16>, vector<512x128xbf16>, vector<8x128xf32> -> vector<8x128xf32>
    %c0_69 = arith.constant 0 : index
    %c0_70 = arith.constant 0 : index
    %124 = vector.load %arg9[%c0_69, %c0_70] : memref<1x128xf32, #tpu.memory_space<vmem>>, vector<1x128xf32>
    %125 = vector.broadcast %124 : vector<1x128xf32> to vector<8x128xf32>
    %126 = arith.addf %123, %125 : vector<8x128xf32>
    %c0_71 = arith.constant 0 : index
    %c0_72 = arith.constant 0 : index
    %127 = vector.load %arg10[%c0_71, %c0_72] : memref<8x128xf32, #tpu.memory_space<vmem>>, vector<8x128xf32>
    tpu.vector_store %arg10[%c0_71, %c0_72], %126 {strides = array<i32>} : memref<8x128xf32, #tpu.memory_space<vmem>>, vector<8x128xf32>,
    return
  }
  func.func @transform_0(%arg0: i32) -> (i32, i32, i32) {
    %c0_i32 = arith.constant 0 : i32
    %c0_i32_0 = arith.constant 0 : i32
    %c0_i32_1 = arith.constant 0 : i32
    return %arg0, %c0_i32, %c0_i32_0 : i32, i32, i32
  }
  func.func @transform_1(%arg0: i32) -> (i32, i32) {
    %c0_i32 = arith.constant 0 : i32
    %c0_i32_0 = arith.constant 0 : i32
    %c0_i32_1 = arith.constant 0 : i32
    return %c0_i32, %c0_i32_0 : i32, i32
  }
  func.func @transform_2(%arg0: i32) -> (i32, i32) {
    %c0_i32 = arith.constant 0 : i32
    %c0_i32_0 = arith.constant 0 : i32
    %c0_i32_1 = arith.constant 0 : i32
    return %c0_i32, %c0_i32_0 : i32, i32
  }
  func.func @transform_3(%arg0: i32) -> (i32, i32, i32) {
    %c0_i32 = arith.constant 0 : i32
    %c0_i32_0 = arith.constant 0 : i32
    %c0_i32_1 = arith.constant 0 : i32
    %c0_i32_2 = arith.constant 0 : i32
    return %c0_i32, %c0_i32_0, %c0_i32_1 : i32, i32, i32
  }
  func.func @transform_4(%arg0: i32) -> (i32, i32) {
    %c0_i32 = arith.constant 0 : i32
    %c0_i32_0 = arith.constant 0 : i32
    %c0_i32_1 = arith.constant 0 : i32
    return %c0_i32, %c0_i32_0 : i32, i32
  }
  func.func @transform_5(%arg0: i32) -> (i32, i32, i32) {
    %c0_i32 = arith.constant 0 : i32
    %c0_i32_0 = arith.constant 0 : i32
    %c0_i32_1 = arith.constant 0 : i32
    %c0_i32_2 = arith.constant 0 : i32
    return %c0_i32, %c0_i32_0, %c0_i32_1 : i32, i32, i32
  }
  func.func @transform_6(%arg0: i32) -> (i32, i32) {
    %c0_i32 = arith.constant 0 : i32
    %c0_i32_0 = arith.constant 0 : i32
    %c0_i32_1 = arith.constant 0 : i32
    return %c0_i32, %c0_i32_0 : i32, i32
  }
  func.func @transform_7(%arg0: i32) -> (i32, i32) {
    %c0_i32 = arith.constant 0 : i32
    %c0_i32_0 = arith.constant 0 : i32
    %c0_i32_1 = arith.constant 0 : i32
    return %c0_i32, %c0_i32_0 : i32, i32
  }
  func.func @transform_8(%arg0: i32) -> (i32, i32) {
    %c0_i32 = arith.constant 0 : i32
    %c0_i32_0 = arith.constant 0 : i32
    %c0_i32_1 = arith.constant 0 : i32
    return %c0_i32, %c0_i32_0 : i32, i32
  }
  func.func @transform_9(%arg0: i32) -> (i32, i32) {
    %c0_i32 = arith.constant 0 : i32
    %c0_i32_0 = arith.constant 0 : i32
    return %arg0, %c0_i32 : i32, i32
  }
}

</mosaic_0001>

<bundles_post_ra>
// kernel: lenet5_forward.1
= control target key start
LH: loop header
LB: loop body
LE: loop exit
PB: predicated region body
PF: predicated region fallthrough
CT: control target
= control target key end

     0   :  { %14 = vsyncpa [#allocation3], 0  ;;  %s8917_s30 = smov [#allocation2]   ;;  %s12033_s0 = inlined_call_operand.vmem [shape: bf16[1,192,256], index: 0, kind: input, shape index: {}]   ;;  %s12034_s1 = inlined_call_operand.vmem [shape: bf16[256,512], index: 1, kind: input, shape index: {}]   ;;  %s12035_s2 = inlined_call_operand.vmem [shape: f32[1,512], index: 2, kind: input, shape index: {}]   ;;  %s12036_s3 = inlined_call_operand.vmem [shape: bf16[5,256,512], index: 3, kind: input, shape index: {}]   ;;  %s12037_s4 = inlined_call_operand.vmem [shape: f32[1,512], index: 4, kind: input, shape index: {}]   ;;  %s12038_s5 = inlined_call_operand.hbm [shape: bf16[4,256,512], index: 5, kind: input, shape index: {}]   ;;  %s12039_s6 = inlined_call_operand.vmem [shape: f32[1,512], index: 6, kind: input, shape index: {}]   ;;  %s12040_s7 = inlined_call_operand.vmem [shape: bf16[512,128], index: 7, kind: input, shape index: {}]   ;;  %s12041_s8 = inlined_call_operand.vmem [shape: f32[1,128], index: 8, kind: input, shape index: {}]   ;;  %s12042_s9 = inlined_call_operand.vmem [shape: f32[8,128], index: 9, kind: output, shape index: {}]  }
   0x1   :  { %s30_s10 = sshll.u32 %s8917_s30, 4  ;;  %s31_s10 = int_to_ptr.vmem [resolvable:$true] %s30_s10 }
   0x2   :  { %s8903_s11 = scalar_lea.vmem %s31_s10, 32768  ;;  %p8908_p1 = scmp.lt.s32.totalorder %s31_s10, %s31_s10 }
   0x3   :  { %p8904_p0 = scmp.ne.s32.totalorder %s31_s10, %s8903_s11  ;;  %p8909_p2 = scmp.lt.s32.totalorder %s8903_s11, %s8903_s11 }
   0x5   :  { %p8910_p3 = por %p8909_p2, %p8908_p1 }
   0x7   :  { %p8911_p4 = pnand %p8910_p3, %p8904_p0 }
   0x9   :  { %8914 = shalt.err (!%p8911_p4)
}
   0xa   :  { %s8918_s12 = smov 256   ;;  %s8919_s13 = smov 16  }
   0xb   :  { %36 = dma.hbm_to_vmem [thread:$0]  %s12038_s5, 32768, %s31_s10, [#allocation3], %s8918_s12, %s8918_s12, %s8919_s13  }
   0xc   :  { %8915 = dma.done.wait [#allocation3], 32768  }
   0xd   :  { %8916 = vsyncadd [#allocation3], 4294934528  ;;  %v7547_v0 = vld [vmem:[%s12034_s1 + $0xe4] ss:$16 sps:$4 sm:$0xff]   ;;  %v7549_v1 = vld [vmem:[%s12034_s1 + $0xec] ss:$16 sps:$4 sm:$0xff]  }
   0xe   :  { %597 = vmatprep.subr.bf16.mxu0 %v7547_v0  ;;  %v7551_v2 = vld [vmem:[%s12034_s1 + $0xe0] ss:$16 sps:$4 sm:$0xff]   ;;  %v7552_v3 = vld [vmem:[%s12034_s1 + $0xe8] ss:$16 sps:$4 sm:$0xff]   ;;  %750 = vmatprep.subr.bf16.mxu1 %v7549_v1  ;;  %v7553_v4 = vld [vmem:[%s12034_s1 + $0xc4] ss:$16 sps:$4 sm:$0xff]  }
   0xf   :  { %598 = vmatpush1.bf16.msra.mxu0 %v7551_v2  ;;  %751 = vmatpush1.bf16.msra.mxu1 %v7552_v3  ;;  %v7555_v5 = vld [vmem:[%s12034_s1 + $0xcc] ss:$16 sps:$4 sm:$0xff]   ;;  %v7557_v6 = vld [vmem:[%s12034_s1 + $0xc0] ss:$16 sps:$4 sm:$0xff]   ;;  %v7558_v7 = vld [vmem:[%s12034_s1 + $0xc8] ss:$16 sps:$4 sm:$0xff]  }
  0x10   :  { %599 = vmatprep.subr.bf16.mxu0 %v7553_v4  ;;  %752 = vmatprep.subr.bf16.mxu1 %v7555_v5  ;;  %v7559_v8 = vld [vmem:[%s12034_s1 + $0xa4] ss:$16 sps:$4 sm:$0xff]   ;;  %v7561_v9 = vld [vmem:[%s12034_s1 + $0xac] ss:$16 sps:$4 sm:$0xff]   ;;  %v7563_v10 = vld [vmem:[%s12034_s1 + $0xa0] ss:$16 sps:$4 sm:$0xff]  }
  0x11   :  { %v7564_v11 = vld [vmem:[%s12034_s1 + $0xa8] ss:$16 sps:$4 sm:$0xff]   ;;  %v7565_v12 = vld [vmem:[%s12034_s1 + $0x84] ss:$16 sps:$4 sm:$0xff]   ;;  %v7567_v13 = vld [vmem:[%s12034_s1 + $0x8c] ss:$16 sps:$4 sm:$0xff]  }
  0x12   :  { %v7569_v14 = vld [vmem:[%s12034_s1 + $0x80] ss:$16 sps:$4 sm:$0xff]   ;;  %v7570_v15 = vld [vmem:[%s12034_s1 + $0x88] ss:$16 sps:$4 sm:$0xff]   ;;  %v7571_v16 = vld [vmem:[%s12034_s1 + $0x64] ss:$16 sps:$4 sm:$0xff]  }
  0x13   :  { %600 = vmatpush1.bf16.msra.mxu0 %v7557_v6  ;;  %753 = vmatpush1.bf16.msra.mxu1 %v7558_v7  ;;  %v7573_v17 = vld [vmem:[%s12034_s1 + $0x6c] ss:$16 sps:$4 sm:$0xff]   ;;  %v7575_v18 = vld [vmem:[%s12034_s1 + $0x60] ss:$16 sps:$4 sm:$0xff]   ;;  %v7576_v19 = vld [vmem:[%s12034_s1 + $0x68] ss:$16 sps:$4 sm:$0xff]  }
  0x14   :  { %601 = vmatprep.subr.bf16.mxu0 %v7559_v8  ;;  %754 = vmatprep.subr.bf16.mxu1 %v7561_v9  ;;  %v7577_v20 = vld [vmem:[%s12034_s1 + $0x44] ss:$16 sps:$4 sm:$0xff]   ;;  %v7579_v21 = vld [vmem:[%s12034_s1 + $0x4c] ss:$16 sps:$4 sm:$0xff]   ;;  %v7581_v22 = vld [vmem:[%s12034_s1 + $0x40] ss:$16 sps:$4 sm:$0xff]  }
  0x15   :  { %v7582_v23 = vld [vmem:[%s12034_s1 + $0x48] ss:$16 sps:$4 sm:$0xff]   ;;  %v7583_v24 = vld [vmem:[%s12034_s1 + $0x24] ss:$16 sps:$4 sm:$0xff]   ;;  %v7585_v25 = vld [vmem:[%s12034_s1 + $0x2c] ss:$16 sps:$4 sm:$0xff]  }
  0x16   :  { %v7587_v26 = vld [vmem:[%s12034_s1 + $0x20] ss:$16 sps:$4 sm:$0xff]   ;;  %v7588_v27 = vld [vmem:[%s12034_s1 + $0x28] ss:$16 sps:$4 sm:$0xff]   ;;  %v7589_v28 = vld [vmem:[%s12034_s1 + $0x4] ss:$16 sps:$4 sm:$0xff]  }
  0x17   :  { %602 = vmatpush1.bf16.msra.mxu0 %v7563_v10  ;;  %755 = vmatpush1.bf16.msra.mxu1 %v7564_v11  ;;  %v7591_v29 = vld [vmem:[%s12034_s1 + $0xc] ss:$16 sps:$4 sm:$0xff]   ;;  %v7593_v30 = vld [vmem:[%s12034_s1] ss:$16 sps:$4 sm:$0xff]   ;;  %v7594_v31 = vld [vmem:[%s12034_s1 + $0x8] ss:$16 sps:$4 sm:$0xff]  }
  0x18   :  { %603 = vmatprep.subr.bf16.mxu0 %v7565_v12  ;;  %756 = vmatprep.subr.bf16.mxu1 %v7567_v13  ;;  %v7595_v32 = vld [vmem:[%s12034_s1 + $0x1e4] ss:$16 sps:$4 sm:$0xff]   ;;  %v7597_v33 = vld [vmem:[%s12034_s1 + $0x1ec] ss:$16 sps:$4 sm:$0xff]   ;;  %v7599_v34 = vld [vmem:[%s12034_s1 + $0x1e0] ss:$16 sps:$4 sm:$0xff]  }
  0x19   :  { %v7600_v35 = vld [vmem:[%s12034_s1 + $0x1e8] ss:$16 sps:$4 sm:$0xff]   ;;  %v7601_v36 = vld [vmem:[%s12034_s1 + $0x1c4] ss:$16 sps:$4 sm:$0xff]   ;;  %v7603_v37 = vld [vmem:[%s12034_s1 + $0x1cc] ss:$16 sps:$4 sm:$0xff]  }
  0x1a   :  { %v7605_v38 = vld [vmem:[%s12034_s1 + $0x1c0] ss:$16 sps:$4 sm:$0xff]   ;;  %v7606_v39 = vld [vmem:[%s12034_s1 + $0x1c8] ss:$16 sps:$4 sm:$0xff]   ;;  %v7607_v40 = vld [vmem:[%s12034_s1 + $0x1a4] ss:$16 sps:$4 sm:$0xff]  }
  0x1b   :  { %604 = vmatpush1.bf16.msra.mxu0 %v7569_v14  ;;  %757 = vmatpush1.bf16.msra.mxu1 %v7570_v15  ;;  %v7609_v41 = vld [vmem:[%s12034_s1 + $0x1ac] ss:$16 sps:$4 sm:$0xff]   ;;  %v7611_v42 = vld [vmem:[%s12034_s1 + $0x1a0] ss:$16 sps:$4 sm:$0xff]   ;;  %v7612_v43 = vld [vmem:[%s12034_s1 + $0x1a8] ss:$16 sps:$4 sm:$0xff]  }
  0x1c   :  { %605 = vmatprep.subr.bf16.mxu0 %v7571_v16  ;;  %758 = vmatprep.subr.bf16.mxu1 %v7573_v17  ;;  %v7613_v44 = vld [vmem:[%s12034_s1 + $0x184] ss:$16 sps:$4 sm:$0xff]   ;;  %v7615_v45 = vld [vmem:[%s12034_s1 + $0x18c] ss:$16 sps:$4 sm:$0xff]   ;;  %v7617_v46 = vld [vmem:[%s12034_s1 + $0x180] ss:$16 sps:$4 sm:$0xff]  }
  0x1d   :  { %v7618_v47 = vld [vmem:[%s12034_s1 + $0x188] ss:$16 sps:$4 sm:$0xff]   ;;  %v7645_v48 = vld [vmem:[%s12033_s0 + $0x4] ss:$8 sps:$4 sm:$0xff]   ;;  %v7623_v51 = vld [vmem:[%s12034_s1 + $0x160] ss:$16 sps:$4 sm:$0xff]  }
  0x1e   :  { %v7619_v49 = vld [vmem:[%s12034_s1 + $0x164] ss:$16 sps:$4 sm:$0xff]   ;;  %v7621_v50 = vld [vmem:[%s12034_s1 + $0x16c] ss:$16 sps:$4 sm:$0xff]   ;;  %629 = vmatprep.mubr.bf16.mxu0 %v7645_v48  ;;  %782 = vmatprep.mubr.bf16.mxu1 %v7645_v48  ;;  %v7624_v52 = vld [vmem:[%s12034_s1 + $0x168] ss:$16 sps:$4 sm:$0xff]  }
  0x1f   :  { %606 = vmatpush1.bf16.msra.mxu0 %v7575_v18  ;;  %759 = vmatpush1.bf16.msra.mxu1 %v7576_v19  ;;  %v7625_v53 = vld [vmem:[%s12034_s1 + $0x144] ss:$16 sps:$4 sm:$0xff]   ;;  %v7627_v54 = vld [vmem:[%s12034_s1 + $0x14c] ss:$16 sps:$4 sm:$0xff]   ;;  %v7629_v55 = vld [vmem:[%s12034_s1 + $0x140] ss:$16 sps:$4 sm:$0xff]  }
  0x20   :  { %607 = vmatprep.subr.bf16.mxu0 %v7577_v20  ;;  %760 = vmatprep.subr.bf16.mxu1 %v7579_v21  ;;  %v7630_v56 = vld [vmem:[%s12034_s1 + $0x148] ss:$16 sps:$4 sm:$0xff]   ;;  %v7631_v57 = vld [vmem:[%s12034_s1 + $0x124] ss:$16 sps:$4 sm:$0xff]   ;;  %v7633_v58 = vld [vmem:[%s12034_s1 + $0x12c] ss:$16 sps:$4 sm:$0xff]  }
  0x21   :  { %v7635_v59 = vld [vmem:[%s12034_s1 + $0x120] ss:$16 sps:$4 sm:$0xff]   ;;  %v7636_v60 = vld [vmem:[%s12034_s1 + $0x128] ss:$16 sps:$4 sm:$0xff]   ;;  %v7637_v61 = vld [vmem:[%s12034_s1 + $0x104] ss:$16 sps:$4 sm:$0xff]  }
  0x22   :  { %v7639_v62 = vld [vmem:[%s12034_s1 + $0x10c] ss:$16 sps:$4 sm:$0xff]   ;;  %v7641_v63 = vld [vmem:[%s12034_s1 + $0x100] ss:$16 sps:$4 sm:$0xff]   ;;  %v7642_v0 = vld [vmem:[%s12034_s1 + $0x108] ss:$16 sps:$4 sm:$0xff]  }
  0x23   :  { %608 = vmatpush1.bf16.msra.mxu0 %v7581_v22  ;;  %761 = vmatpush1.bf16.msra.mxu1 %v7582_v23  ;;  %v7681_v1 = vld [vmem:[%s12036_s3 + $0x2e4] ss:$16 sps:$4 sm:$0xff]   ;;  %v7684_v2 = vld [vmem:[%s12036_s3 + $0x2ec] ss:$16 sps:$4 sm:$0xff]   ;;  %v7643_v3 = vld [vmem:[%s12033_s0] ss:$8 sps:$4 sm:$0xff]  }
  0x24   :  { %609 = vmatprep.subr.bf16.mxu0 %v7583_v24  ;;  %762 = vmatprep.subr.bf16.mxu1 %v7585_v25  ;;  %v7646_v4 = vld [vmem:[%s12033_s0 + $0x14] ss:$8 sps:$4 sm:$0xff]   ;;  %v7679_v5 = vld [vmem:[%s12036_s3 + $0x2e0] ss:$16 sps:$4 sm:$0xff]   ;;  %v7682_v6 = vld [vmem:[%s12036_s3 + $0x2e8] ss:$16 sps:$4 sm:$0xff]  }
  0x25   :  { %v7687_v7 = vld [vmem:[%s12036_s3 + $0x2c4] ss:$16 sps:$4 sm:$0xff]   ;;  %v7690_v8 = vld [vmem:[%s12036_s3 + $0x2cc] ss:$16 sps:$4 sm:$0xff]   ;;  %v7685_v9 = vld [vmem:[%s12036_s3 + $0x2c0] ss:$16 sps:$4 sm:$0xff]  }
  0x26   :  { %v7688_v10 = vld [vmem:[%s12036_s3 + $0x2c8] ss:$16 sps:$4 sm:$0xff]   ;;  %v7649_v12 = vld [vmem:[%s12033_s0 + $0x24] ss:$8 sps:$4 sm:$0xff]   ;;  %v7652_v14 = vld [vmem:[%s12033_s0 + $0x34] ss:$8 sps:$4 sm:$0xff]  }
  0x27   :  { %610 = vmatpush1.bf16.msra.mxu0 %v7587_v26  ;;  %763 = vmatpush1.bf16.msra.mxu1 %v7588_v27  ;;  %v7648_v11 = vld [vmem:[%s12033_s0 + $0x10] ss:$8 sps:$4 sm:$0xff]   ;;  %v7651_v13 = vld [vmem:[%s12033_s0 + $0x20] ss:$8 sps:$4 sm:$0xff]   ;;  %v7655_v16 = vld [vmem:[%s12033_s0 + $0x44] ss:$8 sps:$4 sm:$0xff]  }
  0x28   :  { %611 = vmatprep.subr.bf16.mxu0 %v7589_v28  ;;  %764 = vmatprep.subr.bf16.mxu1 %v7591_v29  ;;  %v7654_v15 = vld [vmem:[%s12033_s0 + $0x30] ss:$8 sps:$4 sm:$0xff]   ;;  %v7657_v17 = vld [vmem:[%s12033_s0 + $0x40] ss:$8 sps:$4 sm:$0xff]   ;;  %v7658_v18 = vld [vmem:[%s12033_s0 + $0x54] ss:$8 sps:$4 sm:$0xff]  }
  0x29   :  { %v7660_v19 = vld [vmem:[%s12033_s0 + $0x50] ss:$8 sps:$4 sm:$0xff]   ;;  %v7661_v20 = vld [vmem:[%s12033_s0 + $0x64] ss:$8 sps:$4 sm:$0xff]   ;;  %v7663_v21 = vld [vmem:[%s12033_s0 + $0x60] ss:$8 sps:$4 sm:$0xff]  }
  0x2a   :  { %v7664_v22 = vld [vmem:[%s12033_s0 + $0x74] ss:$8 sps:$4 sm:$0xff]   ;;  %v7666_v23 = vld [vmem:[%s12033_s0 + $0x70] ss:$8 sps:$4 sm:$0xff]   ;;  %v7667_v24 = vld [vmem:[%s12033_s0 + $0x84] ss:$8 sps:$4 sm:$0xff]  }
  0x2b   :  { %612 = vmatpush1.bf16.msra.mxu0 %v7593_v30  ;;  %765 = vmatpush1.bf16.msra.mxu1 %v7594_v31  ;;  %v7669_v25 = vld [vmem:[%s12033_s0 + $0x80] ss:$8 sps:$4 sm:$0xff]   ;;  %v7670_v26 = vld [vmem:[%s12033_s0 + $0x94] ss:$8 sps:$4 sm:$0xff]   ;;  %v7672_v27 = vld [vmem:[%s12033_s0 + $0x90] ss:$8 sps:$4 sm:$0xff]  }
  0x2c   :  { %613 = vmatprep.subr.bf16.mxu0 %v7595_v32  ;;  %766 = vmatprep.subr.bf16.mxu1 %v7597_v33  ;;  %v7673_v28 = vld [vmem:[%s12033_s0 + $0xa4] ss:$8 sps:$4 sm:$0xff]   ;;  %v7675_v29 = vld [vmem:[%s12033_s0 + $0xa0] ss:$8 sps:$4 sm:$0xff]   ;;  %v7676_v33 = vld [vmem:[%s12033_s0 + $0xb4] ss:$8 sps:$4 sm:$0xff]  }
  0x2d   :  { %v7691_v30 = vld [vmem:[%s12036_s3 + $0x2a0] ss:$16 sps:$4 sm:$0xff]   ;;  %v7693_v31 = vld [vmem:[%s12036_s3 + $0x2a4] ss:$16 sps:$4 sm:$0xff]   ;;  %v7694_v32 = vld [vmem:[%s12036_s3 + $0x2a8] ss:$16 sps:$4 sm:$0xff]  }
  0x2e   :  { %v7715_v48 = vld [vmem:[%s12036_s3 + $0x220] ss:$16 sps:$4 sm:$0xff]  }
  0x2f   :  { %614 = vmatpush2.bf16.msra.mxu0 %v7599_v34  ;;  %767 = vmatpush2.bf16.msra.mxu1 %v7600_v35  ;;  %v7696_v34 = vld [vmem:[%s12036_s3 + $0x2ac] ss:$16 sps:$4 sm:$0xff]   ;;  %v7697_v35 = vld [vmem:[%s12036_s3 + $0x280] ss:$16 sps:$4 sm:$0xff]  }
  0x30   :  { %615 = vmatprep.subr.bf16.mxu0 %v7601_v36  ;;  %768 = vmatprep.subr.bf16.mxu1 %v7603_v37  ;;  %v7699_v36 = vld [vmem:[%s12036_s3 + $0x284] ss:$16 sps:$4 sm:$0xff]   ;;  %v7700_v37 = vld [vmem:[%s12036_s3 + $0x288] ss:$16 sps:$4 sm:$0xff]  }
  0x33   :  { %616 = vmatpush2.bf16.msra.mxu0 %v7605_v38  ;;  %769 = vmatpush2.bf16.msra.mxu1 %v7606_v39  ;;  %v7702_v38 = vld [vmem:[%s12036_s3 + $0x28c] ss:$16 sps:$4 sm:$0xff]   ;;  %v7678_v39 = vld [vmem:[%s12033_s0 + $0xb0] ss:$8 sps:$4 sm:$0xff]  }
  0x34   :  { %617 = vmatprep.subr.bf16.mxu0 %v7607_v40  ;;  %770 = vmatprep.subr.bf16.mxu1 %v7609_v41  ;;  %v7703_v40 = vld [vmem:[%s12036_s3 + $0x260] ss:$16 sps:$4 sm:$0xff]   ;;  %v7705_v41 = vld [vmem:[%s12036_s3 + $0x264] ss:$16 sps:$4 sm:$0xff]  }
  0x37   :  { %618 = vmatpush2.bf16.msra.mxu0 %v7611_v42  ;;  %771 = vmatpush2.bf16.msra.mxu1 %v7612_v43  ;;  %v7706_v42 = vld [vmem:[%s12036_s3 + $0x268] ss:$16 sps:$4 sm:$0xff]   ;;  %v7708_v43 = vld [vmem:[%s12036_s3 + $0x26c] ss:$16 sps:$4 sm:$0xff]  }
  0x38   :  { %619 = vmatprep.subr.bf16.mxu0 %v7613_v44  ;;  %772 = vmatprep.subr.bf16.mxu1 %v7615_v45  ;;  %v7709_v44 = vld [vmem:[%s12036_s3 + $0x240] ss:$16 sps:$4 sm:$0xff]   ;;  %v7711_v45 = vld [vmem:[%s12036_s3 + $0x244] ss:$16 sps:$4 sm:$0xff]  }
  0x3b   :  { %620 = vmatpush2.bf16.msra.mxu0 %v7617_v46  ;;  %773 = vmatpush2.bf16.msra.mxu1 %v7618_v47  ;;  %v7712_v46 = vld [vmem:[%s12036_s3 + $0x248] ss:$16 sps:$4 sm:$0xff]   ;;  %v7714_v47 = vld [vmem:[%s12036_s3 + $0x24c] ss:$16 sps:$4 sm:$0xff]  }
  0x3c   :  { %621 = vmatprep.subr.bf16.mxu0 %v7619_v49  ;;  %774 = vmatprep.subr.bf16.mxu1 %v7621_v50  ;;  %v7717_v49 = vld [vmem:[%s12036_s3 + $0x224] ss:$16 sps:$4 sm:$0xff]   ;;  %v7718_v50 = vld [vmem:[%s12036_s3 + $0x228] ss:$16 sps:$4 sm:$0xff]  }
  0x3f   :  { %622 = vmatpush2.bf16.msra.mxu0 %v7623_v51  ;;  %775 = vmatpush2.bf16.msra.mxu1 %v7624_v52  ;;  %v7720_v51 = vld [vmem:[%s12036_s3 + $0x22c] ss:$16 sps:$4 sm:$0xff]   ;;  %v7721_v52 = vld [vmem:[%s12036_s3 + $0x200] ss:$16 sps:$4 sm:$0xff]  }
  0x40   :  { %623 = vmatprep.subr.bf16.mxu0 %v7625_v53  ;;  %776 = vmatprep.subr.bf16.mxu1 %v7627_v54  ;;  %v7723_v53 = vld [vmem:[%s12036_s3 + $0x204] ss:$16 sps:$4 sm:$0xff]   ;;  %v7724_v54 = vld [vmem:[%s12036_s3 + $0x208] ss:$16 sps:$4 sm:$0xff]  }
  0x43   :  { %624 = vmatpush2.bf16.msra.mxu0 %v7629_v55  ;;  %777 = vmatpush2.bf16.msra.mxu1 %v7630_v56  ;;  %v7726_v55 = vld [vmem:[%s12036_s3 + $0x20c] ss:$16 sps:$4 sm:$0xff]   ;;  %v7727_v56 = vld [vmem:[%s12036_s3 + $0x3e0] ss:$16 sps:$4 sm:$0xff]  }
  0x44   :  { %625 = vmatprep.subr.bf16.mxu0 %v7631_v57  ;;  %778 = vmatprep.subr.bf16.mxu1 %v7633_v58  ;;  %v7729_v57 = vld [vmem:[%s12036_s3 + $0x3e4] ss:$16 sps:$4 sm:$0xff]   ;;  %v7730_v58 = vld [vmem:[%s12036_s3 + $0x3e8] ss:$16 sps:$4 sm:$0xff]  }
  0x47   :  { %626 = vmatpush2.bf16.msra.mxu0 %v7635_v59  ;;  %779 = vmatpush2.bf16.msra.mxu1 %v7636_v60  ;;  %v7732_v59 = vld [vmem:[%s12036_s3 + $0x3ec] ss:$16 sps:$4 sm:$0xff]   ;;  %v7733_v60 = vld [vmem:[%s12036_s3 + $0x3c0] ss:$16 sps:$4 sm:$0xff]  }
  0x48   :  { %627 = vmatprep.subr.bf16.mxu0 %v7637_v61  ;;  %780 = vmatprep.subr.bf16.mxu1 %v7639_v62  ;;  %v7735_v61 = vld [vmem:[%s12036_s3 + $0x3c4] ss:$16 sps:$4 sm:$0xff]   ;;  %v7736_v62 = vld [vmem:[%s12036_s3 + $0x3c8] ss:$16 sps:$4 sm:$0xff]  }
  0x4b   :  { %628 = vmatpush2.bf16.msra.mxu0 %v7641_v63  ;;  %781 = vmatpush2.bf16.msra.mxu1 %v7642_v0  ;;  %v7738_v63 = vld [vmem:[%s12036_s3 + $0x3cc] ss:$16 sps:$4 sm:$0xff]   ;;  %v7739_v0 = vld [vmem:[%s12036_s3 + $0x3a0] ss:$16 sps:$4 sm:$0xff]  }
  0x4c   :  { %1541 = vmatprep.subr.bf16.mxu0 %v7681_v1  ;;  %1594 = vmatprep.subr.bf16.mxu1 %v7684_v2  ;;  %v7741_v1 = vld [vmem:[%s12036_s3 + $0x3a4] ss:$16 sps:$4 sm:$0xff]   ;;  %v7742_v2 = vld [vmem:[%s12036_s3 + $0x3a8] ss:$16 sps:$4 sm:$0xff]  }
  0x4e   :  { %630 = vmatmul.mubr.bf16.vlgmr.msra.gmra.mxu0 %v7643_v3  ;;  %783 = vmatmul.mubr.bf16.vlgmr.msra.gmra.mxu1 %v7643_v3  ;;  %v7744_v3 = vld [vmem:[%s12036_s3 + $0x3ac] ss:$16 sps:$4 sm:$0xff]  }
  0x4f   :  { %639 = vmatprep.mubr.bf16.mxu0 %v7646_v4  ;;  %792 = vmatprep.mubr.bf16.mxu1 %v7646_v4  ;;  %v7745_v4 = vld [vmem:[%s12036_s3 + $0x380] ss:$16 sps:$4 sm:$0xff]  }
  0x50   :  { %1542 = vmatpush1.bf16.msra.mxu0 %v7679_v5  ;;  %1595 = vmatpush1.bf16.msra.mxu1 %v7682_v6  ;;  %v7747_v5 = vld [vmem:[%s12036_s3 + $0x384] ss:$16 sps:$4 sm:$0xff]   ;;  %v7748_v6 = vld [vmem:[%s12036_s3 + $0x388] ss:$16 sps:$4 sm:$0xff]  }
  0x51   :  { %1543 = vmatprep.subr.bf16.mxu0 %v7687_v7  ;;  %1596 = vmatprep.subr.bf16.mxu1 %v7690_v8  ;;  %v7750_v7 = vld [vmem:[%s12036_s3 + $0x38c] ss:$16 sps:$4 sm:$0xff]   ;;  %v7751_v8 = vld [vmem:[%s12036_s3 + $0x360] ss:$16 sps:$4 sm:$0xff]  }
  0x54   :  { %1544 = vmatpush1.bf16.msra.mxu0 %v7685_v9  ;;  %1597 = vmatpush1.bf16.msra.mxu1 %v7688_v10  ;;  %v7753_v9 = vld [vmem:[%s12036_s3 + $0x364] ss:$16 sps:$4 sm:$0xff]   ;;  %v7754_v10 = vld [vmem:[%s12036_s3 + $0x368] ss:$16 sps:$4 sm:$0xff]  }
  0x55   :  { %1545 = vmatprep.subr.bf16.mxu0 %v7693_v31  ;;  %1598 = vmatprep.subr.bf16.mxu1 %v7696_v34 }
  0x56   :  { %640 = vmatmul.mubr.bf16.gmra.mxu0 %v7648_v11  ;;  %793 = vmatmul.mubr.bf16.gmra.mxu1 %v7648_v11  ;;  %v7756_v11 = vld [vmem:[%s12036_s3 + $0x36c] ss:$16 sps:$4 sm:$0xff]  }
  0x57   :  { %649 = vmatprep.mubr.bf16.mxu0 %v7649_v12  ;;  %802 = vmatprep.mubr.bf16.mxu1 %v7649_v12  ;;  %v7757_v12 = vld [vmem:[%s12036_s3 + $0x340] ss:$16 sps:$4 sm:$0xff]  }
  0x58   :  { %1546 = vmatpush1.bf16.msra.mxu0 %v7691_v30  ;;  %1599 = vmatpush1.bf16.msra.mxu1 %v7694_v32 }
  0x59   :  { %1547 = vmatprep.subr.bf16.mxu0 %v7699_v36  ;;  %1600 = vmatprep.subr.bf16.mxu1 %v7702_v38 }
  0x5c   :  { %1548 = vmatpush1.bf16.msra.mxu0 %v7697_v35  ;;  %1601 = vmatpush1.bf16.msra.mxu1 %v7700_v37 }
  0x5d   :  { %1549 = vmatprep.subr.bf16.mxu0 %v7705_v41  ;;  %1602 = vmatprep.subr.bf16.mxu1 %v7708_v43 }
  0x5e   :  { %650 = vmatmul.mubr.bf16.gmra.mxu0 %v7651_v13  ;;  %803 = vmatmul.mubr.bf16.gmra.mxu1 %v7651_v13  ;;  %v7759_v13 = vld [vmem:[%s12036_s3 + $0x344] ss:$16 sps:$4 sm:$0xff]  }
  0x5f   :  { %659 = vmatprep.mubr.bf16.mxu0 %v7652_v14  ;;  %812 = vmatprep.mubr.bf16.mxu1 %v7652_v14  ;;  %v7760_v14 = vld [vmem:[%s12036_s3 + $0x348] ss:$16 sps:$4 sm:$0xff]  }
  0x60   :  { %1550 = vmatpush1.bf16.msra.mxu0 %v7703_v40  ;;  %1603 = vmatpush1.bf16.msra.mxu1 %v7706_v42 }
  0x61   :  { %1551 = vmatprep.subr.bf16.mxu0 %v7711_v45  ;;  %1604 = vmatprep.subr.bf16.mxu1 %v7714_v47 }
  0x64   :  { %1552 = vmatpush1.bf16.msra.mxu0 %v7709_v44  ;;  %1605 = vmatpush1.bf16.msra.mxu1 %v7712_v46 }
  0x65   :  { %1553 = vmatprep.subr.bf16.mxu0 %v7717_v49  ;;  %1606 = vmatprep.subr.bf16.mxu1 %v7720_v51 }
  0x66   :  { %660 = vmatmul.mubr.bf16.gmra.mxu0 %v7654_v15  ;;  %813 = vmatmul.mubr.bf16.gmra.mxu1 %v7654_v15  ;;  %v7762_v15 = vld [vmem:[%s12036_s3 + $0x34c] ss:$16 sps:$4 sm:$0xff]  }
  0x67   :  { %669 = vmatprep.mubr.bf16.mxu0 %v7655_v16  ;;  %822 = vmatprep.mubr.bf16.mxu1 %v7655_v16  ;;  %v7765_v16 = vld [vmem:[%s12036_s3 + $0x324] ss:$16 sps:$4 sm:$0xff]  }
  0x68   :  { %1554 = vmatpush1.bf16.msra.mxu0 %v7715_v48  ;;  %1607 = vmatpush1.bf16.msra.mxu1 %v7718_v50 }
  0x69   :  { %1555 = vmatprep.subr.bf16.mxu0 %v7723_v53  ;;  %1608 = vmatprep.subr.bf16.mxu1 %v7726_v55 }
  0x6c   :  { %1556 = vmatpush1.bf16.msra.mxu0 %v7721_v52  ;;  %1609 = vmatpush1.bf16.msra.mxu1 %v7724_v54 }
  0x6d   :  { %1557 = vmatprep.subr.bf16.mxu0 %v7729_v57  ;;  %1610 = vmatprep.subr.bf16.mxu1 %v7732_v59 }
  0x6e   :  { %670 = vmatmul.mubr.bf16.gmra.mxu0 %v7657_v17  ;;  %823 = vmatmul.mubr.bf16.gmra.mxu1 %v7657_v17  ;;  %v7768_v17 = vld [vmem:[%s12036_s3 + $0x32c] ss:$16 sps:$4 sm:$0xff]  }
  0x6f   :  { %679 = vmatprep.mubr.bf16.mxu0 %v7658_v18  ;;  %832 = vmatprep.mubr.bf16.mxu1 %v7658_v18  ;;  %v7763_v18 = vld [vmem:[%s12036_s3 + $0x320] ss:$16 sps:$4 sm:$0xff]  }
  0x70   :  { %1558 = vmatpush2.bf16.msra.mxu0 %v7727_v56  ;;  %1611 = vmatpush2.bf16.msra.mxu1 %v7730_v58 }
  0x71   :  { %1559 = vmatprep.subr.bf16.mxu0 %v7735_v61  ;;  %1612 = vmatprep.subr.bf16.mxu1 %v7738_v63 }
  0x74   :  { %1560 = vmatpush2.bf16.msra.mxu0 %v7733_v60  ;;  %1613 = vmatpush2.bf16.msra.mxu1 %v7736_v62 }
  0x75   :  { %1561 = vmatprep.subr.bf16.mxu0 %v7741_v1  ;;  %1614 = vmatprep.subr.bf16.mxu1 %v7744_v3 }
  0x76   :  { %680 = vmatmul.mubr.bf16.gmra.mxu0 %v7660_v19  ;;  %833 = vmatmul.mubr.bf16.gmra.mxu1 %v7660_v19  ;;  %v7766_v19 = vld [vmem:[%s12036_s3 + $0x328] ss:$16 sps:$4 sm:$0xff]  }
  0x77   :  { %689 = vmatprep.mubr.bf16.mxu0 %v7661_v20  ;;  %842 = vmatprep.mubr.bf16.mxu1 %v7661_v20  ;;  %v7771_v20 = vld [vmem:[%s12036_s3 + $0x304] ss:$16 sps:$4 sm:$0xff]  }
  0x78   :  { %1562 = vmatpush2.bf16.msra.mxu0 %v7739_v0  ;;  %1615 = vmatpush2.bf16.msra.mxu1 %v7742_v2 }
  0x79   :  { %1563 = vmatprep.subr.bf16.mxu0 %v7747_v5  ;;  %1616 = vmatprep.subr.bf16.mxu1 %v7750_v7 }
  0x7c   :  { %1564 = vmatpush2.bf16.msra.mxu0 %v7745_v4  ;;  %1617 = vmatpush2.bf16.msra.mxu1 %v7748_v6 }
  0x7d   :  { %1565 = vmatprep.subr.bf16.mxu0 %v7753_v9  ;;  %1618 = vmatprep.subr.bf16.mxu1 %v7756_v11 }
  0x7e   :  { %690 = vmatmul.mubr.bf16.gmra.mxu0 %v7663_v21  ;;  %843 = vmatmul.mubr.bf16.gmra.mxu1 %v7663_v21  ;;  %v7774_v21 = vld [vmem:[%s12036_s3 + $0x30c] ss:$16 sps:$4 sm:$0xff]  }
  0x7f   :  { %699 = vmatprep.mubr.bf16.mxu0 %v7664_v22  ;;  %852 = vmatprep.mubr.bf16.mxu1 %v7664_v22  ;;  %v7769_v22 = vld [vmem:[%s12036_s3 + $0x300] ss:$16 sps:$4 sm:$0xff]  }
  0x80   :  { %1566 = vmatpush2.bf16.msra.mxu0 %v7751_v8  ;;  %1619 = vmatpush2.bf16.msra.mxu1 %v7754_v10 }
  0x81   :  { %1567 = vmatprep.subr.bf16.mxu0 %v7759_v13  ;;  %1620 = vmatprep.subr.bf16.mxu1 %v7762_v15 }
  0x84   :  { %1568 = vmatpush2.bf16.msra.mxu0 %v7757_v12  ;;  %1621 = vmatpush2.bf16.msra.mxu1 %v7760_v14 }
  0x85   :  { %1569 = vmatprep.subr.bf16.mxu0 %v7765_v16  ;;  %1622 = vmatprep.subr.bf16.mxu1 %v7768_v17 }
  0x86   :  { %700 = vmatmul.mubr.bf16.gmra.mxu0 %v7666_v23  ;;  %853 = vmatmul.mubr.bf16.gmra.mxu1 %v7666_v23  ;;  %v7772_v23 = vld [vmem:[%s12036_s3 + $0x308] ss:$16 sps:$4 sm:$0xff]  }
  0x87   :  { %709 = vmatprep.mubr.bf16.mxu0 %v7667_v24  ;;  %862 = vmatprep.mubr.bf16.mxu1 %v7667_v24  ;;  %v7777_v24 = vld [vmem:[%s12036_s3 + $0xe4] ss:$16 sps:$4 sm:$0xff]  }
  0x88   :  { %1570 = vmatpush2.bf16.msra.mxu0 %v7763_v18  ;;  %1623 = vmatpush2.bf16.msra.mxu1 %v7766_v19 }
  0x89   :  { %1571 = vmatprep.subr.bf16.mxu0 %v7771_v20  ;;  %1624 = vmatprep.subr.bf16.mxu1 %v7774_v21 }
  0x8c   :  { %1572 = vmatpush2.bf16.msra.mxu0 %v7769_v22  ;;  %1625 = vmatpush2.bf16.msra.mxu1 %v7772_v23 }
  0x8d   :  { %1967 = vmatprep.subr.bf16.mxu0 %v7777_v24 }
  0x8e   :  { %710 = vmatmul.mubr.bf16.gmra.mxu0 %v7669_v25  ;;  %863 = vmatmul.mubr.bf16.gmra.mxu1 %v7669_v25  ;;  %v7780_v25 = vld [vmem:[%s12036_s3 + $0xec] ss:$16 sps:$4 sm:$0xff]  }
  0x8f   :  { %719 = vmatprep.mubr.bf16.mxu0 %v7670_v26  ;;  %872 = vmatprep.mubr.bf16.mxu1 %v7670_v26  ;;  %v137_v26 = vlaneseq }
  0x90   :  { %2020 = vmatprep.subr.bf16.mxu1 %v7780_v25 }
  0x96   :  { %720 = vmatmul.mubr.bf16.gmra.mxu0 %v7672_v27  ;;  %873 = vmatmul.mubr.bf16.gmra.mxu1 %v7672_v27  ;;  %v138_v27 = vshrl.u32 %v137_v26, 7 }
  0x97   :  { %729 = vmatprep.mubr.bf16.mxu0 %v7673_v28  ;;  %882 = vmatprep.mubr.bf16.mxu1 %v7673_v28  ;;  %v135_v28 = vld [vmem:[%s12035_s2] sm:$0xf] }
  0x98   :  { %v9440_v30 = vsub.s32 2, %v138_v27  ;;  %v9442_v31 = vsub.s32 1, %v138_v27  ;;  %v9444_v32 = vsub.s32 3, %v138_v27 }
  0x9a   :  { %12049 = vst [vmem:[#allocation5_spill] sm:$0xff] %v9440_v30  ;;  %12050 = vst [vmem:[#allocation6_spill] sm:$0xff] %v9442_v31  ;;  %v9450_v34 = vrot.slane %v135_v28, %v9440_v30  ;;  %v9453_v35 = vrot.slane %v135_v28, %v9442_v31  ;;  %v9456_v36 = vrot.slane %v135_v28, %v9444_v32 }
  0x9b   :  { %12051 = vst [vmem:[#allocation7_spill] sm:$0xff] %v9444_v32 }
  0x9e   :  { %730 = vmatmul.mubr.bf16.gmra.mxu0 %v7675_v29  ;;  %883 = vmatmul.mubr.bf16.gmra.mxu1 %v7675_v29  ;;  %v9438_v29 = vsub.s32 0, %v138_v27 }
  0x9f   :  { %739 = vmatprep.mubr.bf16.mxu0 %v7676_v33  ;;  %892 = vmatprep.mubr.bf16.mxu1 %v7676_v33 }
  0xa0   :  { %v9447_v33 = vrot.slane %v135_v28, %v9438_v29 }
  0xa6   :  { %740 = vmatmul.mubr.bf16.gmra.mxu0 %v7678_v39  ;;  %893 = vmatmul.mubr.bf16.gmra.mxu1 %v7678_v39 }
 0x10e   :  { %v631_v37 = vpop.f32.mrf.mxu0  ;;  %v784_v38 = vpop.f32.mrf.mxu1 }
 0x10f   :  { %v632_v39 = vadd.f32 %v631_v37, %v9447_v33  ;;  %v785_v40 = vadd.f32 %v784_v38, %v9450_v34 }
 0x110   :  { %v633_v41 = vpop.f32.mrf.mxu0  ;;  %v786_v42 = vpop.f32.mrf.mxu1 }
 0x111   :  { %v903_v43 = vmax.f32 %v632_v39, 0.0  ;;  %v905_v44 = vmax.f32 %v785_v40, 0.0  ;;  %v634_v45 = vadd.f32 %v633_v41, %v9453_v35  ;;  %v787_v46 = vadd.f32 %v786_v42, %v9456_v36 }
 0x112   :  { %v635_v47 = vpop.f32.mrf.mxu0  ;;  %v788_v48 = vpop.f32.mrf.mxu1 }
 0x113   :  { %v9462_v49 = vmax.f32 %v903_v43, %v905_v44  ;;  %v904_v50 = vmax.f32 %v634_v45, 0.0  ;;  %v906_v51 = vmax.f32 %v787_v46, 0.0  ;;  %v636_v52 = vadd.f32 %v635_v47, %v9447_v33 }
 0x114   :  { %v789_v53 = vadd.f32 %v788_v48, %v9450_v34  ;;  %v9466_v54 = vpop.f32.mrf.mxu0  ;;  %v9468_v55 = vpop.f32.mrf.mxu1 }
 0x115   :  { %v9470_v56 = vmax.f32 %v904_v50, %v906_v51  ;;  %v907_v57 = vmax.f32 %v636_v52, 0.0 }
 0x116   :  { %v909_v58 = vmax.f32 %v789_v53, 0.0  ;;  %v641_v59 = vpop.f32.mrf.mxu0  ;;  %v794_v60 = vpop.f32.mrf.mxu1 }
 0x117   :  { %v642_v61 = vadd.f32 %v641_v59, %v9447_v33  ;;  %v795_v62 = vadd.f32 %v794_v60, %v9450_v34 }
 0x118   :  { %v9474_v63 = vmax.f32 %v907_v57, %v909_v58  ;;  %v643_v0 = vpop.f32.mrf.mxu0  ;;  %v796_v1 = vpop.f32.mrf.mxu1 }
 0x119   :  { %v911_v2 = vmax.f32 %v642_v61, 0.0  ;;  %v913_v3 = vmax.f32 %v795_v62, 0.0  ;;  %v644_v4 = vadd.f32 %v643_v0, %v9453_v35  ;;  %v797_v5 = vadd.f32 %v796_v1, %v9456_v36 }
 0x11a   :  { %v645_v6 = vpop.f32.mrf.mxu0  ;;  %v798_v7 = vpop.f32.mrf.mxu1 }
 0x11b   :  { %v9478_v8 = vmax.f32 %v911_v2, %v913_v3  ;;  %v912_v9 = vmax.f32 %v644_v4, 0.0  ;;  %v646_v10 = vadd.f32 %v645_v6, %v9447_v33  ;;  %v799_v11 = vadd.f32 %v798_v7, %v9450_v34 }
 0x11c   :  { %v914_v12 = vmax.f32 %v797_v5, 0.0  ;;  %v9482_v13 = vpop.f32.mrf.mxu0  ;;  %v9484_v14 = vpop.f32.mrf.mxu1  ;;  %v638_v7 = vadd.f32 %v9466_v54, %v9453_v35 }
 0x11d   :  { %v915_v15 = vmax.f32 %v646_v10, 0.0  ;;  %v917_v16 = vmax.f32 %v799_v11, 0.0 }
 0x11e   :  { %v9486_v17 = vmax.f32 %v912_v9, %v914_v12  ;;  %v651_v18 = vpop.f32.mrf.mxu0  ;;  %v804_v19 = vpop.f32.mrf.mxu1  ;;  %v791_v9 = vadd.f32 %v9468_v55, %v9456_v36 }
 0x11f   :  { %v9488_v20 = vmax.f32 %v915_v15, %v917_v16  ;;  %v652_v21 = vadd.f32 %v651_v18, %v9447_v33  ;;  %v805_v22 = vadd.f32 %v804_v19, %v9450_v34 }
 0x120   :  { %v653_v23 = vpop.f32.mrf.mxu0  ;;  %v806_v24 = vpop.f32.mrf.mxu1 }
 0x121   :  { %v919_v25 = vmax.f32 %v652_v21, 0.0  ;;  %v654_v26 = vadd.f32 %v653_v23, %v9453_v35  ;;  %v807_v27 = vadd.f32 %v806_v24, %v9456_v36  ;;  %v921_v28 = vmax.f32 %v805_v22, 0.0 }
 0x122   :  { %v655_v37 = vpop.f32.mrf.mxu0  ;;  %v808_v38 = vpop.f32.mrf.mxu1 }
 0x123   :  { %v920_v39 = vmax.f32 %v654_v26, 0.0  ;;  %v922_v40 = vmax.f32 %v807_v27, 0.0  ;;  %v656_v41 = vadd.f32 %v655_v37, %v9447_v33  ;;  %v809_v42 = vadd.f32 %v808_v38, %v9450_v34 }
 0x124   :  { %v9496_v43 = vmax.f32 %v919_v25, %v921_v28  ;;  %v9498_v44 = vpop.f32.mrf.mxu0  ;;  %v9500_v45 = vpop.f32.mrf.mxu1  ;;  %v908_v27 = vmax.f32 %v638_v7, 0.0 }
 0x125   :  { %v9502_v46 = vmax.f32 %v920_v39, %v922_v40  ;;  %v923_v47 = vmax.f32 %v656_v41, 0.0  ;;  %v925_v48 = vmax.f32 %v809_v42, 0.0 }
 0x126   :  { %v661_v50 = vpop.f32.mrf.mxu0  ;;  %v814_v51 = vpop.f32.mrf.mxu1 }
 0x127   :  { %v9504_v52 = vmax.f32 %v923_v47, %v925_v48  ;;  %v662_v53 = vadd.f32 %v661_v50, %v9447_v33  ;;  %v815_v57 = vadd.f32 %v814_v51, %v9450_v34  ;;  %v648_v48 = vadd.f32 %v9482_v13, %v9453_v35 }
 0x128   :  { %v663_v58 = vpop.f32.mrf.mxu0  ;;  %v816_v59 = vpop.f32.mrf.mxu1 }
 0x129   :  { %v927_v60 = vmax.f32 %v662_v53, 0.0  ;;  %v929_v61 = vmax.f32 %v815_v57, 0.0  ;;  %v664_v62 = vadd.f32 %v663_v58, %v9453_v35  ;;  %v817_v0 = vadd.f32 %v816_v59, %v9456_v36 }
 0x12a   :  { %v665_v1 = vpop.f32.mrf.mxu0  ;;  %v818_v2 = vpop.f32.mrf.mxu1  ;;  %v916_v7 = vmax.f32 %v648_v48, 0.0 }
 0x12b   :  { %v1011_v3 = vmax.f32 %v927_v60, %v929_v61  ;;  %v928_v4 = vmax.f32 %v664_v62, 0.0  ;;  %v930_v5 = vmax.f32 %v817_v0, 0.0  ;;  %v666_v6 = vadd.f32 %v665_v1, %v9447_v33 }
 0x12c   :  { %v819_v10 = vadd.f32 %v818_v2, %v9450_v34  ;;  %v667_v11 = vpop.f32.mrf.mxu0  ;;  %v820_v12 = vpop.f32.mrf.mxu1  ;;  %v801_v0 = vadd.f32 %v9484_v14, %v9456_v36 }
 0x12d   :  { %v1023_v15 = vmax.f32 %v9462_v49, %v1011_v3  ;;  %v9517_v16 = vmax.f32 %v928_v4, %v930_v5  ;;  %v931_v18 = vmax.f32 %v666_v6, 0.0  ;;  %v668_v19 = vadd.f32 %v667_v11, %v9453_v35 }
 0x12e   :  { %v933_v21 = vmax.f32 %v819_v10, 0.0  ;;  %v821_v22 = vadd.f32 %v820_v12, %v9456_v36  ;;  %v671_v23 = vpop.f32.mrf.mxu0  ;;  %v824_v24 = vpop.f32.mrf.mxu1  ;;  %v910_v49 = vmax.f32 %v791_v9, 0.0 }
 0x12f   :  { %v932_v55 = vmax.f32 %v668_v19, 0.0  ;;  %v672_v25 = vadd.f32 %v671_v23, %v9447_v33  ;;  %v825_v26 = vadd.f32 %v824_v24, %v9450_v34 }
 0x130   :  { %v1013_v28 = vmax.f32 %v931_v18, %v933_v21  ;;  %v934_v37 = vmax.f32 %v821_v22, 0.0  ;;  %v673_v38 = vpop.f32.mrf.mxu0  ;;  %v826_v39 = vpop.f32.mrf.mxu1  ;;  %v1002_v62 = vmax.f32 %v908_v27, %v910_v49  ;;  %v918_v21 = vmax.f32 %v801_v0, 0.0 }
 0x131   :  { %v935_v40 = vmax.f32 %v672_v25, 0.0  ;;  %v937_v41 = vmax.f32 %v825_v26, 0.0  ;;  %v674_v42 = vadd.f32 %v673_v38, %v9453_v35  ;;  %v827_v47 = vadd.f32 %v826_v39, %v9456_v36 }
 0x132   :  { %v1025_v50 = vmax.f32 %v9474_v63, %v1013_v28  ;;  %v1014_v51 = vmax.f32 %v932_v55, %v934_v37  ;;  %v675_v53 = vpop.f32.mrf.mxu0  ;;  %v828_v57 = vpop.f32.mrf.mxu1 }
 0x133   :  { %v1015_v58 = vmax.f32 %v935_v40, %v937_v41  ;;  %v936_v59 = vmax.f32 %v674_v42, 0.0  ;;  %v938_v60 = vmax.f32 %v827_v47, 0.0  ;;  %v676_v61 = vadd.f32 %v675_v53, %v9447_v33 }
 0x134   :  { %v9533_v1 = vpack.c.bf16 %v1025_v50, %v1023_v15  ;;  %v829_v2 = vadd.f32 %v828_v57, %v9450_v34  ;;  %v677_v3 = vpop.f32.mrf.mxu0  ;;  %v830_v13 = vpop.f32.mrf.mxu1  ;;  %v9539_v18 = vmax.f32 %v1002_v62, %v1014_v51 }
 0x135   :  { %v1027_v63 = vmax.f32 %v9478_v8, %v1015_v58  ;;  %v1016_v4 = vmax.f32 %v936_v59, %v938_v60  ;;  %v939_v5 = vmax.f32 %v676_v61, 0.0  ;;  %v678_v6 = vadd.f32 %v677_v3, %v9453_v35 }
 0x136   :  { %v941_v9 = vmax.f32 %v829_v2, 0.0  ;;  %v831_v10 = vadd.f32 %v830_v13, %v9456_v36  ;;  %v681_v11 = vpop.f32.mrf.mxu0  ;;  %v834_v12 = vpop.f32.mrf.mxu1  ;;  %v1006_v58 = vmax.f32 %v916_v7, %v918_v21 }
 0x137   :  { %v9541_v14 = vpack.c.bf16 %v1027_v63, %v1025_v50  ;;  %v9544_v15 = vmax.f32 %v9486_v17, %v1016_v4  ;;  %v940_v19 = vmax.f32 %v678_v6, 0.0  ;;  %v682_v8 = vadd.f32 %v681_v11, %v9447_v33 }
 0x138   :  { %v1017_v22 = vmax.f32 %v939_v5, %v941_v9  ;;  %v942_v23 = vmax.f32 %v831_v10, 0.0  ;;  %v835_v24 = vadd.f32 %v834_v12, %v9450_v34  ;;  %v683_v55 = vpop.f32.mrf.mxu0  ;;  %v836_v25 = vpop.f32.mrf.mxu1 }
 0x139   :  { %v943_v26 = vmax.f32 %v682_v8, 0.0  ;;  %v684_v27 = vadd.f32 %v683_v55, %v9453_v35  ;;  %v837_v49 = vadd.f32 %v836_v25, %v9456_v36  ;;  %v9552_v28 = vpack.c.bf16 %v9544_v15, %v9539_v18 }
 0x13a   :  { %v1029_v17 = vmax.f32 %v9488_v20, %v1017_v22  ;;  %v1018_v37 = vmax.f32 %v940_v19, %v942_v23  ;;  %v945_v38 = vmax.f32 %v835_v24, 0.0  ;;  %v685_v39 = vpop.f32.mrf.mxu0  ;;  %v838_v40 = vpop.f32.mrf.mxu1 }
 0x13b   :  { %v944_v41 = vmax.f32 %v684_v27, 0.0  ;;  %v946_v42 = vmax.f32 %v837_v49, 0.0  ;;  %v686_v47 = vadd.f32 %v685_v39, %v9447_v33  ;;  %v839_v48 = vadd.f32 %v838_v40, %v9450_v34 }
 0x13c   :  { %v9557_v50 = vpack.c.bf16 %v1029_v17, %v1027_v63  ;;  %v1019_v51 = vmax.f32 %v943_v26, %v945_v38  ;;  %v9559_v53 = vpop.f32.mrf.mxu0  ;;  %v9561_v57 = vpop.f32.mrf.mxu1  ;;  %v9564_v2 = vmax.f32 %v1006_v58, %v1018_v37 }
 0x13d   :  { %v1020_v59 = vmax.f32 %v944_v41, %v946_v42  ;;  %v947_v20 = vmax.f32 %v686_v47, 0.0  ;;  %v949_v60 = vmax.f32 %v839_v48, 0.0 }
 0x13e   :  { %v1031_v61 = vmax.f32 %v9496_v43, %v1019_v51  ;;  %v691_v62 = vpop.f32.mrf.mxu0  ;;  %v844_v0 = vpop.f32.mrf.mxu1 }
 0x13f   :  { %v9567_v3 = vmax.f32 %v9502_v46, %v1020_v59  ;;  %v1021_v13 = vmax.f32 %v947_v20, %v949_v60  ;;  %v9579_v8 = vadd.f32 %v691_v62, %v9447_v33  ;;  %v9582_v21 = vadd.f32 %v844_v0, %v9450_v34 }
 0x140   :  { %v9569_v63 = vpack.c.bf16 %v1031_v61, %v1029_v17  ;;  %v693_v4 = vpop.f32.mrf.mxu0  ;;  %v846_v5 = vpop.f32.mrf.mxu1 }
 0x141   :  { %v9573_v6 = vpack.c.bf16 %v9567_v3, %v9564_v2  ;;  %v1033_v7 = vmax.f32 %v9504_v52, %v1021_v13  ;;  %v9585_v24 = vadd.f32 %v693_v4, %v9453_v35  ;;  %v9588_v52 = vadd.f32 %v846_v5, %v9456_v36 }
 0x142   :  { %v695_v9 = vpop.f32.mrf.mxu0  ;;  %v848_v43 = vpop.f32.mrf.mxu1  ;;  %v951_v49 = vmax.f32 %v9579_v8, 0.0  ;;  %v953_v17 = vmax.f32 %v9582_v21, 0.0 }
 0x143   :  { %v9576_v10 = vpack.c.bf16 %v1033_v7, %v1031_v61  ;;  %v9591_v26 = vadd.f32 %v695_v9, %v9447_v33  ;;  %v9594_v27 = vadd.f32 %v848_v43, %v9450_v34 }
 0x144   :  { %v697_v11 = vpop.f32.mrf.mxu0  ;;  %v850_v12 = vpop.f32.mrf.mxu1 }
 0x145   :  { %v9599_v37 = vadd.f32 %v697_v11, %v9453_v35  ;;  %v851_v60 = vadd.f32 %v850_v12, %v9456_v36 }
 0x146   :  { %v701_v19 = vpop.f32.mrf.mxu0  ;;  %v854_v46 = vpop.f32.mrf.mxu1 }
 0x147   :  { %v956_v20 = vmax.f32 %v9599_v37, 0.0  ;;  %v9610_v61 = vadd.f32 %v701_v19, %v9447_v33  ;;  %v9613_v62 = vadd.f32 %v854_v46, %v9450_v34  ;;  %v958_v37 = vmax.f32 %v851_v60, 0.0 }
 0x148   :  { %v703_v22 = vpop.f32.mrf.mxu0  ;;  %v856_v23 = vpop.f32.mrf.mxu1 }
 0x149   :  { %v9618_v43 = vadd.f32 %v703_v22, %v9453_v35  ;;  %v961_v22 = vmax.f32 %v9613_v62, 0.0 }
 0x14a   :  { %v705_v55 = vpop.f32.mrf.mxu0  ;;  %v858_v25 = vpop.f32.mrf.mxu1 }
 0x14c   :  { %v707_v38 = vpop.f32.mrf.mxu0  ;;  %v860_v39 = vpop.f32.mrf.mxu1 }
 0x14d   :  { %v708_v48 = vadd.f32 %v707_v38, %v9453_v35  ;;  %v861_v62 = vadd.f32 %v860_v39, %v9456_v36 }
 0x14e   :  { %v711_v42 = vpop.f32.mrf.mxu0  ;;  %v864_v47 = vpop.f32.mrf.mxu1 }
 0x14f   :  { %v712_v58 = vadd.f32 %v711_v42, %v9447_v33  ;;  %v865_v59 = vadd.f32 %v864_v47, %v9450_v34  ;;  %v959_v42 = vmax.f32 %v9610_v61, 0.0  ;;  %v857_v47 = vadd.f32 %v856_v23, %v9456_v36 }
 0x150   :  { %v713_v0 = vpop.f32.mrf.mxu0  ;;  %v866_v13 = vpop.f32.mrf.mxu1  ;;  %v706_v61 = vadd.f32 %v705_v55, %v9447_v33  ;;  %v859_v23 = vadd.f32 %v858_v25, %v9450_v34  ;;  %v9643_v55 = vmax.f32 %v951_v49, %v953_v17  ;;  %v12055_v49 = vmax.f32 %v9585_v24, 0.0 }
 0x151   :  { %v967_v4 = vmax.f32 %v712_v58, 0.0  ;;  %v969_v5 = vmax.f32 %v865_v59, 0.0  ;;  %v714_v7 = vadd.f32 %v713_v0, %v9453_v35  ;;  %v867_v9 = vadd.f32 %v866_v13, %v9456_v36 }
 0x152   :  { %v715_v11 = vpop.f32.mrf.mxu0  ;;  %v868_v8 = vpop.f32.mrf.mxu1  ;;  %v962_v54 = vmax.f32 %v857_v47, 0.0  ;;  %v965_v47 = vmax.f32 %v859_v23, 0.0  ;;  %v12056_v23 = vmax.f32 %v9594_v27, 0.0 }
 0x153   :  { %v9620_v12 = vmax.f32 %v967_v4, %v969_v5  ;;  %v968_v19 = vmax.f32 %v714_v7, 0.0  ;;  %v970_v21 = vmax.f32 %v867_v9, 0.0  ;;  %v716_v46 = vadd.f32 %v715_v11, %v9447_v33 }
 0x154   :  { %v869_v58 = vadd.f32 %v868_v8, %v9450_v34  ;;  %v9626_v59 = vpop.f32.mrf.mxu0  ;;  %v9628_v0 = vpop.f32.mrf.mxu1  ;;  %v960_v5 = vmax.f32 %v9618_v43, 0.0 }
 0x155   :  { %12052 = vst [vmem:[#allocation8_spill] sm:$0xff] %v9626_v59  ;;  %12053 = vst [vmem:[#allocation9_spill] sm:$0xff] %v9628_v0  ;;  %v9631_v13 = vmax.f32 %v968_v19, %v970_v21  ;;  %v971_v4 = vmax.f32 %v716_v46, 0.0 }
 0x156   :  { %v973_v7 = vmax.f32 %v869_v58, 0.0  ;;  %v721_v9 = vpop.f32.mrf.mxu0  ;;  %v874_v60 = vpop.f32.mrf.mxu1 }
 0x157   :  { %v722_v11 = vadd.f32 %v721_v9, %v9447_v33  ;;  %v875_v8 = vadd.f32 %v874_v60, %v9450_v34  ;;  %v963_v60 = vmax.f32 %v706_v61, 0.0 }
 0x158   :  { %v9640_v19 = vmax.f32 %v971_v4, %v973_v7  ;;  %v723_v21 = vpop.f32.mrf.mxu0  ;;  %v876_v43 = vpop.f32.mrf.mxu1  ;;  %v964_v4 = vmax.f32 %v708_v48, 0.0  ;;  %v966_v7 = vmax.f32 %v861_v62, 0.0  ;;  %v1038_v48 = vmax.f32 %v956_v20, %v958_v37 }
 0x159   :  { %v975_v46 = vmax.f32 %v722_v11, 0.0  ;;  %v977_v58 = vmax.f32 %v875_v8, 0.0  ;;  %v724_v51 = vadd.f32 %v723_v21, %v9453_v35  ;;  %v877_v25 = vadd.f32 %v876_v43, %v9456_v36 }
 0x15a   :  { %v725_v9 = vpop.f32.mrf.mxu0  ;;  %v878_v40 = vpop.f32.mrf.mxu1  ;;  %v12054_v21 = vmax.f32 %v9588_v52, 0.0 }
 0x15b   :  { %v726_v38 = vadd.f32 %v725_v9, %v9447_v33  ;;  %v879_v39 = vadd.f32 %v878_v40, %v9450_v34  ;;  %v976_v41 = vmax.f32 %v724_v51, 0.0  ;;  %v978_v0 = vmax.f32 %v877_v25, 0.0 }
 0x15c   :  { %v727_v11 = vpop.f32.mrf.mxu0  ;;  %v880_v8 = vpop.f32.mrf.mxu1  ;;  %v1036_v17 = vmax.f32 %v12055_v49, %v12054_v21  ;;  %v12057_v9 = vmax.f32 %v9591_v26, 0.0  ;;  %v1047_v62 = vmax.f32 %v975_v46, %v977_v58  ;;  %v1040_v21 = vmax.f32 %v960_v5, %v962_v54 }
 0x15d   :  { %v979_v43 = vmax.f32 %v726_v38, 0.0  ;;  %v981_v59 = vmax.f32 %v879_v39, 0.0  ;;  %v728_v61 = vadd.f32 %v727_v11, %v9453_v35  ;;  %v881_v51 = vadd.f32 %v880_v8, %v9456_v36 }
 0x15e   :  { %v1037_v40 = vmax.f32 %v12057_v9, %v12056_v23  ;;  %v731_v25 = vpop.f32.mrf.mxu0  ;;  %v884_v32 = vpop.f32.mrf.mxu1  ;;  %v1039_v39 = vmax.f32 %v959_v42, %v961_v22  ;;  %v1048_v11 = vmax.f32 %v976_v41, %v978_v0  ;;  %v1041_v26 = vmax.f32 %v963_v60, %v965_v47 }
 0x15f   :  { %v1049_v31 = vmax.f32 %v979_v43, %v981_v59  ;;  %v980_v52 = vmax.f32 %v728_v61, 0.0  ;;  %v732_v24 = vadd.f32 %v731_v25, %v9447_v33  ;;  %v885_v38 = vadd.f32 %v884_v32, %v9450_v34 }
 0x160   :  { %v982_v49 = vmax.f32 %v881_v51, 0.0  ;;  %v733_v27 = vpop.f32.mrf.mxu0  ;;  %v886_v30 = vpop.f32.mrf.mxu1  ;;  %v1042_v46 = vmax.f32 %v964_v4, %v966_v7  ;;  %v1059_v32 = vmax.f32 %v9643_v55, %v1047_v62  ;;  %v1060_v0 = vmax.f32 %v1036_v17, %v1048_v11 }
 0x161   :  { %v983_v23 = vmax.f32 %v732_v24, 0.0  ;;  %v985_v20 = vmax.f32 %v885_v38, 0.0  ;;  %v734_v37 = vadd.f32 %v733_v27, %v9453_v35  ;;  %v1061_v58 = vmax.f32 %v1037_v40, %v1049_v31  ;;  %v7775_v31 = vld [vmem:[%s12036_s3 + $0xe0] ss:$16 sps:$4 sm:$0xff]   ;;  %v7783_v40 = vld [vmem:[%s12036_s3 + $0xc4] ss:$16 sps:$4 sm:$0xff]  }
 0x162   :  { %v1050_v8 = vmax.f32 %v980_v52, %v982_v49  ;;  %v887_v59 = vadd.f32 %v886_v30, %v9456_v36  ;;  %v735_v43 = vpop.f32.mrf.mxu0  ;;  %v888_v61 = vpop.f32.mrf.mxu1  ;;  %v7778_v30 = vld [vmem:[%s12036_s3 + $0xe8] ss:$16 sps:$4 sm:$0xff]  }
 0x163   :  { %v1051_v42 = vmax.f32 %v983_v23, %v985_v20  ;;  %v984_v54 = vmax.f32 %v734_v37, 0.0  ;;  %v736_v41 = vadd.f32 %v735_v43, %v9447_v33  ;;  %v889_v60 = vadd.f32 %v888_v61, %v9450_v34 }
 0x164   :  { %v1062_v22 = vmax.f32 %v1038_v48, %v1050_v8  ;;  %v986_v5 = vmax.f32 %v887_v59, 0.0  ;;  %v737_v47 = vpop.f32.mrf.mxu0  ;;  %v890_v9 = vpop.f32.mrf.mxu1  ;;  %v7786_v48 = vld [vmem:[%s12036_s3 + $0xcc] ss:$16 sps:$4 sm:$0xff]   ;;  %v9679_v62 = vpack.c.bf16 %v1061_v58, %v1059_v32 }
 0x165   :  { %v1063_v55 = vmax.f32 %v1039_v39, %v1051_v42  ;;  %v987_v4 = vmax.f32 %v736_v41, 0.0  ;;  %v738_v7 = vadd.f32 %v737_v47, %v9453_v35  ;;  %v891_v17 = vadd.f32 %v890_v9, %v9456_v36  ;;  %v7784_v42 = vld [vmem:[%s12036_s3 + $0xc8] ss:$16 sps:$4 sm:$0xff]  }
 0x166   :  { %v9681_v51 = vpack.c.bf16 %v1062_v22, %v1060_v0  ;;  %v1052_v25 = vmax.f32 %v984_v54, %v986_v5  ;;  %v989_v52 = vmax.f32 %v889_v60, 0.0  ;;  %v741_v24 = vpop.f32.mrf.mxu0  ;;  %v894_v38 = vpop.f32.mrf.mxu1 }
 0x167   :  { %v9683_v39 = vpack.c.bf16 %v1063_v55, %v1061_v58  ;;  %v988_v11 = vmax.f32 %v738_v7, 0.0  ;;  %v990_v49 = vmax.f32 %v891_v17, 0.0  ;;  %v742_v27 = vadd.f32 %v741_v24, %v9447_v33 }
 0x168   :  { %v1064_v23 = vmax.f32 %v1040_v21, %v1052_v25  ;;  %v1053_v20 = vmax.f32 %v987_v4, %v989_v52  ;;  %v895_v37 = vadd.f32 %v894_v38, %v9450_v34  ;;  %1573 = vmatprep.mubr.bf16.mxu0 %v9681_v51  ;;  %1626 = vmatprep.mubr.bf16.mxu1 %v9681_v51  ;;  %v743_v8 = vpop.f32.mrf.mxu0  ;;  %v896_v59 = vpop.f32.mrf.mxu1  ;;  %v7781_v21 = vld [vmem:[%s12036_s3 + $0xc0] ss:$16 sps:$4 sm:$0xff]  }
 0x169   :  { %v1054_v43 = vmax.f32 %v988_v11, %v990_v49  ;;  %v991_v61 = vmax.f32 %v742_v27, 0.0  ;;  %v744_v32 = vadd.f32 %v743_v8, %v9453_v35  ;;  %v897_v58 = vadd.f32 %v896_v59, %v9456_v36  ;;  %1574 = vmatmul.mubr.bf16.vlgmr.msra.gmra.mxu0 %v9679_v62  ;;  %1627 = vmatmul.mubr.bf16.vlgmr.msra.gmra.mxu1 %v9679_v62  ;;  %v7795_v11 = vld [vmem:[%s12036_s3 + $0x84] ss:$16 sps:$4 sm:$0xff]   ;;  %v7802_v8 = vld [vmem:[%s12036_s3 + $0x68] ss:$16 sps:$4 sm:$0xff]  }
 0x16a   :  { %v9699_v54 = vpack.c.bf16 %v1064_v23, %v1062_v22  ;;  %v1065_v41 = vmax.f32 %v1041_v26, %v1053_v20  ;;  %v993_v0 = vmax.f32 %v895_v37, 0.0  ;;  %1968 = vmatpush1.bf16.msra.mxu0 %v7775_v31  ;;  %2021 = vmatpush1.bf16.msra.mxu1 %v7778_v30  ;;  %v745_v5 = vpop.f32.mrf.mxu0  ;;  %v898_v60 = vpop.f32.mrf.mxu1  ;;  %v7789_v22 = vld [vmem:[%s12036_s3 + $0xa4] ss:$16 sps:$4 sm:$0xff]   ;;  %v7792_v26 = vld [vmem:[%s12036_s3 + $0xac] ss:$16 sps:$4 sm:$0xff]   ;;  %v12058_v49 = vmax.f32 %v9470_v56, %v9517_v16 }
 0x16b   :  { %v1066_v47 = vmax.f32 %v1042_v46, %v1054_v43  ;;  %v992_v9 = vmax.f32 %v744_v32, 0.0  ;;  %v994_v4 = vmax.f32 %v897_v58, 0.0  ;;  %v746_v7 = vadd.f32 %v745_v5, %v9447_v33  ;;  %1969 = vmatprep.subr.bf16.mxu0 %v7783_v40  ;;  %2022 = vmatprep.subr.bf16.mxu1 %v7786_v48  ;;  %v7790_v40 = vld [vmem:[%s12036_s3 + $0xa8] ss:$16 sps:$4 sm:$0xff]   ;;  %v7793_v20 = vld [vmem:[%s12036_s3 + $0x80] ss:$16 sps:$4 sm:$0xff]  }
 0x16c   :  { %v1055_v17 = vmax.f32 %v991_v61, %v993_v0  ;;  %v899_v25 = vadd.f32 %v898_v60, %v9450_v34  ;;  %v7787_v34 = vld [vmem:[%s12036_s3 + $0xa0] ss:$16 sps:$4 sm:$0xff]   ;;  %v9718_v48 = vpack.c.bf16 %v1065_v41, %v1063_v55  ;;  %v7798_v55 = vld [vmem:[%s12036_s3 + $0x8c] ss:$16 sps:$4 sm:$0xff]   ;;  %v1072_v27 = vpack.c.bf16 %v9539_v18, %v12058_v49  ;;  %v7796_v37 = vld [vmem:[%s12036_s3 + $0x88] ss:$16 sps:$4 sm:$0xff]  }
 0x16d   :  { %v9709_v31 = vpack.c.bf16 %v1066_v47, %v1064_v23  ;;  %v1056_v46 = vmax.f32 %v992_v9, %v994_v4  ;;  %v995_v30 = vmax.f32 %v746_v7, 0.0  ;;  %v7801_v56 = vld [vmem:[%s12036_s3 + $0x64] ss:$16 sps:$4 sm:$0xff]   ;;  %v7804_v16 = vld [vmem:[%s12036_s3 + $0x6c] ss:$16 sps:$4 sm:$0xff]  }
 0x16e   :  { %v1067_v52 = vmax.f32 %v9620_v12, %v1055_v17  ;;  %v997_v33 = vmax.f32 %v899_v25, 0.0  ;;  %1970 = vmatpush1.bf16.msra.mxu0 %v7781_v21  ;;  %2023 = vmatpush1.bf16.msra.mxu1 %v7784_v42  ;;  %v7807_v59 = vld [vmem:[%s12036_s3 + $0x44] ss:$16 sps:$4 sm:$0xff]   ;;  %v7810_v43 = vld [vmem:[%s12036_s3 + $0x4c] ss:$16 sps:$4 sm:$0xff]  }
 0x16f   :  { %v9721_v24 = vmax.f32 %v9631_v13, %v1056_v46  ;;  %1583 = vmatprep.mubr.bf16.mxu0 %v9709_v31  ;;  %1636 = vmatprep.mubr.bf16.mxu1 %v9709_v31  ;;  %v7805_v61 = vld [vmem:[%s12036_s3 + $0x40] ss:$16 sps:$4 sm:$0xff]   ;;  %v7808_v32 = vld [vmem:[%s12036_s3 + $0x48] ss:$16 sps:$4 sm:$0xff]   ;;  %v7813_v58 = vld [vmem:[%s12036_s3 + $0x24] ss:$16 sps:$4 sm:$0xff]  }
 0x170   :  { %v9725_v12 = vpack.c.bf16 %v1067_v52, %v1065_v41  ;;  %v1057_v38 = vmax.f32 %v995_v30, %v997_v33  ;;  %1971 = vmatprep.subr.bf16.mxu0 %v7789_v22  ;;  %2024 = vmatprep.subr.bf16.mxu1 %v7792_v26  ;;  %v7816_v21 = vld [vmem:[%s12036_s3 + $0x2c] ss:$16 sps:$4 sm:$0xff]   ;;  %v7811_v42 = vld [vmem:[%s12036_s3 + $0x20] ss:$16 sps:$4 sm:$0xff]   ;;  %v7814_v41 = vld [vmem:[%s12036_s3 + $0x28] ss:$16 sps:$4 sm:$0xff]  }
 0x171   :  { %v9734_v13 = vpack.c.bf16 %v9721_v24, %v1066_v47  ;;  %1584 = vmatmul.mubr.bf16.gmra.mxu0 %v9718_v48  ;;  %1637 = vmatmul.mubr.bf16.gmra.mxu1 %v9718_v48  ;;  %v7819_v0 = vld [vmem:[%s12036_s3 + $0x4] ss:$16 sps:$4 sm:$0xff]   ;;  %v7822_v5 = vld [vmem:[%s12036_s3 + $0xc] ss:$16 sps:$4 sm:$0xff]   ;;  %v7817_v60 = vld [vmem:[%s12036_s3] ss:$16 sps:$4 sm:$0xff]  }
 0x172   :  { %v1069_v23 = vmax.f32 %v9640_v19, %v1057_v38  ;;  %1972 = vmatpush1.bf16.msra.mxu0 %v7787_v34  ;;  %2025 = vmatpush1.bf16.msra.mxu1 %v7790_v40  ;;  %v7799_v19 = vld [vmem:[%s12036_s3 + $0x60] ss:$16 sps:$4 sm:$0xff]   ;;  %v7820_v47 = vld [vmem:[%s12036_s3 + $0x8] ss:$16 sps:$4 sm:$0xff]   ;;  %v7825_v9 = vld [vmem:[%s12036_s3 + $0x1e4] ss:$16 sps:$4 sm:$0xff]  }
 0x173   :  { %1999 = vmatprep.mubr.bf16.mxu0 %v1072_v27  ;;  %2052 = vmatprep.mubr.bf16.mxu1 %v1072_v27  ;;  %v7828_v4 = vld [vmem:[%s12036_s3 + $0x1ec] ss:$16 sps:$4 sm:$0xff]   ;;  %v7823_v7 = vld [vmem:[%s12036_s3 + $0x1e0] ss:$16 sps:$4 sm:$0xff]   ;;  %v7826_v17 = vld [vmem:[%s12036_s3 + $0x1e8] ss:$16 sps:$4 sm:$0xff]  }
 0x174   :  { %v9755_v18 = vpack.c.bf16 %v1069_v23, %v1067_v52  ;;  %1973 = vmatprep.subr.bf16.mxu0 %v7795_v11  ;;  %2026 = vmatprep.subr.bf16.mxu1 %v7798_v55  ;;  %v7831_v25 = vld [vmem:[%s12036_s3 + $0x1c4] ss:$16 sps:$4 sm:$0xff]   ;;  %v7834_v22 = vld [vmem:[%s12036_s3 + $0x1cc] ss:$16 sps:$4 sm:$0xff]   ;;  %v7829_v26 = vld [vmem:[%s12036_s3 + $0x1c0] ss:$16 sps:$4 sm:$0xff]  }
 0x175   :  { %v7832_v46 = vld [vmem:[%s12036_s3 + $0x1c8] ss:$16 sps:$4 sm:$0xff]   ;;  %v7837_v30 = vld [vmem:[%s12036_s3 + $0x1a4] ss:$16 sps:$4 sm:$0xff]   ;;  %v7840_v52 = vld [vmem:[%s12036_s3 + $0x1ac] ss:$16 sps:$4 sm:$0xff]  }
 0x176   :  { %1974 = vmatpush1.bf16.msra.mxu0 %v7793_v20  ;;  %2027 = vmatpush1.bf16.msra.mxu1 %v7796_v37  ;;  %v7835_v33 = vld [vmem:[%s12036_s3 + $0x1a0] ss:$16 sps:$4 sm:$0xff]   ;;  %v7838_v34 = vld [vmem:[%s12036_s3 + $0x1a8] ss:$16 sps:$4 sm:$0xff]   ;;  %v7843_v40 = vld [vmem:[%s12036_s3 + $0x184] ss:$16 sps:$4 sm:$0xff]  }
 0x177   :  { %1975 = vmatprep.subr.bf16.mxu0 %v7801_v56  ;;  %2028 = vmatprep.subr.bf16.mxu1 %v7804_v16  ;;  %v7846_v38 = vld [vmem:[%s12036_s3 + $0x18c] ss:$16 sps:$4 sm:$0xff]   ;;  %v7841_v11 = vld [vmem:[%s12036_s3 + $0x180] ss:$16 sps:$4 sm:$0xff]   ;;  %v7844_v55 = vld [vmem:[%s12036_s3 + $0x188] ss:$16 sps:$4 sm:$0xff]  }
 0x178   :  { %v7849_v49 = vld [vmem:[%s12036_s3 + $0x164] ss:$16 sps:$4 sm:$0xff]   ;;  %v7852_v27 = vld [vmem:[%s12036_s3 + $0x16c] ss:$16 sps:$4 sm:$0xff]   ;;  %v7847_v23 = vld [vmem:[%s12036_s3 + $0x160] ss:$16 sps:$4 sm:$0xff]  }
 0x179   :  { %v7850_v20 = vld [vmem:[%s12036_s3 + $0x168] ss:$16 sps:$4 sm:$0xff]   ;;  %v7855_v37 = vld [vmem:[%s12036_s3 + $0x144] ss:$16 sps:$4 sm:$0xff]   ;;  %v7858_v56 = vld [vmem:[%s12036_s3 + $0x14c] ss:$16 sps:$4 sm:$0xff]  }
 0x17a   :  { %1976 = vmatpush1.bf16.msra.mxu0 %v7799_v19  ;;  %2029 = vmatpush1.bf16.msra.mxu1 %v7802_v8  ;;  %v7853_v16 = vld [vmem:[%s12036_s3 + $0x140] ss:$16 sps:$4 sm:$0xff]   ;;  %v7856_v19 = vld [vmem:[%s12036_s3 + $0x148] ss:$16 sps:$4 sm:$0xff]   ;;  %v7861_v8 = vld [vmem:[%s12036_s3 + $0x124] ss:$16 sps:$4 sm:$0xff]  }
 0x17b   :  { %1977 = vmatprep.subr.bf16.mxu0 %v7807_v59  ;;  %2030 = vmatprep.subr.bf16.mxu1 %v7810_v43  ;;  %v7864_v59 = vld [vmem:[%s12036_s3 + $0x12c] ss:$16 sps:$4 sm:$0xff]   ;;  %v7859_v43 = vld [vmem:[%s12036_s3 + $0x120] ss:$16 sps:$4 sm:$0xff]  }
 0x17e   :  { %1978 = vmatpush1.bf16.msra.mxu0 %v7805_v61  ;;  %2031 = vmatpush1.bf16.msra.mxu1 %v7808_v32  ;;  %v7862_v61 = vld [vmem:[%s12036_s3 + $0x128] ss:$16 sps:$4 sm:$0xff]   ;;  %v7867_v32 = vld [vmem:[%s12036_s3 + $0x104] ss:$16 sps:$4 sm:$0xff]  }
 0x17f   :  { %1979 = vmatprep.subr.bf16.mxu0 %v7813_v58  ;;  %2032 = vmatprep.subr.bf16.mxu1 %v7816_v21  ;;  %v7870_v58 = vld [vmem:[%s12036_s3 + $0x10c] ss:$16 sps:$4 sm:$0xff]   ;;  %v7865_v21 = vld [vmem:[%s12036_s3 + $0x100] ss:$16 sps:$4 sm:$0xff]  }
 0x182   :  { %1980 = vmatpush1.bf16.msra.mxu0 %v7811_v42  ;;  %2033 = vmatpush1.bf16.msra.mxu1 %v7814_v41  ;;  %v7868_v42 = vld [vmem:[%s12036_s3 + $0x108] ss:$16 sps:$4 sm:$0xff]   ;;  %v7873_v41 = vld [vmem:[%s12036_s3 + $0x4e4] ss:$16 sps:$4 sm:$0xff]  }
 0x183   :  { %1981 = vmatprep.subr.bf16.mxu0 %v7819_v0  ;;  %2034 = vmatprep.subr.bf16.mxu1 %v7822_v5  ;;  %v7876_v0 = vld [vmem:[%s12036_s3 + $0x4ec] ss:$16 sps:$4 sm:$0xff]   ;;  %v7871_v5 = vld [vmem:[%s12036_s3 + $0x4e0] ss:$16 sps:$4 sm:$0xff]  }
 0x186   :  { %1982 = vmatpush1.bf16.msra.mxu0 %v7817_v60  ;;  %2035 = vmatpush1.bf16.msra.mxu1 %v7820_v47  ;;  %v7874_v60 = vld [vmem:[%s12036_s3 + $0x4e8] ss:$16 sps:$4 sm:$0xff]   ;;  %v9909_v47 = vpack.c.bf16 %v9564_v2, %v9544_v15  ;;  %v7877_v15 = vld [vmem:[%s12036_s3 + $0x4c0] ss:$16 sps:$4 sm:$0xff]  }
 0x187   :  { %1983 = vmatprep.subr.bf16.mxu0 %v7825_v9  ;;  %2036 = vmatprep.subr.bf16.mxu1 %v7828_v4  ;;  %v7879_v9 = vld [vmem:[%s12036_s3 + $0x4c4] ss:$16 sps:$4 sm:$0xff]   ;;  %v7882_v4 = vld [vmem:[%s12036_s3 + $0x4cc] ss:$16 sps:$4 sm:$0xff]   ;;  %v7880_v2 = vld [vmem:[%s12036_s3 + $0x4c8] ss:$16 sps:$4 sm:$0xff]  }
 0x18a   :  { %1984 = vmatpush2.bf16.msra.mxu0 %v7823_v7  ;;  %2037 = vmatpush2.bf16.msra.mxu1 %v7826_v17  ;;  %v7888_v7 = vld [vmem:[%s12036_s3 + $0x4ac] ss:$16 sps:$4 sm:$0xff]   ;;  %v7883_v17 = vld [vmem:[%s12036_s3 + $0x4a0] ss:$16 sps:$4 sm:$0xff]  }
 0x18b   :  { %1985 = vmatprep.subr.bf16.mxu0 %v7831_v25  ;;  %2038 = vmatprep.subr.bf16.mxu1 %v7834_v22  ;;  %v7886_v25 = vld [vmem:[%s12036_s3 + $0x4a8] ss:$16 sps:$4 sm:$0xff]   ;;  %v7891_v22 = vld [vmem:[%s12036_s3 + $0x484] ss:$16 sps:$4 sm:$0xff]  }
 0x18e   :  { %1986 = vmatpush2.bf16.msra.mxu0 %v7829_v26  ;;  %2039 = vmatpush2.bf16.msra.mxu1 %v7832_v46  ;;  %v7894_v26 = vld [vmem:[%s12036_s3 + $0x48c] ss:$16 sps:$4 sm:$0xff]   ;;  %v7889_v46 = vld [vmem:[%s12036_s3 + $0x480] ss:$16 sps:$4 sm:$0xff]  }
 0x18f   :  { %1987 = vmatprep.subr.bf16.mxu0 %v7837_v30  ;;  %2040 = vmatprep.subr.bf16.mxu1 %v7840_v52  ;;  %v7892_v30 = vld [vmem:[%s12036_s3 + $0x488] ss:$16 sps:$4 sm:$0xff]   ;;  %v7897_v52 = vld [vmem:[%s12036_s3 + $0x464] ss:$16 sps:$4 sm:$0xff]  }
 0x192   :  { %1988 = vmatpush2.bf16.msra.mxu0 %v7835_v33  ;;  %2041 = vmatpush2.bf16.msra.mxu1 %v7838_v34  ;;  %v7900_v33 = vld [vmem:[%s12036_s3 + $0x46c] ss:$16 sps:$4 sm:$0xff]   ;;  %v7895_v34 = vld [vmem:[%s12036_s3 + $0x460] ss:$16 sps:$4 sm:$0xff]  }
 0x193   :  { %1989 = vmatprep.subr.bf16.mxu0 %v7843_v40  ;;  %2042 = vmatprep.subr.bf16.mxu1 %v7846_v38  ;;  %v7898_v40 = vld [vmem:[%s12036_s3 + $0x468] ss:$16 sps:$4 sm:$0xff]   ;;  %v7903_v38 = vld [vmem:[%s12036_s3 + $0x444] ss:$16 sps:$4 sm:$0xff]  }
 0x196   :  { %1990 = vmatpush2.bf16.msra.mxu0 %v7841_v11  ;;  %2043 = vmatpush2.bf16.msra.mxu1 %v7844_v55  ;;  %v7906_v11 = vld [vmem:[%s12036_s3 + $0x44c] ss:$16 sps:$4 sm:$0xff]   ;;  %v7901_v55 = vld [vmem:[%s12036_s3 + $0x440] ss:$16 sps:$4 sm:$0xff]  }
 0x197   :  { %1991 = vmatprep.subr.bf16.mxu0 %v7849_v49  ;;  %2044 = vmatprep.subr.bf16.mxu1 %v7852_v27  ;;  %v7904_v49 = vld [vmem:[%s12036_s3 + $0x448] ss:$16 sps:$4 sm:$0xff]   ;;  %v7909_v27 = vld [vmem:[%s12036_s3 + $0x424] ss:$16 sps:$4 sm:$0xff]  }
 0x19a   :  { %1992 = vmatpush2.bf16.msra.mxu0 %v7847_v23  ;;  %2045 = vmatpush2.bf16.msra.mxu1 %v7850_v20  ;;  %v7912_v23 = vld [vmem:[%s12036_s3 + $0x42c] ss:$16 sps:$4 sm:$0xff]   ;;  %v7907_v20 = vld [vmem:[%s12036_s3 + $0x420] ss:$16 sps:$4 sm:$0xff]  }
 0x19b   :  { %1993 = vmatprep.subr.bf16.mxu0 %v7855_v37  ;;  %2046 = vmatprep.subr.bf16.mxu1 %v7858_v56  ;;  %v7910_v37 = vld [vmem:[%s12036_s3 + $0x428] ss:$16 sps:$4 sm:$0xff]   ;;  %v7915_v56 = vld [vmem:[%s12036_s3 + $0x404] ss:$16 sps:$4 sm:$0xff]  }
 0x19e   :  { %1994 = vmatpush2.bf16.msra.mxu0 %v7853_v16  ;;  %2047 = vmatpush2.bf16.msra.mxu1 %v7856_v19  ;;  %v7918_v16 = vld [vmem:[%s12036_s3 + $0x40c] ss:$16 sps:$4 sm:$0xff]   ;;  %v7913_v19 = vld [vmem:[%s12036_s3 + $0x400] ss:$16 sps:$4 sm:$0xff]  }
 0x19f   :  { %1995 = vmatprep.subr.bf16.mxu0 %v7861_v8  ;;  %2048 = vmatprep.subr.bf16.mxu1 %v7864_v59  ;;  %v7916_v8 = vld [vmem:[%s12036_s3 + $0x408] ss:$16 sps:$4 sm:$0xff]   ;;  %v7921_v59 = vld [vmem:[%s12036_s3 + $0x5e4] ss:$16 sps:$4 sm:$0xff]  }
 0x1a2   :  { %1996 = vmatpush2.bf16.msra.mxu0 %v7859_v43  ;;  %2049 = vmatpush2.bf16.msra.mxu1 %v7862_v61  ;;  %v7924_v43 = vld [vmem:[%s12036_s3 + $0x5ec] ss:$16 sps:$4 sm:$0xff]   ;;  %v7919_v61 = vld [vmem:[%s12036_s3 + $0x5e0] ss:$16 sps:$4 sm:$0xff]  }
 0x1a3   :  { %1997 = vmatprep.subr.bf16.mxu0 %v7867_v32  ;;  %2050 = vmatprep.subr.bf16.mxu1 %v7870_v58  ;;  %v7922_v32 = vld [vmem:[%s12036_s3 + $0x5e8] ss:$16 sps:$4 sm:$0xff]   ;;  %v7927_v58 = vld [vmem:[%s12036_s3 + $0x5c4] ss:$16 sps:$4 sm:$0xff]  }
 0x1a6   :  { %1998 = vmatpush2.bf16.msra.mxu0 %v7865_v21  ;;  %2051 = vmatpush2.bf16.msra.mxu1 %v7868_v42  ;;  %v7930_v21 = vld [vmem:[%s12036_s3 + $0x5cc] ss:$16 sps:$4 sm:$0xff]   ;;  %v7925_v42 = vld [vmem:[%s12036_s3 + $0x5c0] ss:$16 sps:$4 sm:$0xff]  }
 0x1a7   :  { %2458 = vmatprep.subr.bf16.mxu0 %v7873_v41  ;;  %2511 = vmatprep.subr.bf16.mxu1 %v7876_v0  ;;  %v7928_v41 = vld [vmem:[%s12036_s3 + $0x5c8] ss:$16 sps:$4 sm:$0xff]   ;;  %v7933_v0 = vld [vmem:[%s12036_s3 + $0x5a4] ss:$16 sps:$4 sm:$0xff]  }
 0x1a9   :  { %2000 = vmatmul.mubr.bf16.vlgmr.msra.gmra.mxu0 %v9533_v1  ;;  %2053 = vmatmul.mubr.bf16.vlgmr.msra.gmra.mxu1 %v9533_v1  ;;  %v7885_v1 = vld [vmem:[%s12036_s3 + $0x4a4] ss:$16 sps:$4 sm:$0xff]  }
 0x1aa   :  { %2009 = vmatprep.mubr.bf16.mxu0 %v9909_v47  ;;  %2062 = vmatprep.mubr.bf16.mxu1 %v9909_v47 }
 0x1ab   :  { %2459 = vmatpush1.bf16.msra.mxu0 %v7871_v5  ;;  %2512 = vmatpush1.bf16.msra.mxu1 %v7874_v60  ;;  %v7936_v5 = vld [vmem:[%s12036_s3 + $0x5ac] ss:$16 sps:$4 sm:$0xff]   ;;  %v7931_v60 = vld [vmem:[%s12036_s3 + $0x5a0] ss:$16 sps:$4 sm:$0xff]  }
 0x1ac   :  { %2460 = vmatprep.subr.bf16.mxu0 %v7879_v9  ;;  %2513 = vmatprep.subr.bf16.mxu1 %v7882_v4  ;;  %v7934_v9 = vld [vmem:[%s12036_s3 + $0x5a8] ss:$16 sps:$4 sm:$0xff]   ;;  %v7939_v4 = vld [vmem:[%s12036_s3 + $0x584] ss:$16 sps:$4 sm:$0xff]  }
 0x1af   :  { %2461 = vmatpush1.bf16.msra.mxu0 %v7877_v15  ;;  %2514 = vmatpush1.bf16.msra.mxu1 %v7880_v2  ;;  %v7942_v15 = vld [vmem:[%s12036_s3 + $0x58c] ss:$16 sps:$4 sm:$0xff]   ;;  %v7937_v2 = vld [vmem:[%s12036_s3 + $0x580] ss:$16 sps:$4 sm:$0xff]  }
 0x1b0   :  { %2462 = vmatprep.subr.bf16.mxu0 %v7885_v1  ;;  %2515 = vmatprep.subr.bf16.mxu1 %v7888_v7  ;;  %v7940_v1 = vld [vmem:[%s12036_s3 + $0x588] ss:$16 sps:$4 sm:$0xff]   ;;  %v7945_v7 = vld [vmem:[%s12036_s3 + $0x564] ss:$16 sps:$4 sm:$0xff]  }
 0x1b1   :  { %2010 = vmatmul.mubr.bf16.gmra.mxu0 %v9557_v50  ;;  %2063 = vmatmul.mubr.bf16.gmra.mxu1 %v9557_v50 }
 0x1b2   :  { %2490 = vmatprep.mubr.bf16.mxu0 %v9552_v28  ;;  %2543 = vmatprep.mubr.bf16.mxu1 %v9552_v28 }
 0x1b3   :  { %2463 = vmatpush1.bf16.msra.mxu0 %v7883_v17  ;;  %2516 = vmatpush1.bf16.msra.mxu1 %v7886_v25  ;;  %v7948_v17 = vld [vmem:[%s12036_s3 + $0x56c] ss:$16 sps:$4 sm:$0xff]   ;;  %v7943_v25 = vld [vmem:[%s12036_s3 + $0x560] ss:$16 sps:$4 sm:$0xff]  }
 0x1b4   :  { %2464 = vmatprep.subr.bf16.mxu0 %v7891_v22  ;;  %2517 = vmatprep.subr.bf16.mxu1 %v7894_v26  ;;  %v7946_v22 = vld [vmem:[%s12036_s3 + $0x568] ss:$16 sps:$4 sm:$0xff]   ;;  %v7951_v26 = vld [vmem:[%s12036_s3 + $0x544] ss:$16 sps:$4 sm:$0xff]  }
 0x1b7   :  { %2465 = vmatpush1.bf16.msra.mxu0 %v7889_v46  ;;  %2518 = vmatpush1.bf16.msra.mxu1 %v7892_v30  ;;  %v7954_v46 = vld [vmem:[%s12036_s3 + $0x54c] ss:$16 sps:$4 sm:$0xff]   ;;  %v7949_v30 = vld [vmem:[%s12036_s3 + $0x540] ss:$16 sps:$4 sm:$0xff]  }
 0x1b8   :  { %2466 = vmatprep.subr.bf16.mxu0 %v7897_v52  ;;  %2519 = vmatprep.subr.bf16.mxu1 %v7900_v33  ;;  %v7952_v52 = vld [vmem:[%s12036_s3 + $0x548] ss:$16 sps:$4 sm:$0xff]   ;;  %v7957_v33 = vld [vmem:[%s12036_s3 + $0x524] ss:$16 sps:$4 sm:$0xff]  }
 0x1bb   :  { %2467 = vmatpush1.bf16.msra.mxu0 %v7895_v34  ;;  %2520 = vmatpush1.bf16.msra.mxu1 %v7898_v40  ;;  %v7960_v34 = vld [vmem:[%s12036_s3 + $0x52c] ss:$16 sps:$4 sm:$0xff]   ;;  %v7955_v40 = vld [vmem:[%s12036_s3 + $0x520] ss:$16 sps:$4 sm:$0xff]  }
 0x1bc   :  { %2468 = vmatprep.subr.bf16.mxu0 %v7903_v38  ;;  %2521 = vmatprep.subr.bf16.mxu1 %v7906_v11  ;;  %v7958_v38 = vld [vmem:[%s12036_s3 + $0x528] ss:$16 sps:$4 sm:$0xff]   ;;  %v7963_v11 = vld [vmem:[%s12036_s3 + $0x504] ss:$16 sps:$4 sm:$0xff]  }
 0x1bf   :  { %2469 = vmatpush1.bf16.msra.mxu0 %v7901_v55  ;;  %2522 = vmatpush1.bf16.msra.mxu1 %v7904_v49  ;;  %v7966_v55 = vld [vmem:[%s12036_s3 + $0x50c] ss:$16 sps:$4 sm:$0xff]   ;;  %v7961_v49 = vld [vmem:[%s12036_s3 + $0x500] ss:$16 sps:$4 sm:$0xff]  }
 0x1c0   :  { %2470 = vmatprep.subr.bf16.mxu0 %v7909_v27  ;;  %2523 = vmatprep.subr.bf16.mxu1 %v7912_v23  ;;  %v7964_v27 = vld [vmem:[%s12036_s3 + $0x508] ss:$16 sps:$4 sm:$0xff]   ;;  %v7969_v23 = vld [vmem:[%s12036_s3 + $0x6e4] ss:$16 sps:$4 sm:$0xff]  }
 0x1c3   :  { %2471 = vmatpush1.bf16.msra.mxu0 %v7907_v20  ;;  %2524 = vmatpush1.bf16.msra.mxu1 %v7910_v37  ;;  %v7972_v20 = vld [vmem:[%s12036_s3 + $0x6ec] ss:$16 sps:$4 sm:$0xff]   ;;  %v7967_v37 = vld [vmem:[%s12036_s3 + $0x6e0] ss:$16 sps:$4 sm:$0xff]  }
 0x1c4   :  { %2472 = vmatprep.subr.bf16.mxu0 %v7915_v56  ;;  %2525 = vmatprep.subr.bf16.mxu1 %v7918_v16  ;;  %v7970_v56 = vld [vmem:[%s12036_s3 + $0x6e8] ss:$16 sps:$4 sm:$0xff]   ;;  %v7975_v16 = vld [vmem:[%s12036_s3 + $0x6c4] ss:$16 sps:$4 sm:$0xff]  }
 0x1c7   :  { %2473 = vmatpush1.bf16.msra.mxu0 %v7913_v19  ;;  %2526 = vmatpush1.bf16.msra.mxu1 %v7916_v8  ;;  %v7978_v19 = vld [vmem:[%s12036_s3 + $0x6cc] ss:$16 sps:$4 sm:$0xff]   ;;  %v7973_v8 = vld [vmem:[%s12036_s3 + $0x6c0] ss:$16 sps:$4 sm:$0xff]  }
 0x1c8   :  { %2474 = vmatprep.subr.bf16.mxu0 %v7921_v59  ;;  %2527 = vmatprep.subr.bf16.mxu1 %v7924_v43  ;;  %v7976_v59 = vld [vmem:[%s12036_s3 + $0x6c8] ss:$16 sps:$4 sm:$0xff]   ;;  %v7981_v43 = vld [vmem:[%s12036_s3 + $0x6a4] ss:$16 sps:$4 sm:$0xff]  }
 0x1cb   :  { %2475 = vmatpush2.bf16.msra.mxu0 %v7919_v61  ;;  %2528 = vmatpush2.bf16.msra.mxu1 %v7922_v32  ;;  %v7984_v61 = vld [vmem:[%s12036_s3 + $0x6ac] ss:$16 sps:$4 sm:$0xff]   ;;  %v7979_v32 = vld [vmem:[%s12036_s3 + $0x6a0] ss:$16 sps:$4 sm:$0xff]  }
 0x1cc   :  { %2476 = vmatprep.subr.bf16.mxu0 %v7927_v58  ;;  %2529 = vmatprep.subr.bf16.mxu1 %v7930_v21  ;;  %v7982_v58 = vld [vmem:[%s12036_s3 + $0x6a8] ss:$16 sps:$4 sm:$0xff]   ;;  %v7987_v21 = vld [vmem:[%s12036_s3 + $0x684] ss:$16 sps:$4 sm:$0xff]  }
 0x1cf   :  { %2477 = vmatpush2.bf16.msra.mxu0 %v7925_v42  ;;  %2530 = vmatpush2.bf16.msra.mxu1 %v7928_v41  ;;  %v7990_v42 = vld [vmem:[%s12036_s3 + $0x68c] ss:$16 sps:$4 sm:$0xff]   ;;  %v7985_v41 = vld [vmem:[%s12036_s3 + $0x680] ss:$16 sps:$4 sm:$0xff]  }
 0x1d0   :  { %2478 = vmatprep.subr.bf16.mxu0 %v7933_v0  ;;  %2531 = vmatprep.subr.bf16.mxu1 %v7936_v5  ;;  %v7988_v0 = vld [vmem:[%s12036_s3 + $0x688] ss:$16 sps:$4 sm:$0xff]   ;;  %v7993_v5 = vld [vmem:[%s12036_s3 + $0x664] ss:$16 sps:$4 sm:$0xff]  }
 0x1d3   :  { %2479 = vmatpush2.bf16.msra.mxu0 %v7931_v60  ;;  %2532 = vmatpush2.bf16.msra.mxu1 %v7934_v9  ;;  %v7996_v60 = vld [vmem:[%s12036_s3 + $0x66c] ss:$16 sps:$4 sm:$0xff]   ;;  %v7991_v9 = vld [vmem:[%s12036_s3 + $0x660] ss:$16 sps:$4 sm:$0xff]  }
 0x1d4   :  { %2480 = vmatprep.subr.bf16.mxu0 %v7939_v4  ;;  %2533 = vmatprep.subr.bf16.mxu1 %v7942_v15  ;;  %v7994_v4 = vld [vmem:[%s12036_s3 + $0x668] ss:$16 sps:$4 sm:$0xff]   ;;  %v7999_v15 = vld [vmem:[%s12036_s3 + $0x644] ss:$16 sps:$4 sm:$0xff]  }
 0x1d7   :  { %2481 = vmatpush2.bf16.msra.mxu0 %v7937_v2  ;;  %2534 = vmatpush2.bf16.msra.mxu1 %v7940_v1  ;;  %v8002_v2 = vld [vmem:[%s12036_s3 + $0x64c] ss:$16 sps:$4 sm:$0xff]   ;;  %v7997_v1 = vld [vmem:[%s12036_s3 + $0x640] ss:$16 sps:$4 sm:$0xff]  }
 0x1d8   :  { %2482 = vmatprep.subr.bf16.mxu0 %v7945_v7  ;;  %2535 = vmatprep.subr.bf16.mxu1 %v7948_v17  ;;  %v8000_v7 = vld [vmem:[%s12036_s3 + $0x648] ss:$16 sps:$4 sm:$0xff]   ;;  %v8005_v17 = vld [vmem:[%s12036_s3 + $0x624] ss:$16 sps:$4 sm:$0xff]  }
 0x1db   :  { %2483 = vmatpush2.bf16.msra.mxu0 %v7943_v25  ;;  %2536 = vmatpush2.bf16.msra.mxu1 %v7946_v22  ;;  %v8008_v25 = vld [vmem:[%s12036_s3 + $0x62c] ss:$16 sps:$4 sm:$0xff]   ;;  %v8003_v22 = vld [vmem:[%s12036_s3 + $0x620] ss:$16 sps:$4 sm:$0xff]  }
 0x1dc   :  { %2484 = vmatprep.subr.bf16.mxu0 %v7951_v26  ;;  %2537 = vmatprep.subr.bf16.mxu1 %v7954_v46  ;;  %v8006_v26 = vld [vmem:[%s12036_s3 + $0x628] ss:$16 sps:$4 sm:$0xff]   ;;  %v8011_v46 = vld [vmem:[%s12036_s3 + $0x604] ss:$16 sps:$4 sm:$0xff]  }
 0x1df   :  { %2485 = vmatpush2.bf16.msra.mxu0 %v7949_v30  ;;  %2538 = vmatpush2.bf16.msra.mxu1 %v7952_v52  ;;  %v8014_v30 = vld [vmem:[%s12036_s3 + $0x60c] ss:$16 sps:$4 sm:$0xff]   ;;  %v8009_v52 = vld [vmem:[%s12036_s3 + $0x600] ss:$16 sps:$4 sm:$0xff]  }
 0x1e0   :  { %2486 = vmatprep.subr.bf16.mxu0 %v7957_v33  ;;  %2539 = vmatprep.subr.bf16.mxu1 %v7960_v34  ;;  %v8012_v33 = vld [vmem:[%s12036_s3 + $0x608] ss:$16 sps:$4 sm:$0xff]   ;;  %v8017_v34 = vld [vmem:[%s12036_s3 + $0x7e4] ss:$16 sps:$4 sm:$0xff]  }
 0x1e3   :  { %2487 = vmatpush2.bf16.msra.mxu0 %v7955_v40  ;;  %2540 = vmatpush2.bf16.msra.mxu1 %v7958_v38  ;;  %v8020_v40 = vld [vmem:[%s12036_s3 + $0x7ec] ss:$16 sps:$4 sm:$0xff]   ;;  %v8015_v38 = vld [vmem:[%s12036_s3 + $0x7e0] ss:$16 sps:$4 sm:$0xff]  }
 0x1e4   :  { %2488 = vmatprep.subr.bf16.mxu0 %v7963_v11  ;;  %2541 = vmatprep.subr.bf16.mxu1 %v7966_v55  ;;  %v8018_v11 = vld [vmem:[%s12036_s3 + $0x7e8] ss:$16 sps:$4 sm:$0xff]   ;;  %v8023_v55 = vld [vmem:[%s12036_s3 + $0x7c4] ss:$16 sps:$4 sm:$0xff]  }
 0x1e7   :  { %2489 = vmatpush2.bf16.msra.mxu0 %v7961_v49  ;;  %2542 = vmatpush2.bf16.msra.mxu1 %v7964_v27  ;;  %v8026_v49 = vld [vmem:[%s12036_s3 + $0x7cc] ss:$16 sps:$4 sm:$0xff]   ;;  %v8021_v27 = vld [vmem:[%s12036_s3 + $0x7c0] ss:$16 sps:$4 sm:$0xff]  }
 0x1e8   :  { %2965 = vmatprep.subr.bf16.mxu0 %v7969_v23  ;;  %3018 = vmatprep.subr.bf16.mxu1 %v7972_v20  ;;  %v8024_v23 = vld [vmem:[%s12036_s3 + $0x7c8] ss:$16 sps:$4 sm:$0xff]   ;;  %v8029_v20 = vld [vmem:[%s12036_s3 + $0x7a4] ss:$16 sps:$4 sm:$0xff]  }
 0x1ea   :  { %2491 = vmatmul.mubr.bf16.vlgmr.msra.gmra.mxu0 %v9541_v14  ;;  %2544 = vmatmul.mubr.bf16.vlgmr.msra.gmra.mxu1 %v9541_v14 }
 0x1eb   :  { %2500 = vmatprep.mubr.bf16.mxu0 %v9573_v6  ;;  %2553 = vmatprep.mubr.bf16.mxu1 %v9573_v6 }
 0x1ec   :  { %2966 = vmatpush1.bf16.msra.mxu0 %v7967_v37  ;;  %3019 = vmatpush1.bf16.msra.mxu1 %v7970_v56  ;;  %v8032_v37 = vld [vmem:[%s12036_s3 + $0x7ac] ss:$16 sps:$4 sm:$0xff]   ;;  %v8027_v56 = vld [vmem:[%s12036_s3 + $0x7a0] ss:$16 sps:$4 sm:$0xff]  }
 0x1ed   :  { %2967 = vmatprep.subr.bf16.mxu0 %v7975_v16  ;;  %3020 = vmatprep.subr.bf16.mxu1 %v7978_v19  ;;  %v8030_v16 = vld [vmem:[%s12036_s3 + $0x7a8] ss:$16 sps:$4 sm:$0xff]   ;;  %v8035_v19 = vld [vmem:[%s12036_s3 + $0x784] ss:$16 sps:$4 sm:$0xff]  }
 0x1f0   :  { %2968 = vmatpush1.bf16.msra.mxu0 %v7973_v8  ;;  %3021 = vmatpush1.bf16.msra.mxu1 %v7976_v59  ;;  %v8038_v8 = vld [vmem:[%s12036_s3 + $0x78c] ss:$16 sps:$4 sm:$0xff]   ;;  %v8033_v59 = vld [vmem:[%s12036_s3 + $0x780] ss:$16 sps:$4 sm:$0xff]  }
 0x1f1   :  { %2969 = vmatprep.subr.bf16.mxu0 %v7981_v43  ;;  %3022 = vmatprep.subr.bf16.mxu1 %v7984_v61  ;;  %v8036_v43 = vld [vmem:[%s12036_s3 + $0x788] ss:$16 sps:$4 sm:$0xff]   ;;  %v8041_v61 = vld [vmem:[%s12036_s3 + $0x764] ss:$16 sps:$4 sm:$0xff]  }
 0x1f2   :  { %2501 = vmatmul.mubr.bf16.gmra.mxu0 %v9569_v63  ;;  %2554 = vmatmul.mubr.bf16.gmra.mxu1 %v9569_v63 }
 0x1f3   :  { %2997 = vmatprep.mubr.bf16.mxu0 %v9699_v54  ;;  %3050 = vmatprep.mubr.bf16.mxu1 %v9699_v54 }
 0x1f4   :  { %2970 = vmatpush1.bf16.msra.mxu0 %v7979_v32  ;;  %3023 = vmatpush1.bf16.msra.mxu1 %v7982_v58  ;;  %v8044_v32 = vld [vmem:[%s12036_s3 + $0x76c] ss:$16 sps:$4 sm:$0xff]   ;;  %v8039_v58 = vld [vmem:[%s12036_s3 + $0x760] ss:$16 sps:$4 sm:$0xff]  }
 0x1f5   :  { %2971 = vmatprep.subr.bf16.mxu0 %v7987_v21  ;;  %3024 = vmatprep.subr.bf16.mxu1 %v7990_v42  ;;  %v8042_v21 = vld [vmem:[%s12036_s3 + $0x768] ss:$16 sps:$4 sm:$0xff]   ;;  %v8047_v42 = vld [vmem:[%s12036_s3 + $0x744] ss:$16 sps:$4 sm:$0xff]  }
 0x1f8   :  { %2972 = vmatpush1.bf16.msra.mxu0 %v7985_v41  ;;  %3025 = vmatpush1.bf16.msra.mxu1 %v7988_v0  ;;  %v8050_v41 = vld [vmem:[%s12036_s3 + $0x74c] ss:$16 sps:$4 sm:$0xff]   ;;  %v8045_v0 = vld [vmem:[%s12036_s3 + $0x740] ss:$16 sps:$4 sm:$0xff]  }
 0x1f9   :  { %2973 = vmatprep.subr.bf16.mxu0 %v7993_v5  ;;  %3026 = vmatprep.subr.bf16.mxu1 %v7996_v60  ;;  %v8048_v5 = vld [vmem:[%s12036_s3 + $0x748] ss:$16 sps:$4 sm:$0xff]   ;;  %v8053_v60 = vld [vmem:[%s12036_s3 + $0x724] ss:$16 sps:$4 sm:$0xff]  }
 0x1fc   :  { %2974 = vmatpush1.bf16.msra.mxu0 %v7991_v9  ;;  %3027 = vmatpush1.bf16.msra.mxu1 %v7994_v4  ;;  %v8056_v9 = vld [vmem:[%s12036_s3 + $0x72c] ss:$16 sps:$4 sm:$0xff]   ;;  %v8051_v4 = vld [vmem:[%s12036_s3 + $0x720] ss:$16 sps:$4 sm:$0xff]  }
 0x1fd   :  { %2975 = vmatprep.subr.bf16.mxu0 %v7999_v15  ;;  %3028 = vmatprep.subr.bf16.mxu1 %v8002_v2  ;;  %v8054_v15 = vld [vmem:[%s12036_s3 + $0x728] ss:$16 sps:$4 sm:$0xff]   ;;  %v8059_v2 = vld [vmem:[%s12036_s3 + $0x704] ss:$16 sps:$4 sm:$0xff]  }
 0x200   :  { %2976 = vmatpush1.bf16.msra.mxu0 %v7997_v1  ;;  %3029 = vmatpush1.bf16.msra.mxu1 %v8000_v7  ;;  %v8062_v1 = vld [vmem:[%s12036_s3 + $0x70c] ss:$16 sps:$4 sm:$0xff]   ;;  %v8057_v7 = vld [vmem:[%s12036_s3 + $0x700] ss:$16 sps:$4 sm:$0xff]  }
 0x201   :  { %2977 = vmatprep.subr.bf16.mxu0 %v8005_v17  ;;  %3030 = vmatprep.subr.bf16.mxu1 %v8008_v25  ;;  %v8060_v17 = vld [vmem:[%s12036_s3 + $0x708] ss:$16 sps:$4 sm:$0xff]   ;;  %v8065_v25 = vld [vmem:[%s12036_s3 + $0x8e4] ss:$16 sps:$4 sm:$0xff]  }
 0x204   :  { %2978 = vmatpush1.bf16.msra.mxu0 %v8003_v22  ;;  %3031 = vmatpush1.bf16.msra.mxu1 %v8006_v26  ;;  %v8068_v22 = vld [vmem:[%s12036_s3 + $0x8ec] ss:$16 sps:$4 sm:$0xff]   ;;  %v8063_v26 = vld [vmem:[%s12036_s3 + $0x8e0] ss:$16 sps:$4 sm:$0xff]  }
 0x205   :  { %2979 = vmatprep.subr.bf16.mxu0 %v8011_v46  ;;  %3032 = vmatprep.subr.bf16.mxu1 %v8014_v30  ;;  %v8066_v46 = vld [vmem:[%s12036_s3 + $0x8e8] ss:$16 sps:$4 sm:$0xff]   ;;  %v8071_v30 = vld [vmem:[%s12036_s3 + $0x8c4] ss:$16 sps:$4 sm:$0xff]  }
 0x208   :  { %2980 = vmatpush1.bf16.msra.mxu0 %v8009_v52  ;;  %3033 = vmatpush1.bf16.msra.mxu1 %v8012_v33  ;;  %v8074_v52 = vld [vmem:[%s12036_s3 + $0x8cc] ss:$16 sps:$4 sm:$0xff]   ;;  %v8069_v33 = vld [vmem:[%s12036_s3 + $0x8c0] ss:$16 sps:$4 sm:$0xff]  }
 0x209   :  { %2981 = vmatprep.subr.bf16.mxu0 %v8017_v34  ;;  %3034 = vmatprep.subr.bf16.mxu1 %v8020_v40  ;;  %v8072_v34 = vld [vmem:[%s12036_s3 + $0x8c8] ss:$16 sps:$4 sm:$0xff]   ;;  %v8077_v40 = vld [vmem:[%s12036_s3 + $0x8a4] ss:$16 sps:$4 sm:$0xff]  }
 0x20c   :  { %2982 = vmatpush2.bf16.msra.mxu0 %v8015_v38  ;;  %3035 = vmatpush2.bf16.msra.mxu1 %v8018_v11  ;;  %v8080_v38 = vld [vmem:[%s12036_s3 + $0x8ac] ss:$16 sps:$4 sm:$0xff]   ;;  %v8075_v11 = vld [vmem:[%s12036_s3 + $0x8a0] ss:$16 sps:$4 sm:$0xff]  }
 0x20d   :  { %2983 = vmatprep.subr.bf16.mxu0 %v8023_v55  ;;  %3036 = vmatprep.subr.bf16.mxu1 %v8026_v49  ;;  %v8078_v55 = vld [vmem:[%s12036_s3 + $0x8a8] ss:$16 sps:$4 sm:$0xff]   ;;  %v8083_v49 = vld [vmem:[%s12036_s3 + $0x884] ss:$16 sps:$4 sm:$0xff]  }
 0x210   :  { %2984 = vmatpush2.bf16.msra.mxu0 %v8021_v27  ;;  %3037 = vmatpush2.bf16.msra.mxu1 %v8024_v23  ;;  %v8086_v27 = vld [vmem:[%s12036_s3 + $0x88c] ss:$16 sps:$4 sm:$0xff]   ;;  %v8081_v23 = vld [vmem:[%s12036_s3 + $0x880] ss:$16 sps:$4 sm:$0xff]  }
 0x211   :  { %2985 = vmatprep.subr.bf16.mxu0 %v8029_v20  ;;  %3038 = vmatprep.subr.bf16.mxu1 %v8032_v37  ;;  %v8084_v20 = vld [vmem:[%s12036_s3 + $0x888] ss:$16 sps:$4 sm:$0xff]   ;;  %v8089_v37 = vld [vmem:[%s12036_s3 + $0x864] ss:$16 sps:$4 sm:$0xff]  }
 0x214   :  { %2986 = vmatpush2.bf16.msra.mxu0 %v8027_v56  ;;  %3039 = vmatpush2.bf16.msra.mxu1 %v8030_v16  ;;  %v8092_v56 = vld [vmem:[%s12036_s3 + $0x86c] ss:$16 sps:$4 sm:$0xff]   ;;  %v8087_v16 = vld [vmem:[%s12036_s3 + $0x860] ss:$16 sps:$4 sm:$0xff]  }
 0x215   :  { %2987 = vmatprep.subr.bf16.mxu0 %v8035_v19  ;;  %3040 = vmatprep.subr.bf16.mxu1 %v8038_v8  ;;  %v8090_v19 = vld [vmem:[%s12036_s3 + $0x868] ss:$16 sps:$4 sm:$0xff]   ;;  %v8095_v8 = vld [vmem:[%s12036_s3 + $0x844] ss:$16 sps:$4 sm:$0xff]  }
 0x218   :  { %2988 = vmatpush2.bf16.msra.mxu0 %v8033_v59  ;;  %3041 = vmatpush2.bf16.msra.mxu1 %v8036_v43  ;;  %v8098_v59 = vld [vmem:[%s12036_s3 + $0x84c] ss:$16 sps:$4 sm:$0xff]   ;;  %v8093_v43 = vld [vmem:[%s12036_s3 + $0x840] ss:$16 sps:$4 sm:$0xff]  }
 0x219   :  { %2989 = vmatprep.subr.bf16.mxu0 %v8041_v61  ;;  %3042 = vmatprep.subr.bf16.mxu1 %v8044_v32  ;;  %v8096_v61 = vld [vmem:[%s12036_s3 + $0x848] ss:$16 sps:$4 sm:$0xff]   ;;  %v8101_v32 = vld [vmem:[%s12036_s3 + $0x824] ss:$16 sps:$4 sm:$0xff]  }
 0x21c   :  { %2990 = vmatpush2.bf16.msra.mxu0 %v8039_v58  ;;  %3043 = vmatpush2.bf16.msra.mxu1 %v8042_v21  ;;  %v8104_v58 = vld [vmem:[%s12036_s3 + $0x82c] ss:$16 sps:$4 sm:$0xff]   ;;  %v8099_v21 = vld [vmem:[%s12036_s3 + $0x820] ss:$16 sps:$4 sm:$0xff]  }
 0x21d   :  { %2991 = vmatprep.subr.bf16.mxu0 %v8047_v42  ;;  %3044 = vmatprep.subr.bf16.mxu1 %v8050_v41  ;;  %v8102_v42 = vld [vmem:[%s12036_s3 + $0x828] ss:$16 sps:$4 sm:$0xff]   ;;  %v8107_v41 = vld [vmem:[%s12036_s3 + $0x804] ss:$16 sps:$4 sm:$0xff]  }
 0x220   :  { %2992 = vmatpush2.bf16.msra.mxu0 %v8045_v0  ;;  %3045 = vmatpush2.bf16.msra.mxu1 %v8048_v5  ;;  %v8110_v0 = vld [vmem:[%s12036_s3 + $0x80c] ss:$16 sps:$4 sm:$0xff]   ;;  %v8105_v5 = vld [vmem:[%s12036_s3 + $0x800] ss:$16 sps:$4 sm:$0xff]  }
 0x221   :  { %2993 = vmatprep.subr.bf16.mxu0 %v8053_v60  ;;  %3046 = vmatprep.subr.bf16.mxu1 %v8056_v9  ;;  %v8108_v60 = vld [vmem:[%s12036_s3 + $0x808] ss:$16 sps:$4 sm:$0xff]   ;;  %v8113_v9 = vld [vmem:[%s12036_s3 + $0x9e4] ss:$16 sps:$4 sm:$0xff]  }
 0x224   :  { %2994 = vmatpush2.bf16.msra.mxu0 %v8051_v4  ;;  %3047 = vmatpush2.bf16.msra.mxu1 %v8054_v15  ;;  %v8116_v4 = vld [vmem:[%s12036_s3 + $0x9ec] ss:$16 sps:$4 sm:$0xff]   ;;  %v10409_v15 = vpop.f32.mrf.mxu0 }
 0x225   :  { %2995 = vmatprep.subr.bf16.mxu0 %v8059_v2  ;;  %3048 = vmatprep.subr.bf16.mxu1 %v8062_v1  ;;  %v10411_v2 = vpop.f32.mrf.mxu1  ;;  %v8111_v1 = vld [vmem:[%s12036_s3 + $0x9e0] ss:$16 sps:$4 sm:$0xff]  }
 0x228   :  { %2996 = vmatpush2.bf16.msra.mxu0 %v8057_v7  ;;  %3049 = vmatpush2.bf16.msra.mxu1 %v8060_v17  ;;  %v8114_v7 = vld [vmem:[%s12036_s3 + $0x9e8] ss:$16 sps:$4 sm:$0xff]   ;;  %v8119_v17 = vld [vmem:[%s12036_s3 + $0x9c4] ss:$16 sps:$4 sm:$0xff]  }
 0x229   :  { %3472 = vmatprep.subr.bf16.mxu0 %v8065_v25  ;;  %3525 = vmatprep.subr.bf16.mxu1 %v8068_v22  ;;  %v8122_v25 = vld [vmem:[%s12036_s3 + $0x9cc] ss:$16 sps:$4 sm:$0xff]   ;;  %v10425_v22 = vpop.f32.mrf.mxu0 }
 0x22b   :  { %2998 = vmatmul.mubr.bf16.vlgmr.msra.gmra.mxu0 %v9683_v39  ;;  %3051 = vmatmul.mubr.bf16.vlgmr.msra.gmra.mxu1 %v9683_v39 }
 0x22c   :  { %3007 = vmatprep.mubr.bf16.mxu0 %v9734_v13  ;;  %3060 = vmatprep.mubr.bf16.mxu1 %v9734_v13 }
 0x22d   :  { %3473 = vmatpush1.bf16.msra.mxu0 %v8063_v26  ;;  %3526 = vmatpush1.bf16.msra.mxu1 %v8066_v46  ;;  %v10427_v26 = vpop.f32.mrf.mxu1  ;;  %v8117_v46 = vld [vmem:[%s12036_s3 + $0x9c0] ss:$16 sps:$4 sm:$0xff]  }
 0x22e   :  { %3474 = vmatprep.subr.bf16.mxu0 %v8071_v30  ;;  %3527 = vmatprep.subr.bf16.mxu1 %v8074_v52  ;;  %v8120_v30 = vld [vmem:[%s12036_s3 + $0x9c8] ss:$16 sps:$4 sm:$0xff]   ;;  %v8125_v52 = vld [vmem:[%s12036_s3 + $0x9a4] ss:$16 sps:$4 sm:$0xff]  }
 0x231   :  { %3475 = vmatpush1.bf16.msra.mxu0 %v8069_v33  ;;  %3528 = vmatpush1.bf16.msra.mxu1 %v8072_v34  ;;  %v8128_v33 = vld [vmem:[%s12036_s3 + $0x9ac] ss:$16 sps:$4 sm:$0xff]   ;;  %v10441_v34 = vpop.f32.mrf.mxu0 }
 0x232   :  { %3476 = vmatprep.subr.bf16.mxu0 %v8077_v40  ;;  %3529 = vmatprep.subr.bf16.mxu1 %v8080_v38  ;;  %v10443_v40 = vpop.f32.mrf.mxu1  ;;  %v8123_v38 = vld [vmem:[%s12036_s3 + $0x9a0] ss:$16 sps:$4 sm:$0xff]  }
 0x233   :  { %3008 = vmatmul.mubr.bf16.gmra.mxu0 %v9725_v12  ;;  %3061 = vmatmul.mubr.bf16.gmra.mxu1 %v9725_v12 }
 0x234   :  { %3504 = vmatprep.mubr.bf16.mxu0 %v9909_v47  ;;  %3557 = vmatprep.mubr.bf16.mxu1 %v9909_v47 }
 0x235   :  { %3477 = vmatpush1.bf16.msra.mxu0 %v8075_v11  ;;  %3530 = vmatpush1.bf16.msra.mxu1 %v8078_v55  ;;  %v8126_v11 = vld [vmem:[%s12036_s3 + $0x9a8] ss:$16 sps:$4 sm:$0xff]   ;;  %v8131_v55 = vld [vmem:[%s12036_s3 + $0x984] ss:$16 sps:$4 sm:$0xff]  }
 0x236   :  { %3478 = vmatprep.subr.bf16.mxu0 %v8083_v49  ;;  %3531 = vmatprep.subr.bf16.mxu1 %v8086_v27  ;;  %v8134_v49 = vld [vmem:[%s12036_s3 + $0x98c] ss:$16 sps:$4 sm:$0xff]   ;;  %v10457_v27 = vpop.f32.mrf.mxu0 }
 0x239   :  { %3479 = vmatpush1.bf16.msra.mxu0 %v8081_v23  ;;  %3532 = vmatpush1.bf16.msra.mxu1 %v8084_v20  ;;  %v10459_v23 = vpop.f32.mrf.mxu1  ;;  %v8129_v20 = vld [vmem:[%s12036_s3 + $0x980] ss:$16 sps:$4 sm:$0xff]  }
 0x23a   :  { %3480 = vmatprep.subr.bf16.mxu0 %v8089_v37  ;;  %3533 = vmatprep.subr.bf16.mxu1 %v8092_v56  ;;  %v8132_v37 = vld [vmem:[%s12036_s3 + $0x988] ss:$16 sps:$4 sm:$0xff]   ;;  %v8137_v56 = vld [vmem:[%s12036_s3 + $0x964] ss:$16 sps:$4 sm:$0xff]  }
 0x23d   :  { %3481 = vmatpush1.bf16.msra.mxu0 %v8087_v16  ;;  %3534 = vmatpush1.bf16.msra.mxu1 %v8090_v19  ;;  %v8140_v16 = vld [vmem:[%s12036_s3 + $0x96c] ss:$16 sps:$4 sm:$0xff]   ;;  %v10473_v19 = vpop.f32.mrf.mxu0 }
 0x23e   :  { %3482 = vmatprep.subr.bf16.mxu0 %v8095_v8  ;;  %3535 = vmatprep.subr.bf16.mxu1 %v8098_v59  ;;  %v10475_v8 = vpop.f32.mrf.mxu1  ;;  %v8135_v59 = vld [vmem:[%s12036_s3 + $0x960] ss:$16 sps:$4 sm:$0xff]  }
 0x241   :  { %3483 = vmatpush1.bf16.msra.mxu0 %v8093_v43  ;;  %3536 = vmatpush1.bf16.msra.mxu1 %v8096_v61  ;;  %v8138_v43 = vld [vmem:[%s12036_s3 + $0x968] ss:$16 sps:$4 sm:$0xff]   ;;  %v8143_v61 = vld [vmem:[%s12036_s3 + $0x944] ss:$16 sps:$4 sm:$0xff]  }
 0x242   :  { %3484 = vmatprep.subr.bf16.mxu0 %v8101_v32  ;;  %3537 = vmatprep.subr.bf16.mxu1 %v8104_v58  ;;  %v8146_v32 = vld [vmem:[%s12036_s3 + $0x94c] ss:$16 sps:$4 sm:$0xff]   ;;  %v688_v58 = vadd.f32 %v9559_v53, %v9453_v35  ;;  %v8144_v53 = vld [vmem:[%s12036_s3 + $0x948] ss:$16 sps:$4 sm:$0xff]  }
 0x245   :  { %3485 = vmatpush1.bf16.msra.mxu0 %v8099_v21  ;;  %3538 = vmatpush1.bf16.msra.mxu1 %v8102_v42  ;;  %v841_v21 = vadd.f32 %v9561_v57, %v9456_v36  ;;  %v10493_v42 = vpop.f32.mrf.mxu0  ;;  %v8149_v57 = vld [vmem:[%s12036_s3 + $0x924] ss:$16 sps:$4 sm:$0xff]  }
 0x246   :  { %3486 = vmatprep.subr.bf16.mxu0 %v8107_v41  ;;  %3539 = vmatprep.subr.bf16.mxu1 %v8110_v0  ;;  %v10495_v41 = vpop.f32.mrf.mxu1  ;;  %v658_v0 = vadd.f32 %v9498_v44, %v9453_v35  ;;  %v8152_v44 = vld [vmem:[%s12036_s3 + $0x92c] ss:$16 sps:$4 sm:$0xff]  }
 0x249   :  { %3487 = vmatpush1.bf16.msra.mxu0 %v8105_v5  ;;  %3540 = vmatpush1.bf16.msra.mxu1 %v8108_v60  ;;  %v811_v5 = vadd.f32 %v9500_v45, %v9456_v36  ;;  %v8141_v60 = vld [vmem:[%s12036_s3 + $0x940] ss:$16 sps:$4 sm:$0xff]   ;;  %v948_v45 = vmax.f32 %v688_v58, 0.0  ;;  %v8575_v58 = vld [vmem:[%s12036_s3 + $0x2e4] ss:$16 sps:$4 sm:$0xff]  }
 0x24a   :  { %3488 = vmatprep.subr.bf16.mxu0 %v8113_v9  ;;  %3541 = vmatprep.subr.bf16.mxu1 %v8116_v4  ;;  %v950_v9 = vmax.f32 %v841_v21, 0.0  ;;  %v10513_v4 = vpop.f32.mrf.mxu0  ;;  %v8576_v21 = vld [vmem:[%s12036_s3 + $0x2ec] ss:$16 sps:$4 sm:$0xff]  }
 0x24d   :  { %3489 = vmatpush2.bf16.msra.mxu0 %v8111_v1  ;;  %3542 = vmatpush2.bf16.msra.mxu1 %v8114_v7  ;;  %v10515_v1 = vpop.f32.mrf.mxu1  ;;  %v924_v7 = vmax.f32 %v658_v0, 0.0 }
 0x24e   :  { %3490 = vmatprep.subr.bf16.mxu0 %v8119_v17  ;;  %3543 = vmatprep.subr.bf16.mxu1 %v8122_v25  ;;  %v926_v17 = vmax.f32 %v811_v5, 0.0  ;;  %v8147_v25 = vld [vmem:[%s12036_s3 + $0x920] ss:$16 sps:$4 sm:$0xff]  }
 0x251   :  { %3491 = vmatpush2.bf16.msra.mxu0 %v8117_v46  ;;  %3544 = vmatpush2.bf16.msra.mxu1 %v8120_v30  ;;  %v8150_v46 = vld [vmem:[%s12036_s3 + $0x928] ss:$16 sps:$4 sm:$0xff]   ;;  %v8155_v30 = vld [vmem:[%s12036_s3 + $0x904] ss:$16 sps:$4 sm:$0xff]  }
 0x252   :  { %3492 = vmatprep.subr.bf16.mxu0 %v8125_v52  ;;  %3545 = vmatprep.subr.bf16.mxu1 %v8128_v33  ;;  %v8158_v52 = vld [vmem:[%s12036_s3 + $0x90c] ss:$16 sps:$4 sm:$0xff]   ;;  %v1022_v33 = vmax.f32 %v948_v45, %v950_v9  ;;  %v8579_v45 = vld [vmem:[%s12036_s3 + $0x2c4] ss:$16 sps:$4 sm:$0xff]  }
 0x253   :  { %v8580_v9 = vld [vmem:[%s12036_s3 + $0x2cc] ss:$16 sps:$4 sm:$0xff]  }
 0x255   :  { %3493 = vmatpush2.bf16.msra.mxu0 %v8123_v38  ;;  %3546 = vmatpush2.bf16.msra.mxu1 %v8126_v11  ;;  %v10529_v38 = vpop.f32.mrf.mxu0  ;;  %v10531_v11 = vpop.f32.mrf.mxu1 }
 0x256   :  { %3494 = vmatprep.subr.bf16.mxu0 %v8131_v55  ;;  %3547 = vmatprep.subr.bf16.mxu1 %v8134_v49  ;;  %v1010_v55 = vmax.f32 %v924_v7, %v926_v17  ;;  %v8153_v49 = vld [vmem:[%s12036_s3 + $0x900] ss:$16 sps:$4 sm:$0xff]  }
 0x259   :  { %3495 = vmatpush2.bf16.msra.mxu0 %v8129_v20  ;;  %3548 = vmatpush2.bf16.msra.mxu1 %v8132_v37  ;;  %v8156_v20 = vld [vmem:[%s12036_s3 + $0x908] ss:$16 sps:$4 sm:$0xff]   ;;  %v1034_v37 = vmax.f32 %v1010_v55, %v1022_v33  ;;  %v8584_v55 = vld [vmem:[%s12036_s3 + $0x2ac] ss:$16 sps:$4 sm:$0xff]  }
 0x25a   :  { %3496 = vmatprep.subr.bf16.mxu0 %v8137_v56  ;;  %3549 = vmatprep.subr.bf16.mxu1 %v8140_v16  ;;  %v10539_v56 = vpop.f32.mrf.mxu0  ;;  %v10541_v16 = vpop.f32.mrf.mxu1 }
 0x25b   :  { %v10556_v0 = vpack.c.bf16 %v1034_v37, %v9567_v3  ;;  %v8577_v3 = vld [vmem:[%s12036_s3 + $0x2e0] ss:$16 sps:$4 sm:$0xff]  }
 0x25d   :  { %3497 = vmatpush2.bf16.msra.mxu0 %v8135_v59  ;;  %3550 = vmatpush2.bf16.msra.mxu1 %v8138_v43 }
 0x25e   :  { %3498 = vmatprep.subr.bf16.mxu0 %v8143_v61  ;;  %3551 = vmatprep.subr.bf16.mxu1 %v8146_v32 }
 0x261   :  { %3499 = vmatpush2.bf16.msra.mxu0 %v8141_v60  ;;  %3552 = vmatpush2.bf16.msra.mxu1 %v8144_v53 }
 0x262   :  { %3500 = vmatprep.subr.bf16.mxu0 %v8149_v57  ;;  %3553 = vmatprep.subr.bf16.mxu1 %v8152_v44  ;;  %v8578_v44 = vld [vmem:[%s12036_s3 + $0x2e8] ss:$16 sps:$4 sm:$0xff]  }
 0x265   :  { %3501 = vmatpush2.bf16.msra.mxu0 %v8147_v25  ;;  %3554 = vmatpush2.bf16.msra.mxu1 %v8150_v46 }
 0x266   :  { %3502 = vmatprep.subr.bf16.mxu0 %v8155_v30  ;;  %3555 = vmatprep.subr.bf16.mxu1 %v8158_v52  ;;  %v8581_v30 = vld [vmem:[%s12036_s3 + $0x2c0] ss:$16 sps:$4 sm:$0xff]   ;;  %v8582_v52 = vld [vmem:[%s12036_s3 + $0x2c8] ss:$16 sps:$4 sm:$0xff]  }
 0x269   :  { %3503 = vmatpush2.bf16.msra.mxu0 %v8153_v49  ;;  %3556 = vmatpush2.bf16.msra.mxu1 %v8156_v20  ;;  %v2001_v59 = vpop.f32.mrf.mxu0  ;;  %v2054_v43 = vpop.f32.mrf.mxu1 }
 0x26a   :  { %v10544_v61 = vadd.f32 %v2001_v59, %v10425_v22  ;;  %v10547_v32 = vadd.f32 %v2054_v43, %v10427_v26  ;;  %3647 = vmatprep.subr.bf16.mxu0 %v8575_v58  ;;  %3700 = vmatprep.subr.bf16.mxu1 %v8576_v21  ;;  %v8585_v43 = vld [vmem:[%s12036_s3 + $0x2a0] ss:$16 sps:$4 sm:$0xff]   ;;  %v8586_v58 = vld [vmem:[%s12036_s3 + $0x2a8] ss:$16 sps:$4 sm:$0xff]   ;;  %v8588_v21 = vld [vmem:[%s12036_s3 + $0x28c] ss:$16 sps:$4 sm:$0xff]  }
 0x26b   :  { %v2003_v5 = vpop.f32.mrf.mxu0  ;;  %v2056_v60 = vpop.f32.mrf.mxu1 }
 0x26c   :  { %3505 = vmatmul.mubr.bf16.vlgmr.msra.gmra.mxu0 %v9557_v50  ;;  %3558 = vmatmul.mubr.bf16.vlgmr.msra.gmra.mxu1 %v9557_v50  ;;  %v10561_v22 = vadd.f32 %v2003_v5, %v10441_v34  ;;  %v10564_v26 = vadd.f32 %v2056_v60, %v10443_v40 }
 0x26d   :  { %3514 = vmatprep.mubr.bf16.mxu0 %v10556_v0  ;;  %3567 = vmatprep.mubr.bf16.mxu1 %v10556_v0  ;;  %v2005_v53 = vpop.f32.mrf.mxu0  ;;  %v2058_v57 = vpop.f32.mrf.mxu1 }
 0x26e   :  { %3648 = vmatpush1.bf16.msra.mxu0 %v8577_v3  ;;  %3701 = vmatpush1.bf16.msra.mxu1 %v8578_v44  ;;  %v10575_v34 = vadd.f32 %v2005_v53, %v10457_v27  ;;  %v10578_v40 = vadd.f32 %v2058_v57, %v10459_v23  ;;  %v8590_v57 = vld [vmem:[%s12036_s3 + $0x288] ss:$16 sps:$4 sm:$0xff]   ;;  %v8591_v3 = vld [vmem:[%s12036_s3 + $0x264] ss:$16 sps:$4 sm:$0xff]  }
 0x26f   :  { %3649 = vmatprep.subr.bf16.mxu0 %v8579_v45  ;;  %3702 = vmatprep.subr.bf16.mxu1 %v8580_v9  ;;  %v2007_v7 = vpop.f32.mrf.mxu0  ;;  %v2060_v17 = vpop.f32.mrf.mxu1  ;;  %v8594_v44 = vld [vmem:[%s12036_s3 + $0x268] ss:$16 sps:$4 sm:$0xff]   ;;  %v8595_v45 = vld [vmem:[%s12036_s3 + $0x244] ss:$16 sps:$4 sm:$0xff]   ;;  %v8596_v9 = vld [vmem:[%s12036_s3 + $0x24c] ss:$16 sps:$4 sm:$0xff]  }
 0x270   :  { %v10587_v25 = vadd.f32 %v2007_v7, %v10473_v19  ;;  %v10590_v27 = vadd.f32 %v2060_v17, %v10475_v8  ;;  %v8583_v8 = vld [vmem:[%s12036_s3 + $0x2a4] ss:$16 sps:$4 sm:$0xff]   ;;  %v8597_v7 = vld [vmem:[%s12036_s3 + $0x240] ss:$16 sps:$4 sm:$0xff]   ;;  %v8598_v17 = vld [vmem:[%s12036_s3 + $0x248] ss:$16 sps:$4 sm:$0xff]  }
 0x271   :  { %v2011_v23 = vpop.f32.mrf.mxu0  ;;  %v2064_v46 = vpop.f32.mrf.mxu1 }
 0x272   :  { %3650 = vmatpush1.bf16.msra.mxu0 %v8581_v30  ;;  %3703 = vmatpush1.bf16.msra.mxu1 %v8582_v52  ;;  %v10599_v33 = vadd.f32 %v2011_v23, %v10493_v42  ;;  %v10602_v19 = vadd.f32 %v2064_v46, %v10495_v41  ;;  %v8599_v23 = vld [vmem:[%s12036_s3 + $0x224] ss:$16 sps:$4 sm:$0xff]   ;;  %v8600_v46 = vld [vmem:[%s12036_s3 + $0x22c] ss:$16 sps:$4 sm:$0xff]   ;;  %v8601_v30 = vld [vmem:[%s12036_s3 + $0x220] ss:$16 sps:$4 sm:$0xff]  }
 0x273   :  { %3651 = vmatprep.subr.bf16.mxu0 %v8583_v8  ;;  %3704 = vmatprep.subr.bf16.mxu1 %v8584_v55  ;;  %v2013_v49 = vpop.f32.mrf.mxu0  ;;  %v2066_v20 = vpop.f32.mrf.mxu1  ;;  %v8602_v52 = vld [vmem:[%s12036_s3 + $0x228] ss:$16 sps:$4 sm:$0xff]   ;;  %v8603_v8 = vld [vmem:[%s12036_s3 + $0x204] ss:$16 sps:$4 sm:$0xff]   ;;  %v8604_v55 = vld [vmem:[%s12036_s3 + $0x20c] ss:$16 sps:$4 sm:$0xff]  }
 0x274   :  { %3515 = vmatmul.mubr.bf16.gmra.mxu0 %v9576_v10  ;;  %3568 = vmatmul.mubr.bf16.gmra.mxu1 %v9576_v10  ;;  %v10613_v42 = vadd.f32 %v2013_v49, %v10513_v4  ;;  %v10616_v41 = vadd.f32 %v2066_v20, %v10515_v1  ;;  %v8605_v49 = vld [vmem:[%s12036_s3 + $0x200] ss:$16 sps:$4 sm:$0xff]   ;;  %v8606_v20 = vld [vmem:[%s12036_s3 + $0x208] ss:$16 sps:$4 sm:$0xff]  }
 0x275   :  { %3679 = vmatprep.mubr.bf16.mxu0 %v9552_v28  ;;  %3732 = vmatprep.mubr.bf16.mxu1 %v9552_v28  ;;  %v2015_v37 = vpop.f32.mrf.mxu0  ;;  %v2068_v59 = vpop.f32.mrf.mxu1  ;;  %v8587_v28 = vld [vmem:[%s12036_s3 + $0x284] ss:$16 sps:$4 sm:$0xff]  }
 0x276   :  { %3652 = vmatpush1.bf16.msra.mxu0 %v8585_v43  ;;  %3705 = vmatpush1.bf16.msra.mxu1 %v8586_v58  ;;  %v10627_v4 = vadd.f32 %v2015_v37, %v10529_v38  ;;  %v10630_v1 = vadd.f32 %v2068_v59, %v10531_v11  ;;  %v8589_v11 = vld [vmem:[%s12036_s3 + $0x280] ss:$16 sps:$4 sm:$0xff]   ;;  %v8607_v37 = vld [vmem:[%s12036_s3 + $0x3e4] ss:$16 sps:$4 sm:$0xff]   ;;  %v8608_v59 = vld [vmem:[%s12036_s3 + $0x3ec] ss:$16 sps:$4 sm:$0xff]  }
 0x277   :  { %3653 = vmatprep.subr.bf16.mxu0 %v8587_v28  ;;  %3706 = vmatprep.subr.bf16.mxu1 %v8588_v21  ;;  %v2017_v5 = vpop.f32.mrf.mxu0  ;;  %v2070_v60 = vpop.f32.mrf.mxu1  ;;  %v8609_v43 = vld [vmem:[%s12036_s3 + $0x3e0] ss:$16 sps:$4 sm:$0xff]   ;;  %v8610_v58 = vld [vmem:[%s12036_s3 + $0x3e8] ss:$16 sps:$4 sm:$0xff]   ;;  %v8611_v28 = vld [vmem:[%s12036_s3 + $0x3c4] ss:$16 sps:$4 sm:$0xff]  }
 0x278   :  { %v10639_v53 = vadd.f32 %v2017_v5, %v10539_v56  ;;  %v10642_v38 = vadd.f32 %v2070_v60, %v10541_v16  ;;  %v8592_v56 = vld [vmem:[%s12036_s3 + $0x26c] ss:$16 sps:$4 sm:$0xff]   ;;  %v8593_v16 = vld [vmem:[%s12036_s3 + $0x260] ss:$16 sps:$4 sm:$0xff]   ;;  %v8614_v60 = vld [vmem:[%s12036_s3 + $0x3c8] ss:$16 sps:$4 sm:$0xff]  }
 0x279   :  { %v8612_v21 = vld [vmem:[%s12036_s3 + $0x3cc] ss:$16 sps:$4 sm:$0xff]   ;;  %v8613_v5 = vld [vmem:[%s12036_s3 + $0x3c0] ss:$16 sps:$4 sm:$0xff]  }
 0x27a   :  { %3654 = vmatpush1.bf16.msra.mxu0 %v8589_v11  ;;  %3707 = vmatpush1.bf16.msra.mxu1 %v8590_v57  ;;  %v8615_v11 = vld [vmem:[%s12036_s3 + $0x3a4] ss:$16 sps:$4 sm:$0xff]   ;;  %v8616_v57 = vld [vmem:[%s12036_s3 + $0x3ac] ss:$16 sps:$4 sm:$0xff]  }
 0x27b   :  { %3655 = vmatprep.subr.bf16.mxu0 %v8591_v3  ;;  %3708 = vmatprep.subr.bf16.mxu1 %v8592_v56  ;;  %v8617_v3 = vld [vmem:[%s12036_s3 + $0x3a0] ss:$16 sps:$4 sm:$0xff]   ;;  %v8618_v56 = vld [vmem:[%s12036_s3 + $0x3a8] ss:$16 sps:$4 sm:$0xff]  }
 0x27e   :  { %3656 = vmatpush1.bf16.msra.mxu0 %v8593_v16  ;;  %3709 = vmatpush1.bf16.msra.mxu1 %v8594_v44  ;;  %v8619_v16 = vld [vmem:[%s12036_s3 + $0x384] ss:$16 sps:$4 sm:$0xff]   ;;  %v8620_v44 = vld [vmem:[%s12036_s3 + $0x38c] ss:$16 sps:$4 sm:$0xff]  }
 0x27f   :  { %3657 = vmatprep.subr.bf16.mxu0 %v8595_v45  ;;  %3710 = vmatprep.subr.bf16.mxu1 %v8596_v9  ;;  %v8621_v45 = vld [vmem:[%s12036_s3 + $0x380] ss:$16 sps:$4 sm:$0xff]   ;;  %v8622_v9 = vld [vmem:[%s12036_s3 + $0x388] ss:$16 sps:$4 sm:$0xff]  }
 0x282   :  { %3658 = vmatpush1.bf16.msra.mxu0 %v8597_v7  ;;  %3711 = vmatpush1.bf16.msra.mxu1 %v8598_v17  ;;  %v8623_v7 = vld [vmem:[%s12036_s3 + $0x364] ss:$16 sps:$4 sm:$0xff]   ;;  %v8624_v17 = vld [vmem:[%s12036_s3 + $0x36c] ss:$16 sps:$4 sm:$0xff]  }
 0x283   :  { %3659 = vmatprep.subr.bf16.mxu0 %v8599_v23  ;;  %3712 = vmatprep.subr.bf16.mxu1 %v8600_v46  ;;  %v8625_v23 = vld [vmem:[%s12036_s3 + $0x360] ss:$16 sps:$4 sm:$0xff]   ;;  %v8626_v46 = vld [vmem:[%s12036_s3 + $0x368] ss:$16 sps:$4 sm:$0xff]  }
 0x286   :  { %3660 = vmatpush1.bf16.msra.mxu0 %v8601_v30  ;;  %3713 = vmatpush1.bf16.msra.mxu1 %v8602_v52  ;;  %v8627_v30 = vld [vmem:[%s12036_s3 + $0x344] ss:$16 sps:$4 sm:$0xff]   ;;  %v8628_v52 = vld [vmem:[%s12036_s3 + $0x34c] ss:$16 sps:$4 sm:$0xff]  }
 0x287   :  { %3661 = vmatprep.subr.bf16.mxu0 %v8603_v8  ;;  %3714 = vmatprep.subr.bf16.mxu1 %v8604_v55  ;;  %v8629_v8 = vld [vmem:[%s12036_s3 + $0x340] ss:$16 sps:$4 sm:$0xff]   ;;  %v8630_v55 = vld [vmem:[%s12036_s3 + $0x348] ss:$16 sps:$4 sm:$0xff]  }
 0x28a   :  { %3662 = vmatpush1.bf16.msra.mxu0 %v8605_v49  ;;  %3715 = vmatpush1.bf16.msra.mxu1 %v8606_v20  ;;  %v8631_v49 = vld [vmem:[%s12036_s3 + $0x324] ss:$16 sps:$4 sm:$0xff]   ;;  %v8632_v20 = vld [vmem:[%s12036_s3 + $0x32c] ss:$16 sps:$4 sm:$0xff]  }
 0x28b   :  { %3663 = vmatprep.subr.bf16.mxu0 %v8607_v37  ;;  %3716 = vmatprep.subr.bf16.mxu1 %v8608_v59  ;;  %v8633_v37 = vld [vmem:[%s12036_s3 + $0x320] ss:$16 sps:$4 sm:$0xff]   ;;  %v8634_v59 = vld [vmem:[%s12036_s3 + $0x328] ss:$16 sps:$4 sm:$0xff]  }
 0x28e   :  { %3664 = vmatpush2.bf16.msra.mxu0 %v8609_v43  ;;  %3717 = vmatpush2.bf16.msra.mxu1 %v8610_v58  ;;  %v8635_v43 = vld [vmem:[%s12036_s3 + $0x304] ss:$16 sps:$4 sm:$0xff]   ;;  %v8636_v58 = vld [vmem:[%s12036_s3 + $0x30c] ss:$16 sps:$4 sm:$0xff]  }
 0x28f   :  { %3665 = vmatprep.subr.bf16.mxu0 %v8611_v28  ;;  %3718 = vmatprep.subr.bf16.mxu1 %v8612_v21  ;;  %v8637_v28 = vld [vmem:[%s12036_s3 + $0x300] ss:$16 sps:$4 sm:$0xff]   ;;  %v8638_v21 = vld [vmem:[%s12036_s3 + $0x308] ss:$16 sps:$4 sm:$0xff]  }
 0x292   :  { %3666 = vmatpush2.bf16.msra.mxu0 %v8613_v5  ;;  %3719 = vmatpush2.bf16.msra.mxu1 %v8614_v60 }
 0x293   :  { %3667 = vmatprep.subr.bf16.mxu0 %v8615_v11  ;;  %3720 = vmatprep.subr.bf16.mxu1 %v8616_v57 }
 0x296   :  { %3668 = vmatpush2.bf16.msra.mxu0 %v8617_v3  ;;  %3721 = vmatpush2.bf16.msra.mxu1 %v8618_v56  ;;  %v8639_v3 = vld [vmem:[%s12036_s3 + $0xe4] ss:$16 sps:$4 sm:$0xff]   ;;  %v8640_v56 = vld [vmem:[%s12036_s3 + $0xec] ss:$16 sps:$4 sm:$0xff]  }
 0x297   :  { %3669 = vmatprep.subr.bf16.mxu0 %v8619_v16  ;;  %3722 = vmatprep.subr.bf16.mxu1 %v8620_v44 }
 0x29a   :  { %3670 = vmatpush2.bf16.msra.mxu0 %v8621_v45  ;;  %3723 = vmatpush2.bf16.msra.mxu1 %v8622_v9 }
 0x29b   :  { %3671 = vmatprep.subr.bf16.mxu0 %v8623_v7  ;;  %3724 = vmatprep.subr.bf16.mxu1 %v8624_v17  ;;  %v8641_v7 = vld [vmem:[%s12036_s3 + $0xe0] ss:$16 sps:$4 sm:$0xff]   ;;  %v8644_v17 = vld [vmem:[%s12036_s3 + $0xcc] ss:$16 sps:$4 sm:$0xff]  }
 0x29e   :  { %3672 = vmatpush2.bf16.msra.mxu0 %v8625_v23  ;;  %3725 = vmatpush2.bf16.msra.mxu1 %v8626_v46 }
 0x29f   :  { %3673 = vmatprep.subr.bf16.mxu0 %v8627_v30  ;;  %3726 = vmatprep.subr.bf16.mxu1 %v8628_v52 }
 0x2a2   :  { %3674 = vmatpush2.bf16.msra.mxu0 %v8629_v8  ;;  %3727 = vmatpush2.bf16.msra.mxu1 %v8630_v55  ;;  %v8645_v8 = vld [vmem:[%s12036_s3 + $0xc0] ss:$16 sps:$4 sm:$0xff]   ;;  %v8646_v55 = vld [vmem:[%s12036_s3 + $0xc8] ss:$16 sps:$4 sm:$0xff]  }
 0x2a3   :  { %3675 = vmatprep.subr.bf16.mxu0 %v8631_v49  ;;  %3728 = vmatprep.subr.bf16.mxu1 %v8632_v20  ;;  %v8648_v20 = vld [vmem:[%s12036_s3 + $0xac] ss:$16 sps:$4 sm:$0xff]  }
 0x2a6   :  { %3676 = vmatpush2.bf16.msra.mxu0 %v8633_v37  ;;  %3729 = vmatpush2.bf16.msra.mxu1 %v8634_v59 }
 0x2a7   :  { %3677 = vmatprep.subr.bf16.mxu0 %v8635_v43  ;;  %3730 = vmatprep.subr.bf16.mxu1 %v8636_v58 }
 0x2aa   :  { %3678 = vmatpush2.bf16.msra.mxu0 %v8637_v28  ;;  %3731 = vmatpush2.bf16.msra.mxu1 %v8638_v21  ;;  %v2492_v5 = vpop.f32.mrf.mxu0  ;;  %v2545_v60 = vpop.f32.mrf.mxu1  ;;  %v8649_v28 = vld [vmem:[%s12036_s3 + $0xa0] ss:$16 sps:$4 sm:$0xff]   ;;  %v8652_v21 = vld [vmem:[%s12036_s3 + $0x8c] ss:$16 sps:$4 sm:$0xff]  }
 0x2ab   :  { %v10795_v11 = vadd.f32 %v2492_v5, %v10544_v61  ;;  %v10798_v57 = vadd.f32 %v2545_v60, %v10547_v32  ;;  %3753 = vmatprep.subr.bf16.mxu0 %v8639_v3  ;;  %3806 = vmatprep.subr.bf16.mxu1 %v8640_v56  ;;  %v8654_v56 = vld [vmem:[%s12036_s3 + $0x88] ss:$16 sps:$4 sm:$0xff]  }
 0x2ac   :  { %v2494_v16 = vpop.f32.mrf.mxu0  ;;  %v2547_v44 = vpop.f32.mrf.mxu1 }
 0x2ad   :  { %3680 = vmatmul.mubr.bf16.vlgmr.msra.gmra.mxu0 %v9541_v14  ;;  %3733 = vmatmul.mubr.bf16.vlgmr.msra.gmra.mxu1 %v9541_v14  ;;  %v10809_v61 = vadd.f32 %v2494_v16, %v10561_v22  ;;  %v10812_v32 = vadd.f32 %v2547_v44, %v10564_v26  ;;  %v8642_v14 = vld [vmem:[%s12036_s3 + $0xe8] ss:$16 sps:$4 sm:$0xff]   ;;  %v8655_v16 = vld [vmem:[%s12036_s3 + $0x64] ss:$16 sps:$4 sm:$0xff]  }
 0x2ae   :  { %3689 = vmatprep.mubr.bf16.mxu0 %v9573_v6  ;;  %3742 = vmatprep.mubr.bf16.mxu1 %v9573_v6  ;;  %v2496_v45 = vpop.f32.mrf.mxu0  ;;  %v2549_v9 = vpop.f32.mrf.mxu1  ;;  %v8643_v6 = vld [vmem:[%s12036_s3 + $0xc4] ss:$16 sps:$4 sm:$0xff]   ;;  %v8658_v44 = vld [vmem:[%s12036_s3 + $0x68] ss:$16 sps:$4 sm:$0xff]  }
 0x2af   :  { %3754 = vmatpush1.bf16.msra.mxu0 %v8641_v7  ;;  %3807 = vmatpush1.bf16.msra.mxu1 %v8642_v14  ;;  %v10823_v22 = vadd.f32 %v2496_v45, %v10575_v34  ;;  %v10826_v26 = vadd.f32 %v2549_v9, %v10578_v40  ;;  %v8659_v45 = vld [vmem:[%s12036_s3 + $0x44] ss:$16 sps:$4 sm:$0xff]   ;;  %v8660_v9 = vld [vmem:[%s12036_s3 + $0x4c] ss:$16 sps:$4 sm:$0xff]   ;;  %v8661_v7 = vld [vmem:[%s12036_s3 + $0x40] ss:$16 sps:$4 sm:$0xff]  }
 0x2b0   :  { %3755 = vmatprep.subr.bf16.mxu0 %v8643_v6  ;;  %3808 = vmatprep.subr.bf16.mxu1 %v8644_v17  ;;  %v2498_v23 = vpop.f32.mrf.mxu0  ;;  %v2551_v46 = vpop.f32.mrf.mxu1  ;;  %v8662_v14 = vld [vmem:[%s12036_s3 + $0x48] ss:$16 sps:$4 sm:$0xff]   ;;  %v8663_v6 = vld [vmem:[%s12036_s3 + $0x24] ss:$16 sps:$4 sm:$0xff]   ;;  %v8664_v17 = vld [vmem:[%s12036_s3 + $0x2c] ss:$16 sps:$4 sm:$0xff]  }
 0x2b1   :  { %v10835_v30 = vadd.f32 %v2498_v23, %v10587_v25  ;;  %v10838_v34 = vadd.f32 %v2551_v46, %v10590_v27  ;;  %v8647_v27 = vld [vmem:[%s12036_s3 + $0xa4] ss:$16 sps:$4 sm:$0xff]   ;;  %v8665_v23 = vld [vmem:[%s12036_s3 + $0x20] ss:$16 sps:$4 sm:$0xff]   ;;  %v8666_v46 = vld [vmem:[%s12036_s3 + $0x28] ss:$16 sps:$4 sm:$0xff]  }
 0x2b2   :  { %v2502_v40 = vpop.f32.mrf.mxu0  ;;  %v2555_v52 = vpop.f32.mrf.mxu1 }
 0x2b3   :  { %3756 = vmatpush1.bf16.msra.mxu0 %v8645_v8  ;;  %3809 = vmatpush1.bf16.msra.mxu1 %v8646_v55  ;;  %v10847_v49 = vadd.f32 %v2502_v40, %v10599_v33  ;;  %v10850_v25 = vadd.f32 %v2555_v52, %v10602_v19  ;;  %v8667_v40 = vld [vmem:[%s12036_s3 + $0x4] ss:$16 sps:$4 sm:$0xff]   ;;  %v8668_v52 = vld [vmem:[%s12036_s3 + $0xc] ss:$16 sps:$4 sm:$0xff]   ;;  %v8669_v8 = vld [vmem:[%s12036_s3] ss:$16 sps:$4 sm:$0xff]  }
 0x2b4   :  { %3757 = vmatprep.subr.bf16.mxu0 %v8647_v27  ;;  %3810 = vmatprep.subr.bf16.mxu1 %v8648_v20  ;;  %v2504_v37 = vpop.f32.mrf.mxu0  ;;  %v2557_v59 = vpop.f32.mrf.mxu1  ;;  %v8670_v55 = vld [vmem:[%s12036_s3 + $0x8] ss:$16 sps:$4 sm:$0xff]   ;;  %v8671_v27 = vld [vmem:[%s12036_s3 + $0x1e4] ss:$16 sps:$4 sm:$0xff]   ;;  %v8672_v20 = vld [vmem:[%s12036_s3 + $0x1ec] ss:$16 sps:$4 sm:$0xff]  }
 0x2b5   :  { %3690 = vmatmul.mubr.bf16.gmra.mxu0 %v9569_v63  ;;  %3743 = vmatmul.mubr.bf16.gmra.mxu1 %v9569_v63  ;;  %v10861_v33 = vadd.f32 %v2504_v37, %v10613_v42  ;;  %v10864_v19 = vadd.f32 %v2557_v59, %v10616_v41  ;;  %v8650_v63 = vld [vmem:[%s12036_s3 + $0xa8] ss:$16 sps:$4 sm:$0xff]   ;;  %v8673_v37 = vld [vmem:[%s12036_s3 + $0x1e0] ss:$16 sps:$4 sm:$0xff]  }
 0x2b6   :  { %3785 = vmatprep.mubr.bf16.mxu0 %v9681_v51  ;;  %3838 = vmatprep.mubr.bf16.mxu1 %v9681_v51  ;;  %v2506_v43 = vpop.f32.mrf.mxu0  ;;  %v2559_v58 = vpop.f32.mrf.mxu1  ;;  %v8651_v51 = vld [vmem:[%s12036_s3 + $0x84] ss:$16 sps:$4 sm:$0xff]   ;;  %v8674_v59 = vld [vmem:[%s12036_s3 + $0x1e8] ss:$16 sps:$4 sm:$0xff]  }
 0x2b7   :  { %3758 = vmatpush1.bf16.msra.mxu0 %v8649_v28  ;;  %3811 = vmatpush1.bf16.msra.mxu1 %v8650_v63  ;;  %v10875_v42 = vadd.f32 %v2506_v43, %v10627_v4  ;;  %v10878_v41 = vadd.f32 %v2559_v58, %v10630_v1  ;;  %v8653_v1 = vld [vmem:[%s12036_s3 + $0x80] ss:$16 sps:$4 sm:$0xff]   ;;  %v8675_v43 = vld [vmem:[%s12036_s3 + $0x1c4] ss:$16 sps:$4 sm:$0xff]   ;;  %v8676_v58 = vld [vmem:[%s12036_s3 + $0x1cc] ss:$16 sps:$4 sm:$0xff]  }
 0x2b8   :  { %3759 = vmatprep.subr.bf16.mxu0 %v8651_v51  ;;  %3812 = vmatprep.subr.bf16.mxu1 %v8652_v21  ;;  %v2508_v5 = vpop.f32.mrf.mxu0  ;;  %v2561_v60 = vpop.f32.mrf.mxu1  ;;  %v8677_v28 = vld [vmem:[%s12036_s3 + $0x1c0] ss:$16 sps:$4 sm:$0xff]   ;;  %v8678_v63 = vld [vmem:[%s12036_s3 + $0x1c8] ss:$16 sps:$4 sm:$0xff]   ;;  %v8679_v51 = vld [vmem:[%s12036_s3 + $0x1a4] ss:$16 sps:$4 sm:$0xff]  }
 0x2b9   :  { %v10887_v3 = vadd.f32 %v2508_v5, %v10639_v53  ;;  %v10890_v4 = vadd.f32 %v2561_v60, %v10642_v38  ;;  %v8656_v53 = vld [vmem:[%s12036_s3 + $0x6c] ss:$16 sps:$4 sm:$0xff]   ;;  %v8657_v38 = vld [vmem:[%s12036_s3 + $0x60] ss:$16 sps:$4 sm:$0xff]   ;;  %v8682_v60 = vld [vmem:[%s12036_s3 + $0x1a8] ss:$16 sps:$4 sm:$0xff]  }
 0x2ba   :  { %v8680_v21 = vld [vmem:[%s12036_s3 + $0x1ac] ss:$16 sps:$4 sm:$0xff]   ;;  %v8681_v5 = vld [vmem:[%s12036_s3 + $0x1a0] ss:$16 sps:$4 sm:$0xff]  }
 0x2bb   :  { %3760 = vmatpush1.bf16.msra.mxu0 %v8653_v1  ;;  %3813 = vmatpush1.bf16.msra.mxu1 %v8654_v56  ;;  %v8683_v1 = vld [vmem:[%s12036_s3 + $0x184] ss:$16 sps:$4 sm:$0xff]   ;;  %v8684_v56 = vld [vmem:[%s12036_s3 + $0x18c] ss:$16 sps:$4 sm:$0xff]  }
 0x2bc   :  { %3761 = vmatprep.subr.bf16.mxu0 %v8655_v16  ;;  %3814 = vmatprep.subr.bf16.mxu1 %v8656_v53  ;;  %v8685_v16 = vld [vmem:[%s12036_s3 + $0x180] ss:$16 sps:$4 sm:$0xff]   ;;  %v8686_v53 = vld [vmem:[%s12036_s3 + $0x188] ss:$16 sps:$4 sm:$0xff]  }
 0x2bf   :  { %3762 = vmatpush1.bf16.msra.mxu0 %v8657_v38  ;;  %3815 = vmatpush1.bf16.msra.mxu1 %v8658_v44  ;;  %v8687_v38 = vld [vmem:[%s12036_s3 + $0x164] ss:$16 sps:$4 sm:$0xff]   ;;  %v8688_v44 = vld [vmem:[%s12036_s3 + $0x16c] ss:$16 sps:$4 sm:$0xff]  }
 0x2c0   :  { %3763 = vmatprep.subr.bf16.mxu0 %v8659_v45  ;;  %3816 = vmatprep.subr.bf16.mxu1 %v8660_v9  ;;  %v8689_v45 = vld [vmem:[%s12036_s3 + $0x160] ss:$16 sps:$4 sm:$0xff]   ;;  %v8690_v9 = vld [vmem:[%s12036_s3 + $0x168] ss:$16 sps:$4 sm:$0xff]  }
 0x2c3   :  { %3764 = vmatpush1.bf16.msra.mxu0 %v8661_v7  ;;  %3817 = vmatpush1.bf16.msra.mxu1 %v8662_v14  ;;  %v8691_v7 = vld [vmem:[%s12036_s3 + $0x144] ss:$16 sps:$4 sm:$0xff]   ;;  %v8692_v14 = vld [vmem:[%s12036_s3 + $0x14c] ss:$16 sps:$4 sm:$0xff]  }
 0x2c4   :  { %3765 = vmatprep.subr.bf16.mxu0 %v8663_v6  ;;  %3818 = vmatprep.subr.bf16.mxu1 %v8664_v17  ;;  %v8693_v6 = vld [vmem:[%s12036_s3 + $0x140] ss:$16 sps:$4 sm:$0xff]   ;;  %v8694_v17 = vld [vmem:[%s12036_s3 + $0x148] ss:$16 sps:$4 sm:$0xff]  }
 0x2c7   :  { %3766 = vmatpush1.bf16.msra.mxu0 %v8665_v23  ;;  %3819 = vmatpush1.bf16.msra.mxu1 %v8666_v46  ;;  %v8695_v23 = vld [vmem:[%s12036_s3 + $0x124] ss:$16 sps:$4 sm:$0xff]   ;;  %v8696_v46 = vld [vmem:[%s12036_s3 + $0x12c] ss:$16 sps:$4 sm:$0xff]  }
 0x2c8   :  { %3767 = vmatprep.subr.bf16.mxu0 %v8667_v40  ;;  %3820 = vmatprep.subr.bf16.mxu1 %v8668_v52  ;;  %v8697_v40 = vld [vmem:[%s12036_s3 + $0x120] ss:$16 sps:$4 sm:$0xff]   ;;  %v8698_v52 = vld [vmem:[%s12036_s3 + $0x128] ss:$16 sps:$4 sm:$0xff]  }
 0x2cb   :  { %3768 = vmatpush1.bf16.msra.mxu0 %v8669_v8  ;;  %3821 = vmatpush1.bf16.msra.mxu1 %v8670_v55  ;;  %v8699_v8 = vld [vmem:[%s12036_s3 + $0x104] ss:$16 sps:$4 sm:$0xff]   ;;  %v8700_v55 = vld [vmem:[%s12036_s3 + $0x10c] ss:$16 sps:$4 sm:$0xff]  }
 0x2cc   :  { %3769 = vmatprep.subr.bf16.mxu0 %v8671_v27  ;;  %3822 = vmatprep.subr.bf16.mxu1 %v8672_v20  ;;  %v8701_v27 = vld [vmem:[%s12036_s3 + $0x100] ss:$16 sps:$4 sm:$0xff]   ;;  %v8702_v20 = vld [vmem:[%s12036_s3 + $0x108] ss:$16 sps:$4 sm:$0xff]  }
 0x2cf   :  { %3770 = vmatpush2.bf16.msra.mxu0 %v8673_v37  ;;  %3823 = vmatpush2.bf16.msra.mxu1 %v8674_v59 }
 0x2d0   :  { %3771 = vmatprep.subr.bf16.mxu0 %v8675_v43  ;;  %3824 = vmatprep.subr.bf16.mxu1 %v8676_v58 }
 0x2d3   :  { %3772 = vmatpush2.bf16.msra.mxu0 %v8677_v28  ;;  %3825 = vmatpush2.bf16.msra.mxu1 %v8678_v63  ;;  %v8703_v28 = vld [vmem:[%s12036_s3 + $0x4e4] ss:$16 sps:$4 sm:$0xff]   ;;  %v8704_v63 = vld [vmem:[%s12036_s3 + $0x4ec] ss:$16 sps:$4 sm:$0xff]  }
 0x2d4   :  { %3773 = vmatprep.subr.bf16.mxu0 %v8679_v51  ;;  %3826 = vmatprep.subr.bf16.mxu1 %v8680_v21 }
 0x2d7   :  { %3774 = vmatpush2.bf16.msra.mxu0 %v8681_v5  ;;  %3827 = vmatpush2.bf16.msra.mxu1 %v8682_v60 }
 0x2d8   :  { %3775 = vmatprep.subr.bf16.mxu0 %v8683_v1  ;;  %3828 = vmatprep.subr.bf16.mxu1 %v8684_v56  ;;  %v8705_v1 = vld [vmem:[%s12036_s3 + $0x4e0] ss:$16 sps:$4 sm:$0xff]   ;;  %v8707_v56 = vld [vmem:[%s12036_s3 + $0x4c4] ss:$16 sps:$4 sm:$0xff]  }
 0x2db   :  { %3776 = vmatpush2.bf16.msra.mxu0 %v8685_v16  ;;  %3829 = vmatpush2.bf16.msra.mxu1 %v8686_v53  ;;  %v8708_v16 = vld [vmem:[%s12036_s3 + $0x4cc] ss:$16 sps:$4 sm:$0xff]  }
 0x2dc   :  { %3777 = vmatprep.subr.bf16.mxu0 %v8687_v38  ;;  %3830 = vmatprep.subr.bf16.mxu1 %v8688_v44 }
 0x2df   :  { %3778 = vmatpush2.bf16.msra.mxu0 %v8689_v45  ;;  %3831 = vmatpush2.bf16.msra.mxu1 %v8690_v9  ;;  %v8709_v9 = vld [vmem:[%s12036_s3 + $0x4c0] ss:$16 sps:$4 sm:$0xff]  }
 0x2e0   :  { %3779 = vmatprep.subr.bf16.mxu0 %v8691_v7  ;;  %3832 = vmatprep.subr.bf16.mxu1 %v8692_v14  ;;  %v8710_v7 = vld [vmem:[%s12036_s3 + $0x4c8] ss:$16 sps:$4 sm:$0xff]  }
 0x2e3   :  { %3780 = vmatpush2.bf16.msra.mxu0 %v8693_v6  ;;  %3833 = vmatpush2.bf16.msra.mxu1 %v8694_v17  ;;  %v8712_v6 = vld [vmem:[%s12036_s3 + $0x4ac] ss:$16 sps:$4 sm:$0xff]  }
 0x2e4   :  { %3781 = vmatprep.subr.bf16.mxu0 %v8695_v23  ;;  %3834 = vmatprep.subr.bf16.mxu1 %v8696_v46 }
 0x2e7   :  { %3782 = vmatpush2.bf16.msra.mxu0 %v8697_v40  ;;  %3835 = vmatpush2.bf16.msra.mxu1 %v8698_v52  ;;  %v8713_v52 = vld [vmem:[%s12036_s3 + $0x4a0] ss:$16 sps:$4 sm:$0xff]  }
 0x2e8   :  { %3783 = vmatprep.subr.bf16.mxu0 %v8699_v8  ;;  %3836 = vmatprep.subr.bf16.mxu1 %v8700_v55  ;;  %v8714_v8 = vld [vmem:[%s12036_s3 + $0x4a8] ss:$16 sps:$4 sm:$0xff]   ;;  %v8716_v55 = vld [vmem:[%s12036_s3 + $0x48c] ss:$16 sps:$4 sm:$0xff]  }
 0x2eb   :  { %3784 = vmatpush2.bf16.msra.mxu0 %v8701_v27  ;;  %3837 = vmatpush2.bf16.msra.mxu1 %v8702_v20  ;;  %v2999_v37 = vpop.f32.mrf.mxu0  ;;  %v3052_v59 = vpop.f32.mrf.mxu1 }
 0x2ec   :  { %v11043_v43 = vadd.f32 %v2999_v37, %v10795_v11  ;;  %v11046_v58 = vadd.f32 %v3052_v59, %v10798_v57  ;;  %3859 = vmatprep.subr.bf16.mxu0 %v8703_v28  ;;  %3912 = vmatprep.subr.bf16.mxu1 %v8704_v63  ;;  %v8718_v59 = vld [vmem:[%s12036_s3 + $0x488] ss:$16 sps:$4 sm:$0xff]   ;;  %v8719_v28 = vld [vmem:[%s12036_s3 + $0x464] ss:$16 sps:$4 sm:$0xff]  }
 0x2ed   :  { %v3001_v51 = vpop.f32.mrf.mxu0  ;;  %v3054_v21 = vpop.f32.mrf.mxu1  ;;  %v8722_v63 = vld [vmem:[%s12036_s3 + $0x468] ss:$16 sps:$4 sm:$0xff]  }
 0x2ee   :  { %3786 = vmatmul.mubr.bf16.vlgmr.msra.gmra.mxu0 %v9679_v62  ;;  %3839 = vmatmul.mubr.bf16.vlgmr.msra.gmra.mxu1 %v9679_v62  ;;  %v11057_v11 = vadd.f32 %v3001_v51, %v10809_v61  ;;  %v11060_v57 = vadd.f32 %v3054_v21, %v10812_v32  ;;  %v8706_v62 = vld [vmem:[%s12036_s3 + $0x4e8] ss:$16 sps:$4 sm:$0xff]   ;;  %v8723_v51 = vld [vmem:[%s12036_s3 + $0x444] ss:$16 sps:$4 sm:$0xff]   ;;  %v8724_v21 = vld [vmem:[%s12036_s3 + $0x44c] ss:$16 sps:$4 sm:$0xff]  }
 0x2ef   :  { %3795 = vmatprep.mubr.bf16.mxu0 %v9709_v31  ;;  %3848 = vmatprep.mubr.bf16.mxu1 %v9709_v31  ;;  %v3003_v5 = vpop.f32.mrf.mxu0  ;;  %v3056_v60 = vpop.f32.mrf.mxu1 }
 0x2f0   :  { %3860 = vmatpush1.bf16.msra.mxu0 %v8705_v1  ;;  %3913 = vmatpush1.bf16.msra.mxu1 %v8706_v62  ;;  %v11071_v61 = vadd.f32 %v3003_v5, %v10823_v22  ;;  %v11074_v32 = vadd.f32 %v3056_v60, %v10826_v26  ;;  %v8725_v5 = vld [vmem:[%s12036_s3 + $0x440] ss:$16 sps:$4 sm:$0xff]   ;;  %v8726_v60 = vld [vmem:[%s12036_s3 + $0x448] ss:$16 sps:$4 sm:$0xff]   ;;  %v8727_v1 = vld [vmem:[%s12036_s3 + $0x424] ss:$16 sps:$4 sm:$0xff]  }
 0x2f1   :  { %3861 = vmatprep.subr.bf16.mxu0 %v8707_v56  ;;  %3914 = vmatprep.subr.bf16.mxu1 %v8708_v16  ;;  %v3005_v53 = vpop.f32.mrf.mxu0  ;;  %v3058_v38 = vpop.f32.mrf.mxu1  ;;  %v8728_v62 = vld [vmem:[%s12036_s3 + $0x42c] ss:$16 sps:$4 sm:$0xff]   ;;  %v8729_v56 = vld [vmem:[%s12036_s3 + $0x420] ss:$16 sps:$4 sm:$0xff]   ;;  %v8730_v16 = vld [vmem:[%s12036_s3 + $0x428] ss:$16 sps:$4 sm:$0xff]  }
 0x2f2   :  { %v11083_v44 = vadd.f32 %v3005_v53, %v10835_v30  ;;  %v11086_v22 = vadd.f32 %v3058_v38, %v10838_v34  ;;  %v8711_v34 = vld [vmem:[%s12036_s3 + $0x4a4] ss:$16 sps:$4 sm:$0xff]   ;;  %v8732_v38 = vld [vmem:[%s12036_s3 + $0x40c] ss:$16 sps:$4 sm:$0xff]  }
 0x2f3   :  { %v3009_v26 = vpop.f32.mrf.mxu0  ;;  %v3062_v45 = vpop.f32.mrf.mxu1  ;;  %v8731_v53 = vld [vmem:[%s12036_s3 + $0x404] ss:$16 sps:$4 sm:$0xff]  }
 0x2f4   :  { %3862 = vmatpush1.bf16.msra.mxu0 %v8709_v9  ;;  %3915 = vmatpush1.bf16.msra.mxu1 %v8710_v7  ;;  %v11095_v14 = vadd.f32 %v3009_v26, %v10847_v49  ;;  %v11098_v30 = vadd.f32 %v3062_v45, %v10850_v25  ;;  %v8733_v26 = vld [vmem:[%s12036_s3 + $0x400] ss:$16 sps:$4 sm:$0xff]   ;;  %v8734_v45 = vld [vmem:[%s12036_s3 + $0x408] ss:$16 sps:$4 sm:$0xff]   ;;  %v8735_v9 = vld [vmem:[%s12036_s3 + $0x5e4] ss:$16 sps:$4 sm:$0xff]  }
 0x2f5   :  { %3863 = vmatprep.subr.bf16.mxu0 %v8711_v34  ;;  %3916 = vmatprep.subr.bf16.mxu1 %v8712_v6  ;;  %v3011_v17 = vpop.f32.mrf.mxu0  ;;  %v3064_v23 = vpop.f32.mrf.mxu1  ;;  %v8736_v7 = vld [vmem:[%s12036_s3 + $0x5ec] ss:$16 sps:$4 sm:$0xff]   ;;  %v8737_v34 = vld [vmem:[%s12036_s3 + $0x5e0] ss:$16 sps:$4 sm:$0xff]   ;;  %v8738_v6 = vld [vmem:[%s12036_s3 + $0x5e8] ss:$16 sps:$4 sm:$0xff]  }
 0x2f6   :  { %3796 = vmatmul.mubr.bf16.gmra.mxu0 %v9718_v48  ;;  %3849 = vmatmul.mubr.bf16.gmra.mxu1 %v9718_v48  ;;  %v11109_v49 = vadd.f32 %v3011_v17, %v10861_v33  ;;  %v11112_v25 = vadd.f32 %v3064_v23, %v10864_v19  ;;  %v8739_v17 = vld [vmem:[%s12036_s3 + $0x5c4] ss:$16 sps:$4 sm:$0xff]   ;;  %v8740_v23 = vld [vmem:[%s12036_s3 + $0x5cc] ss:$16 sps:$4 sm:$0xff]  }
 0x2f7   :  { %3891 = vmatprep.mubr.bf16.mxu0 %v9699_v54  ;;  %3944 = vmatprep.mubr.bf16.mxu1 %v9699_v54  ;;  %v3013_v46 = vpop.f32.mrf.mxu0  ;;  %v3066_v40 = vpop.f32.mrf.mxu1  ;;  %v8715_v54 = vld [vmem:[%s12036_s3 + $0x484] ss:$16 sps:$4 sm:$0xff]  }
 0x2f8   :  { %3864 = vmatpush1.bf16.msra.mxu0 %v8713_v52  ;;  %3917 = vmatpush1.bf16.msra.mxu1 %v8714_v8  ;;  %v11123_v33 = vadd.f32 %v3013_v46, %v10875_v42  ;;  %v11126_v19 = vadd.f32 %v3066_v40, %v10878_v41  ;;  %v8717_v41 = vld [vmem:[%s12036_s3 + $0x480] ss:$16 sps:$4 sm:$0xff]   ;;  %v8742_v40 = vld [vmem:[%s12036_s3 + $0x5c8] ss:$16 sps:$4 sm:$0xff]   ;;  %v8743_v52 = vld [vmem:[%s12036_s3 + $0x5a4] ss:$16 sps:$4 sm:$0xff]  }
 0x2f9   :  { %3865 = vmatprep.subr.bf16.mxu0 %v8715_v54  ;;  %3918 = vmatprep.subr.bf16.mxu1 %v8716_v55  ;;  %v3015_v27 = vpop.f32.mrf.mxu0  ;;  %v3068_v20 = vpop.f32.mrf.mxu1  ;;  %v8741_v46 = vld [vmem:[%s12036_s3 + $0x5c0] ss:$16 sps:$4 sm:$0xff]   ;;  %v8744_v8 = vld [vmem:[%s12036_s3 + $0x5ac] ss:$16 sps:$4 sm:$0xff]   ;;  %v8746_v55 = vld [vmem:[%s12036_s3 + $0x5a8] ss:$16 sps:$4 sm:$0xff]  }
 0x2fa   :  { %v11135_v37 = vadd.f32 %v3015_v27, %v10887_v3  ;;  %v11138_v42 = vadd.f32 %v3068_v20, %v10890_v4  ;;  %v8720_v3 = vld [vmem:[%s12036_s3 + $0x46c] ss:$16 sps:$4 sm:$0xff]   ;;  %v8721_v4 = vld [vmem:[%s12036_s3 + $0x460] ss:$16 sps:$4 sm:$0xff]   ;;  %v8747_v27 = vld [vmem:[%s12036_s3 + $0x584] ss:$16 sps:$4 sm:$0xff]  }
 0x2fb   :  { %v8745_v54 = vld [vmem:[%s12036_s3 + $0x5a0] ss:$16 sps:$4 sm:$0xff]   ;;  %v8748_v20 = vld [vmem:[%s12036_s3 + $0x58c] ss:$16 sps:$4 sm:$0xff]  }
 0x2fc   :  { %3866 = vmatpush1.bf16.msra.mxu0 %v8717_v41  ;;  %3919 = vmatpush1.bf16.msra.mxu1 %v8718_v59  ;;  %v8749_v41 = vld [vmem:[%s12036_s3 + $0x580] ss:$16 sps:$4 sm:$0xff]   ;;  %v8750_v59 = vld [vmem:[%s12036_s3 + $0x588] ss:$16 sps:$4 sm:$0xff]  }
 0x2fd   :  { %3867 = vmatprep.subr.bf16.mxu0 %v8719_v28  ;;  %3920 = vmatprep.subr.bf16.mxu1 %v8720_v3  ;;  %v8751_v28 = vld [vmem:[%s12036_s3 + $0x564] ss:$16 sps:$4 sm:$0xff]   ;;  %v8752_v3 = vld [vmem:[%s12036_s3 + $0x56c] ss:$16 sps:$4 sm:$0xff]  }
 0x300   :  { %3868 = vmatpush1.bf16.msra.mxu0 %v8721_v4  ;;  %3921 = vmatpush1.bf16.msra.mxu1 %v8722_v63  ;;  %v8753_v4 = vld [vmem:[%s12036_s3 + $0x560] ss:$16 sps:$4 sm:$0xff]   ;;  %v8754_v63 = vld [vmem:[%s12036_s3 + $0x568] ss:$16 sps:$4 sm:$0xff]  }
 0x301   :  { %3869 = vmatprep.subr.bf16.mxu0 %v8723_v51  ;;  %3922 = vmatprep.subr.bf16.mxu1 %v8724_v21  ;;  %v8755_v51 = vld [vmem:[%s12036_s3 + $0x544] ss:$16 sps:$4 sm:$0xff]   ;;  %v8756_v21 = vld [vmem:[%s12036_s3 + $0x54c] ss:$16 sps:$4 sm:$0xff]  }
 0x304   :  { %3870 = vmatpush1.bf16.msra.mxu0 %v8725_v5  ;;  %3923 = vmatpush1.bf16.msra.mxu1 %v8726_v60  ;;  %v8757_v5 = vld [vmem:[%s12036_s3 + $0x540] ss:$16 sps:$4 sm:$0xff]   ;;  %v8758_v60 = vld [vmem:[%s12036_s3 + $0x548] ss:$16 sps:$4 sm:$0xff]  }
 0x305   :  { %3871 = vmatprep.subr.bf16.mxu0 %v8727_v1  ;;  %3924 = vmatprep.subr.bf16.mxu1 %v8728_v62  ;;  %v8759_v1 = vld [vmem:[%s12036_s3 + $0x524] ss:$16 sps:$4 sm:$0xff]   ;;  %v8760_v62 = vld [vmem:[%s12036_s3 + $0x52c] ss:$16 sps:$4 sm:$0xff]  }
 0x308   :  { %3872 = vmatpush1.bf16.msra.mxu0 %v8729_v56  ;;  %3925 = vmatpush1.bf16.msra.mxu1 %v8730_v16  ;;  %v8761_v56 = vld [vmem:[%s12036_s3 + $0x520] ss:$16 sps:$4 sm:$0xff]   ;;  %v8762_v16 = vld [vmem:[%s12036_s3 + $0x528] ss:$16 sps:$4 sm:$0xff]  }
 0x309   :  { %3873 = vmatprep.subr.bf16.mxu0 %v8731_v53  ;;  %3926 = vmatprep.subr.bf16.mxu1 %v8732_v38  ;;  %v1091_v53 = vld [vmem:[%s12037_s4] sm:$0xf]  ;;  %v8763_v38 = vld [vmem:[%s12036_s3 + $0x504] ss:$16 sps:$4 sm:$0xff]  }
 0x30c   :  { %3874 = vmatpush1.bf16.msra.mxu0 %v8733_v26  ;;  %3927 = vmatpush1.bf16.msra.mxu1 %v8734_v45  ;;  %v8764_v26 = vld [vmem:[%s12036_s3 + $0x50c] ss:$16 sps:$4 sm:$0xff]   ;;  %v11288_v45 = vrot.slane %v1091_v53, %v9438_v29 }
 0x30d   :  { %3875 = vmatprep.subr.bf16.mxu0 %v8735_v9  ;;  %3928 = vmatprep.subr.bf16.mxu1 %v8736_v7  ;;  %v12059_v9 = vld [vmem:[#allocation5_spill] sm:$0xff] }
 0x30e   :  { %v11291_v7 = vrot.slane %v1091_v53, %v12059_v9 }
 0x310   :  { %3876 = vmatpush2.bf16.msra.mxu0 %v8737_v34  ;;  %3929 = vmatpush2.bf16.msra.mxu1 %v8738_v6  ;;  %v8765_v34 = vld [vmem:[%s12036_s3 + $0x500] ss:$16 sps:$4 sm:$0xff]   ;;  %v8766_v6 = vld [vmem:[%s12036_s3 + $0x508] ss:$16 sps:$4 sm:$0xff]  }
 0x311   :  { %3877 = vmatprep.subr.bf16.mxu0 %v8739_v17  ;;  %3930 = vmatprep.subr.bf16.mxu1 %v8740_v23 }
 0x314   :  { %3878 = vmatpush2.bf16.msra.mxu0 %v8741_v46  ;;  %3931 = vmatpush2.bf16.msra.mxu1 %v8742_v40 }
 0x315   :  { %3879 = vmatprep.subr.bf16.mxu0 %v8743_v52  ;;  %3932 = vmatprep.subr.bf16.mxu1 %v8744_v8  ;;  %v8767_v52 = vld [vmem:[%s12036_s3 + $0x6e4] ss:$16 sps:$4 sm:$0xff]   ;;  %v8768_v8 = vld [vmem:[%s12036_s3 + $0x6ec] ss:$16 sps:$4 sm:$0xff]  }
 0x318   :  { %3880 = vmatpush2.bf16.msra.mxu0 %v8745_v54  ;;  %3933 = vmatpush2.bf16.msra.mxu1 %v8746_v55  ;;  %v12060_v54 = vld [vmem:[#allocation6_spill] sm:$0xff] }
 0x319   :  { %3881 = vmatprep.subr.bf16.mxu0 %v8747_v27  ;;  %3934 = vmatprep.subr.bf16.mxu1 %v8748_v20  ;;  %v11308_v55 = vrot.slane %v1091_v53, %v12060_v54 }
 0x31c   :  { %3882 = vmatpush2.bf16.msra.mxu0 %v8749_v41  ;;  %3935 = vmatpush2.bf16.msra.mxu1 %v8750_v59  ;;  %v12061_v41 = vld [vmem:[#allocation7_spill] sm:$0xff] }
 0x31d   :  { %3883 = vmatprep.subr.bf16.mxu0 %v8751_v28  ;;  %3936 = vmatprep.subr.bf16.mxu1 %v8752_v3  ;;  %v11311_v59 = vrot.slane %v1091_v53, %v12061_v41 }
 0x320   :  { %3884 = vmatpush2.bf16.msra.mxu0 %v8753_v4  ;;  %3937 = vmatpush2.bf16.msra.mxu1 %v8754_v63 }
 0x321   :  { %3885 = vmatprep.subr.bf16.mxu0 %v8755_v51  ;;  %3938 = vmatprep.subr.bf16.mxu1 %v8756_v21 }
 0x324   :  { %3886 = vmatpush2.bf16.msra.mxu0 %v8757_v5  ;;  %3939 = vmatpush2.bf16.msra.mxu1 %v8758_v60  ;;  %v8769_v5 = vld [vmem:[%s12036_s3 + $0x6e0] ss:$16 sps:$4 sm:$0xff]  }
 0x325   :  { %3887 = vmatprep.subr.bf16.mxu0 %v8759_v1  ;;  %3940 = vmatprep.subr.bf16.mxu1 %v8760_v62  ;;  %v8771_v1 = vld [vmem:[%s12036_s3 + $0x6c4] ss:$16 sps:$4 sm:$0xff]   ;;  %v8772_v62 = vld [vmem:[%s12036_s3 + $0x6cc] ss:$16 sps:$4 sm:$0xff]  }
 0x328   :  { %3888 = vmatpush2.bf16.msra.mxu0 %v8761_v56  ;;  %3941 = vmatpush2.bf16.msra.mxu1 %v8762_v16 }
 0x329   :  { %3889 = vmatprep.subr.bf16.mxu0 %v8763_v38  ;;  %3942 = vmatprep.subr.bf16.mxu1 %v8764_v26 }
 0x32c   :  { %3890 = vmatpush2.bf16.msra.mxu0 %v8765_v34  ;;  %3943 = vmatpush2.bf16.msra.mxu1 %v8766_v6  ;;  %v3506_v17 = vpop.f32.mrf.mxu0  ;;  %v3559_v23 = vpop.f32.mrf.mxu1 }
 0x32d   :  { %v3578_v46 = vadd.f32 %v3506_v17, %v11043_v43  ;;  %v3580_v40 = vadd.f32 %v3559_v23, %v11046_v58  ;;  %3981 = vmatprep.subr.bf16.mxu0 %v8767_v52  ;;  %4034 = vmatprep.subr.bf16.mxu1 %v8768_v8  ;;  %v8774_v52 = vld [vmem:[%s12036_s3 + $0x6c8] ss:$16 sps:$4 sm:$0xff]  }
 0x32e   :  { %v3508_v27 = vpop.f32.mrf.mxu0  ;;  %v3561_v20 = vpop.f32.mrf.mxu1 }
 0x32f   :  { %v3615_v43 = vadd.f32 %v11288_v45, %v3578_v46  ;;  %v3617_v58 = vadd.f32 %v11291_v7, %v3580_v40  ;;  %3892 = vmatmul.mubr.bf16.vlgmr.msra.gmra.mxu0 %v9683_v39  ;;  %3945 = vmatmul.mubr.bf16.vlgmr.msra.gmra.mxu1 %v9683_v39  ;;  %v3579_v28 = vadd.f32 %v3508_v27, %v11057_v11  ;;  %v8770_v39 = vld [vmem:[%s12036_s3 + $0x6e8] ss:$16 sps:$4 sm:$0xff]   ;;  %v8773_v40 = vld [vmem:[%s12036_s3 + $0x6c0] ss:$16 sps:$4 sm:$0xff]  }
 0x330   :  { %3901 = vmatprep.mubr.bf16.mxu0 %v9734_v13  ;;  %3954 = vmatprep.mubr.bf16.mxu1 %v9734_v13  ;;  %v3581_v3 = vadd.f32 %v3561_v20, %v11060_v57  ;;  %v3510_v4 = vpop.f32.mrf.mxu0  ;;  %v3563_v63 = vpop.f32.mrf.mxu1 }
 0x331   :  { %v3631_v51 = vmax.f32 %v3615_v43, 0.0  ;;  %v3633_v21 = vmax.f32 %v3617_v58, 0.0  ;;  %3982 = vmatpush1.bf16.msra.mxu0 %v8769_v5  ;;  %4035 = vmatpush1.bf16.msra.mxu1 %v8770_v39  ;;  %v3616_v11 = vadd.f32 %v11308_v55, %v3579_v28  ;;  %v3582_v13 = vadd.f32 %v3510_v4, %v11071_v61  ;;  %v8775_v58 = vld [vmem:[%s12036_s3 + $0x6a4] ss:$16 sps:$4 sm:$0xff]   ;;  %v8776_v28 = vld [vmem:[%s12036_s3 + $0x6ac] ss:$16 sps:$4 sm:$0xff]  }
 0x332   :  { %v3618_v57 = vadd.f32 %v11311_v59, %v3581_v3  ;;  %v3584_v60 = vadd.f32 %v3563_v63, %v11074_v32  ;;  %3983 = vmatprep.subr.bf16.mxu0 %v8771_v1  ;;  %4036 = vmatprep.subr.bf16.mxu1 %v8772_v62  ;;  %v3512_v56 = vpop.f32.mrf.mxu0  ;;  %v3565_v16 = vpop.f32.mrf.mxu1  ;;  %v8777_v1 = vld [vmem:[%s12036_s3 + $0x6a0] ss:$16 sps:$4 sm:$0xff]  }
 0x333   :  { %v11337_v53 = vmax.f32 %v3631_v51, %v3633_v21  ;;  %v3632_v38 = vmax.f32 %v3616_v11, 0.0  ;;  %v3619_v61 = vadd.f32 %v11288_v45, %v3582_v13  ;;  %v3583_v26 = vadd.f32 %v3512_v56, %v11083_v44 }
 0x334   :  { %v3634_v32 = vmax.f32 %v3618_v57, 0.0  ;;  %v3621_v34 = vadd.f32 %v11291_v7, %v3584_v60  ;;  %v3585_v6 = vadd.f32 %v3565_v16, %v11086_v22  ;;  %v3516_v17 = vpop.f32.mrf.mxu0  ;;  %v3569_v23 = vpop.f32.mrf.mxu1  ;;  %v8779_v16 = vld [vmem:[%s12036_s3 + $0x684] ss:$16 sps:$4 sm:$0xff]  }
 0x335   :  { %v3635_v46 = vmax.f32 %v3619_v61, 0.0  ;;  %3984 = vmatpush1.bf16.msra.mxu0 %v8773_v40  ;;  %4037 = vmatpush1.bf16.msra.mxu1 %v8774_v52  ;;  %v3620_v44 = vadd.f32 %v11308_v55, %v3583_v26  ;;  %v3586_v8 = vadd.f32 %v3516_v17, %v11095_v14  ;;  %v3588_v27 = vadd.f32 %v3569_v23, %v11098_v30  ;;  %v8781_v40 = vld [vmem:[%s12036_s3 + $0x680] ss:$16 sps:$4 sm:$0xff]   ;;  %v8782_v52 = vld [vmem:[%s12036_s3 + $0x688] ss:$16 sps:$4 sm:$0xff]  }
 0x336   :  { %v11352_v22 = vmax.f32 %v3632_v38, %v3634_v32  ;;  %v3637_v20 = vmax.f32 %v3621_v34, 0.0  ;;  %v3622_v43 = vadd.f32 %v11311_v59, %v3585_v6  ;;  %3985 = vmatprep.subr.bf16.mxu0 %v8775_v58  ;;  %4038 = vmatprep.subr.bf16.mxu1 %v8776_v28  ;;  %v3518_v3 = vpop.f32.mrf.mxu0  ;;  %v3571_v4 = vpop.f32.mrf.mxu1  ;;  %v8780_v38 = vld [vmem:[%s12036_s3 + $0x68c] ss:$16 sps:$4 sm:$0xff]  }
 0x337   :  { %v3636_v14 = vmax.f32 %v3620_v44, 0.0  ;;  %v3623_v30 = vadd.f32 %v11288_v45, %v3586_v8  ;;  %v3625_v63 = vadd.f32 %v11291_v7, %v3588_v27  ;;  %3902 = vmatmul.mubr.bf16.gmra.mxu0 %v9725_v12  ;;  %3955 = vmatmul.mubr.bf16.gmra.mxu1 %v9725_v12  ;;  %v3587_v51 = vadd.f32 %v3518_v3, %v11109_v49  ;;  %v8778_v12 = vld [vmem:[%s12036_s3 + $0x6a8] ss:$16 sps:$4 sm:$0xff]   ;;  %v8785_v3 = vld [vmem:[%s12036_s3 + $0x660] ss:$16 sps:$4 sm:$0xff]  }
 0x338   :  { %v11366_v21 = vmax.f32 %v3635_v46, %v3637_v20  ;;  %v3638_v5 = vmax.f32 %v3622_v43, 0.0  ;;  %4013 = vmatprep.mubr.bf16.mxu0 %v9909_v47  ;;  %4066 = vmatprep.mubr.bf16.mxu1 %v9909_v47  ;;  %v3589_v39 = vadd.f32 %v3571_v4, %v11112_v25  ;;  %v3520_v11 = vpop.f32.mrf.mxu0  ;;  %v3573_v13 = vpop.f32.mrf.mxu1  ;;  %v8784_v20 = vld [vmem:[%s12036_s3 + $0x66c] ss:$16 sps:$4 sm:$0xff]   ;;  %v8786_v4 = vld [vmem:[%s12036_s3 + $0x668] ss:$16 sps:$4 sm:$0xff]  }
 0x339   :  { %v3639_v57 = vmax.f32 %v3623_v30, 0.0  ;;  %v3641_v60 = vmax.f32 %v3625_v63, 0.0  ;;  %3986 = vmatpush1.bf16.msra.mxu0 %v8777_v1  ;;  %4039 = vmatpush1.bf16.msra.mxu1 %v8778_v12  ;;  %v3624_v49 = vadd.f32 %v11308_v55, %v3587_v51  ;;  %v3590_v47 = vadd.f32 %v3520_v11, %v11123_v33  ;;  %v8787_v30 = vld [vmem:[%s12036_s3 + $0x644] ss:$16 sps:$4 sm:$0xff]   ;;  %v8788_v63 = vld [vmem:[%s12036_s3 + $0x64c] ss:$16 sps:$4 sm:$0xff]  }
 0x33a   :  { %v11379_v62 = vmax.f32 %v3636_v14, %v3638_v5  ;;  %v3626_v25 = vadd.f32 %v11311_v59, %v3589_v39  ;;  %v3592_v56 = vadd.f32 %v3573_v13, %v11126_v19  ;;  %3987 = vmatprep.subr.bf16.mxu0 %v8779_v16  ;;  %4040 = vmatprep.subr.bf16.mxu1 %v8780_v38  ;;  %v3522_v61 = vpop.f32.mrf.mxu0  ;;  %v3575_v26 = vpop.f32.mrf.mxu1  ;;  %v8789_v51 = vld [vmem:[%s12036_s3 + $0x640] ss:$16 sps:$4 sm:$0xff]   ;;  %v8790_v5 = vld [vmem:[%s12036_s3 + $0x648] ss:$16 sps:$4 sm:$0xff]   ;;  %v8791_v39 = vld [vmem:[%s12036_s3 + $0x624] ss:$16 sps:$4 sm:$0xff]  }
 0x33b   :  { %v11389_v32 = vmax.f32 %v3639_v57, %v3641_v60  ;;  %v3640_v33 = vmax.f32 %v3624_v49, 0.0  ;;  %v3627_v34 = vadd.f32 %v11288_v45, %v3590_v47  ;;  %v3591_v6 = vadd.f32 %v3522_v61, %v11135_v37  ;;  %v8792_v11 = vld [vmem:[%s12036_s3 + $0x62c] ss:$16 sps:$4 sm:$0xff]   ;;  %v8793_v13 = vld [vmem:[%s12036_s3 + $0x620] ss:$16 sps:$4 sm:$0xff]  }
 0x33c   :  { %v3642_v19 = vmax.f32 %v3626_v25, 0.0  ;;  %v3629_v17 = vadd.f32 %v11291_v7, %v3592_v56  ;;  %v3593_v23 = vadd.f32 %v3575_v26, %v11138_v42  ;;  %v8783_v42 = vld [vmem:[%s12036_s3 + $0x664] ss:$16 sps:$4 sm:$0xff]   ;;  %v8794_v57 = vld [vmem:[%s12036_s3 + $0x628] ss:$16 sps:$4 sm:$0xff]  }
 0x33d   :  { %v3643_v46 = vmax.f32 %v3627_v34, 0.0  ;;  %3988 = vmatpush1.bf16.msra.mxu0 %v8781_v40  ;;  %4041 = vmatpush1.bf16.msra.mxu1 %v8782_v52  ;;  %v3628_v44 = vadd.f32 %v11308_v55, %v3591_v6  ;;  %v8795_v60 = vld [vmem:[%s12036_s3 + $0x604] ss:$16 sps:$4 sm:$0xff]   ;;  %v8796_v1 = vld [vmem:[%s12036_s3 + $0x60c] ss:$16 sps:$4 sm:$0xff]  }
 0x33e   :  { %v11402_v8 = vmax.f32 %v3640_v33, %v3642_v19  ;;  %v3645_v37 = vmax.f32 %v3629_v17, 0.0  ;;  %v3630_v27 = vadd.f32 %v11311_v59, %v3593_v23  ;;  %3989 = vmatprep.subr.bf16.mxu0 %v8783_v42  ;;  %4042 = vmatprep.subr.bf16.mxu1 %v8784_v20  ;;  %v8797_v12 = vld [vmem:[%s12036_s3 + $0x600] ss:$16 sps:$4 sm:$0xff]   ;;  %v8798_v49 = vld [vmem:[%s12036_s3 + $0x608] ss:$16 sps:$4 sm:$0xff]  }
 0x33f   :  { %v3644_v43 = vmax.f32 %v3628_v44, 0.0  ;;  %v8799_v47 = vld [vmem:[%s12036_s3 + $0x7e4] ss:$16 sps:$4 sm:$0xff]   ;;  %v8800_v25 = vld [vmem:[%s12036_s3 + $0x7ec] ss:$16 sps:$4 sm:$0xff]  }
 0x340   :  { %v11411_v58 = vmax.f32 %v3643_v46, %v3645_v37  ;;  %v3646_v28 = vmax.f32 %v3630_v27, 0.0  ;;  %v8801_v56 = vld [vmem:[%s12036_s3 + $0x7e0] ss:$16 sps:$4 sm:$0xff]   ;;  %v8802_v16 = vld [vmem:[%s12036_s3 + $0x7e8] ss:$16 sps:$4 sm:$0xff]  }
 0x341   :  { %3990 = vmatpush1.bf16.msra.mxu0 %v8785_v3  ;;  %4043 = vmatpush1.bf16.msra.mxu1 %v8786_v4  ;;  %v8803_v38 = vld [vmem:[%s12036_s3 + $0x7c4] ss:$16 sps:$4 sm:$0xff]   ;;  %v8804_v61 = vld [vmem:[%s12036_s3 + $0x7cc] ss:$16 sps:$4 sm:$0xff]   ;;  %v8805_v26 = vld [vmem:[%s12036_s3 + $0x7c0] ss:$16 sps:$4 sm:$0xff]  }
 0x342   :  { %v11419_v14 = vmax.f32 %v3644_v43, %v3646_v28  ;;  %3991 = vmatprep.subr.bf16.mxu0 %v8787_v30  ;;  %4044 = vmatprep.subr.bf16.mxu1 %v8788_v63  ;;  %v8806_v33 = vld [vmem:[%s12036_s3 + $0x7c8] ss:$16 sps:$4 sm:$0xff]   ;;  %v8807_v34 = vld [vmem:[%s12036_s3 + $0x7a4] ss:$16 sps:$4 sm:$0xff]   ;;  %v8808_v6 = vld [vmem:[%s12036_s3 + $0x7ac] ss:$16 sps:$4 sm:$0xff]  }
 0x343   :  { %v8809_v19 = vld [vmem:[%s12036_s3 + $0x7a0] ss:$16 sps:$4 sm:$0xff]   ;;  %v8810_v17 = vld [vmem:[%s12036_s3 + $0x7a8] ss:$16 sps:$4 sm:$0xff]   ;;  %v8811_v23 = vld [vmem:[%s12036_s3 + $0x784] ss:$16 sps:$4 sm:$0xff]  }
 0x344   :  { %v8812_v46 = vld [vmem:[%s12036_s3 + $0x78c] ss:$16 sps:$4 sm:$0xff]   ;;  %v8813_v40 = vld [vmem:[%s12036_s3 + $0x780] ss:$16 sps:$4 sm:$0xff]   ;;  %v8814_v52 = vld [vmem:[%s12036_s3 + $0x788] ss:$16 sps:$4 sm:$0xff]  }
 0x345   :  { %3992 = vmatpush1.bf16.msra.mxu0 %v8789_v51  ;;  %4045 = vmatpush1.bf16.msra.mxu1 %v8790_v5  ;;  %v8815_v44 = vld [vmem:[%s12036_s3 + $0x764] ss:$16 sps:$4 sm:$0xff]   ;;  %v8816_v37 = vld [vmem:[%s12036_s3 + $0x76c] ss:$16 sps:$4 sm:$0xff]   ;;  %v8817_v27 = vld [vmem:[%s12036_s3 + $0x760] ss:$16 sps:$4 sm:$0xff]  }
 0x346   :  { %3993 = vmatprep.subr.bf16.mxu0 %v8791_v39  ;;  %4046 = vmatprep.subr.bf16.mxu1 %v8792_v11  ;;  %v8818_v42 = vld [vmem:[%s12036_s3 + $0x768] ss:$16 sps:$4 sm:$0xff]   ;;  %v8819_v20 = vld [vmem:[%s12036_s3 + $0x744] ss:$16 sps:$4 sm:$0xff]   ;;  %v8820_v43 = vld [vmem:[%s12036_s3 + $0x74c] ss:$16 sps:$4 sm:$0xff]  }
 0x347   :  { %v8821_v28 = vld [vmem:[%s12036_s3 + $0x740] ss:$16 sps:$4 sm:$0xff]   ;;  %v8822_v3 = vld [vmem:[%s12036_s3 + $0x748] ss:$16 sps:$4 sm:$0xff]   ;;  %v8823_v4 = vld [vmem:[%s12036_s3 + $0x724] ss:$16 sps:$4 sm:$0xff]  }
 0x348   :  { %v8824_v30 = vld [vmem:[%s12036_s3 + $0x72c] ss:$16 sps:$4 sm:$0xff]   ;;  %v8825_v63 = vld [vmem:[%s12036_s3 + $0x720] ss:$16 sps:$4 sm:$0xff]   ;;  %v8826_v51 = vld [vmem:[%s12036_s3 + $0x728] ss:$16 sps:$4 sm:$0xff]  }
 0x349   :  { %3994 = vmatpush1.bf16.msra.mxu0 %v8793_v13  ;;  %4047 = vmatpush1.bf16.msra.mxu1 %v8794_v57  ;;  %v8827_v5 = vld [vmem:[%s12036_s3 + $0x704] ss:$16 sps:$4 sm:$0xff]   ;;  %v8828_v39 = vld [vmem:[%s12036_s3 + $0x70c] ss:$16 sps:$4 sm:$0xff]   ;;  %v8829_v11 = vld [vmem:[%s12036_s3 + $0x700] ss:$16 sps:$4 sm:$0xff]  }
 0x34a   :  { %3995 = vmatprep.subr.bf16.mxu0 %v8795_v60  ;;  %4048 = vmatprep.subr.bf16.mxu1 %v8796_v1  ;;  %v8830_v13 = vld [vmem:[%s12036_s3 + $0x708] ss:$16 sps:$4 sm:$0xff]   ;;  %v8831_v57 = vld [vmem:[%s12036_s3 + $0x8e4] ss:$16 sps:$4 sm:$0xff]   ;;  %v8832_v60 = vld [vmem:[%s12036_s3 + $0x8ec] ss:$16 sps:$4 sm:$0xff]  }
 0x34b   :  { %v8833_v1 = vld [vmem:[%s12036_s3 + $0x8e0] ss:$16 sps:$4 sm:$0xff]  }
 0x34d   :  { %3996 = vmatpush1.bf16.msra.mxu0 %v8797_v12  ;;  %4049 = vmatpush1.bf16.msra.mxu1 %v8798_v49  ;;  %v8834_v12 = vld [vmem:[%s12036_s3 + $0x8e8] ss:$16 sps:$4 sm:$0xff]   ;;  %v8835_v49 = vld [vmem:[%s12036_s3 + $0x8c4] ss:$16 sps:$4 sm:$0xff]  }
 0x34e   :  { %3997 = vmatprep.subr.bf16.mxu0 %v8799_v47  ;;  %4050 = vmatprep.subr.bf16.mxu1 %v8800_v25  ;;  %v8838_v47 = vld [vmem:[%s12036_s3 + $0x8c8] ss:$16 sps:$4 sm:$0xff]   ;;  %v8839_v25 = vld [vmem:[%s12036_s3 + $0x8a4] ss:$16 sps:$4 sm:$0xff]  }
 0x351   :  { %3998 = vmatpush2.bf16.msra.mxu0 %v8801_v56  ;;  %4051 = vmatpush2.bf16.msra.mxu1 %v8802_v16  ;;  %v8840_v56 = vld [vmem:[%s12036_s3 + $0x8ac] ss:$16 sps:$4 sm:$0xff]   ;;  %v8841_v16 = vld [vmem:[%s12036_s3 + $0x8a0] ss:$16 sps:$4 sm:$0xff]  }
 0x352   :  { %3999 = vmatprep.subr.bf16.mxu0 %v8803_v38  ;;  %4052 = vmatprep.subr.bf16.mxu1 %v8804_v61  ;;  %v8842_v38 = vld [vmem:[%s12036_s3 + $0x8a8] ss:$16 sps:$4 sm:$0xff]   ;;  %v8843_v61 = vld [vmem:[%s12036_s3 + $0x884] ss:$16 sps:$4 sm:$0xff]  }
 0x355   :  { %4000 = vmatpush2.bf16.msra.mxu0 %v8805_v26  ;;  %4053 = vmatpush2.bf16.msra.mxu1 %v8806_v33  ;;  %v8846_v26 = vld [vmem:[%s12036_s3 + $0x888] ss:$16 sps:$4 sm:$0xff]   ;;  %v8847_v33 = vld [vmem:[%s12036_s3 + $0x864] ss:$16 sps:$4 sm:$0xff]  }
 0x356   :  { %4001 = vmatprep.subr.bf16.mxu0 %v8807_v34  ;;  %4054 = vmatprep.subr.bf16.mxu1 %v8808_v6  ;;  %v8848_v34 = vld [vmem:[%s12036_s3 + $0x86c] ss:$16 sps:$4 sm:$0xff]   ;;  %v8849_v6 = vld [vmem:[%s12036_s3 + $0x860] ss:$16 sps:$4 sm:$0xff]  }
 0x359   :  { %4002 = vmatpush2.bf16.msra.mxu0 %v8809_v19  ;;  %4055 = vmatpush2.bf16.msra.mxu1 %v8810_v17  ;;  %v8850_v19 = vld [vmem:[%s12036_s3 + $0x868] ss:$16 sps:$4 sm:$0xff]   ;;  %v8851_v17 = vld [vmem:[%s12036_s3 + $0x844] ss:$16 sps:$4 sm:$0xff]  }
 0x35a   :  { %4003 = vmatprep.subr.bf16.mxu0 %v8811_v23  ;;  %4056 = vmatprep.subr.bf16.mxu1 %v8812_v46  ;;  %v8852_v23 = vld [vmem:[%s12036_s3 + $0x84c] ss:$16 sps:$4 sm:$0xff]   ;;  %v8853_v46 = vld [vmem:[%s12036_s3 + $0x840] ss:$16 sps:$4 sm:$0xff]  }
 0x35d   :  { %4004 = vmatpush2.bf16.msra.mxu0 %v8813_v40  ;;  %4057 = vmatpush2.bf16.msra.mxu1 %v8814_v52  ;;  %v8854_v40 = vld [vmem:[%s12036_s3 + $0x848] ss:$16 sps:$4 sm:$0xff]   ;;  %v8855_v52 = vld [vmem:[%s12036_s3 + $0x824] ss:$16 sps:$4 sm:$0xff]  }
 0x35e   :  { %4005 = vmatprep.subr.bf16.mxu0 %v8815_v44  ;;  %4058 = vmatprep.subr.bf16.mxu1 %v8816_v37  ;;  %v8856_v44 = vld [vmem:[%s12036_s3 + $0x82c] ss:$16 sps:$4 sm:$0xff]   ;;  %v8857_v37 = vld [vmem:[%s12036_s3 + $0x820] ss:$16 sps:$4 sm:$0xff]  }
 0x361   :  { %4006 = vmatpush2.bf16.msra.mxu0 %v8817_v27  ;;  %4059 = vmatpush2.bf16.msra.mxu1 %v8818_v42  ;;  %v8858_v27 = vld [vmem:[%s12036_s3 + $0x828] ss:$16 sps:$4 sm:$0xff]   ;;  %v8859_v42 = vld [vmem:[%s12036_s3 + $0x804] ss:$16 sps:$4 sm:$0xff]  }
 0x362   :  { %4007 = vmatprep.subr.bf16.mxu0 %v8819_v20  ;;  %4060 = vmatprep.subr.bf16.mxu1 %v8820_v43  ;;  %v8860_v20 = vld [vmem:[%s12036_s3 + $0x80c] ss:$16 sps:$4 sm:$0xff]   ;;  %v8861_v43 = vld [vmem:[%s12036_s3 + $0x800] ss:$16 sps:$4 sm:$0xff]  }
 0x365   :  { %4008 = vmatpush2.bf16.msra.mxu0 %v8821_v28  ;;  %4061 = vmatpush2.bf16.msra.mxu1 %v8822_v3  ;;  %v8862_v28 = vld [vmem:[%s12036_s3 + $0x808] ss:$16 sps:$4 sm:$0xff]   ;;  %v8863_v3 = vld [vmem:[%s12036_s3 + $0x9e4] ss:$16 sps:$4 sm:$0xff]  }
 0x366   :  { %4009 = vmatprep.subr.bf16.mxu0 %v8823_v4  ;;  %4062 = vmatprep.subr.bf16.mxu1 %v8824_v30  ;;  %v8864_v4 = vld [vmem:[%s12036_s3 + $0x9ec] ss:$16 sps:$4 sm:$0xff]  }
 0x369   :  { %4010 = vmatpush2.bf16.msra.mxu0 %v8825_v63  ;;  %4063 = vmatpush2.bf16.msra.mxu1 %v8826_v51  ;;  %v8865_v51 = vld [vmem:[%s12036_s3 + $0x9e0] ss:$16 sps:$4 sm:$0xff]  }
 0x36a   :  { %4011 = vmatprep.subr.bf16.mxu0 %v8827_v5  ;;  %4064 = vmatprep.subr.bf16.mxu1 %v8828_v39  ;;  %v8866_v5 = vld [vmem:[%s12036_s3 + $0x9e8] ss:$16 sps:$4 sm:$0xff]   ;;  %v8867_v39 = vld [vmem:[%s12036_s3 + $0x9c4] ss:$16 sps:$4 sm:$0xff]  }
 0x36d   :  { %4012 = vmatpush2.bf16.msra.mxu0 %v8829_v11  ;;  %4065 = vmatpush2.bf16.msra.mxu1 %v8830_v13  ;;  %v11663_v30 = vpop.f32.mrf.mxu0  ;;  %v11665_v63 = vpop.f32.mrf.mxu1  ;;  %v8868_v11 = vld [vmem:[%s12036_s3 + $0x9cc] ss:$16 sps:$4 sm:$0xff]  }
 0x36e   :  { %4103 = vmatprep.subr.bf16.mxu0 %v8831_v57  ;;  %4156 = vmatprep.subr.bf16.mxu1 %v8832_v60  ;;  %v8869_v60 = vld [vmem:[%s12036_s3 + $0x9c0] ss:$16 sps:$4 sm:$0xff]  }
 0x36f   :  { %v11679_v13 = vpop.f32.mrf.mxu0  ;;  %v11681_v57 = vpop.f32.mrf.mxu1 }
 0x370   :  { %4014 = vmatmul.mubr.bf16.vlgmr.msra.gmra.mxu0 %v9557_v50  ;;  %4067 = vmatmul.mubr.bf16.vlgmr.msra.gmra.mxu1 %v9557_v50  ;;  %v8836_v50 = vld [vmem:[%s12036_s3 + $0x8cc] ss:$16 sps:$4 sm:$0xff]  }
 0x371   :  { %4023 = vmatprep.mubr.bf16.mxu0 %v10556_v0  ;;  %4076 = vmatprep.mubr.bf16.mxu1 %v10556_v0  ;;  %v8837_v0 = vld [vmem:[%s12036_s3 + $0x8c0] ss:$16 sps:$4 sm:$0xff]  }
 0x372   :  { %4104 = vmatpush1.bf16.msra.mxu0 %v8833_v1  ;;  %4157 = vmatpush1.bf16.msra.mxu1 %v8834_v12  ;;  %v8870_v1 = vld [vmem:[%s12036_s3 + $0x9c8] ss:$16 sps:$4 sm:$0xff]   ;;  %v8871_v12 = vld [vmem:[%s12036_s3 + $0x9a4] ss:$16 sps:$4 sm:$0xff]  }
 0x373   :  { %4105 = vmatprep.subr.bf16.mxu0 %v8835_v49  ;;  %4158 = vmatprep.subr.bf16.mxu1 %v8836_v50  ;;  %v8872_v49 = vld [vmem:[%s12036_s3 + $0x9ac] ss:$16 sps:$4 sm:$0xff]   ;;  %v11695_v50 = vpop.f32.mrf.mxu0 }
 0x376   :  { %4106 = vmatpush1.bf16.msra.mxu0 %v8837_v0  ;;  %4159 = vmatpush1.bf16.msra.mxu1 %v8838_v47  ;;  %v11697_v0 = vpop.f32.mrf.mxu1  ;;  %v8873_v47 = vld [vmem:[%s12036_s3 + $0x9a0] ss:$16 sps:$4 sm:$0xff]  }
 0x377   :  { %4107 = vmatprep.subr.bf16.mxu0 %v8839_v25  ;;  %4160 = vmatprep.subr.bf16.mxu1 %v8840_v56  ;;  %v8874_v25 = vld [vmem:[%s12036_s3 + $0x9a8] ss:$16 sps:$4 sm:$0xff]   ;;  %v8875_v56 = vld [vmem:[%s12036_s3 + $0x984] ss:$16 sps:$4 sm:$0xff]  }
 0x378   :  { %4024 = vmatmul.mubr.bf16.gmra.mxu0 %v9576_v10  ;;  %4077 = vmatmul.mubr.bf16.gmra.mxu1 %v9576_v10  ;;  %v8844_v10 = vld [vmem:[%s12036_s3 + $0x88c] ss:$16 sps:$4 sm:$0xff]  }
 0x379   :  { %4135 = vmatprep.mubr.bf16.mxu0 %v9709_v31  ;;  %4188 = vmatprep.mubr.bf16.mxu1 %v9709_v31  ;;  %v8845_v31 = vld [vmem:[%s12036_s3 + $0x880] ss:$16 sps:$4 sm:$0xff]  }
 0x37a   :  { %4108 = vmatpush1.bf16.msra.mxu0 %v8841_v16  ;;  %4161 = vmatpush1.bf16.msra.mxu1 %v8842_v38  ;;  %v8876_v16 = vld [vmem:[%s12036_s3 + $0x98c] ss:$16 sps:$4 sm:$0xff]   ;;  %v11711_v38 = vpop.f32.mrf.mxu0 }
 0x37b   :  { %4109 = vmatprep.subr.bf16.mxu0 %v8843_v61  ;;  %4162 = vmatprep.subr.bf16.mxu1 %v8844_v10  ;;  %v11713_v61 = vpop.f32.mrf.mxu1  ;;  %v8877_v10 = vld [vmem:[%s12036_s3 + $0x980] ss:$16 sps:$4 sm:$0xff]  }
 0x37e   :  { %4110 = vmatpush1.bf16.msra.mxu0 %v8845_v31  ;;  %4163 = vmatpush1.bf16.msra.mxu1 %v8846_v26  ;;  %v8878_v31 = vld [vmem:[%s12036_s3 + $0x988] ss:$16 sps:$4 sm:$0xff]   ;;  %v8879_v26 = vld [vmem:[%s12036_s3 + $0x964] ss:$16 sps:$4 sm:$0xff]  }
 0x37f   :  { %4111 = vmatprep.subr.bf16.mxu0 %v8847_v33  ;;  %4164 = vmatprep.subr.bf16.mxu1 %v8848_v34  ;;  %v8880_v33 = vld [vmem:[%s12036_s3 + $0x96c] ss:$16 sps:$4 sm:$0xff]   ;;  %v748_v34 = vadd.f32 %v10409_v15, %v9453_v35  ;;  %v8882_v15 = vld [vmem:[%s12036_s3 + $0x968] ss:$16 sps:$4 sm:$0xff]  }
 0x382   :  { %4112 = vmatpush1.bf16.msra.mxu0 %v8849_v6  ;;  %4165 = vmatpush1.bf16.msra.mxu1 %v8850_v19  ;;  %v901_v6 = vadd.f32 %v10411_v2, %v9456_v36  ;;  %v3691_v19 = vpop.f32.mrf.mxu0  ;;  %v8883_v2 = vld [vmem:[%s12036_s3 + $0x944] ss:$16 sps:$4 sm:$0xff]  }
 0x383   :  { %4113 = vmatprep.subr.bf16.mxu0 %v8851_v17  ;;  %4166 = vmatprep.subr.bf16.mxu1 %v8852_v23  ;;  %v3744_v17 = vpop.f32.mrf.mxu1  ;;  %v12062_v23 = vld [vmem:[#allocation8_spill] sm:$0xff] }
 0x386   :  { %4114 = vmatpush1.bf16.msra.mxu0 %v8853_v46  ;;  %4167 = vmatpush1.bf16.msra.mxu1 %v8854_v40  ;;  %v718_v46 = vadd.f32 %v12062_v23, %v9453_v35  ;;  %v12063_v40 = vld [vmem:[#allocation9_spill] sm:$0xff]  ;;  %v8884_v35 = vld [vmem:[%s12036_s3 + $0x94c] ss:$16 sps:$4 sm:$0xff]  }
 0x387   :  { %4115 = vmatprep.subr.bf16.mxu0 %v8855_v52  ;;  %4168 = vmatprep.subr.bf16.mxu1 %v8856_v44  ;;  %v871_v52 = vadd.f32 %v12063_v40, %v9456_v36  ;;  %v8881_v44 = vld [vmem:[%s12036_s3 + $0x960] ss:$16 sps:$4 sm:$0xff]   ;;  %v996_v36 = vmax.f32 %v748_v34, 0.0 }
 0x38a   :  { %4116 = vmatpush1.bf16.msra.mxu0 %v8857_v37  ;;  %4169 = vmatpush1.bf16.msra.mxu1 %v8858_v27  ;;  %v998_v37 = vmax.f32 %v901_v6, 0.0  ;;  %v3693_v27 = vpop.f32.mrf.mxu0 }
 0x38b   :  { %4117 = vmatprep.subr.bf16.mxu0 %v8859_v42  ;;  %4170 = vmatprep.subr.bf16.mxu1 %v8860_v20  ;;  %v3746_v42 = vpop.f32.mrf.mxu1  ;;  %v972_v20 = vmax.f32 %v718_v46, 0.0 }
 0x38e   :  { %4118 = vmatpush1.bf16.msra.mxu0 %v8861_v43  ;;  %4171 = vmatpush1.bf16.msra.mxu1 %v8862_v28  ;;  %v974_v43 = vmax.f32 %v871_v52, 0.0  ;;  %v8885_v28 = vld [vmem:[%s12036_s3 + $0x940] ss:$16 sps:$4 sm:$0xff]  }
 0x38f   :  { %4119 = vmatprep.subr.bf16.mxu0 %v8863_v3  ;;  %4172 = vmatprep.subr.bf16.mxu1 %v8864_v4  ;;  %v8886_v3 = vld [vmem:[%s12036_s3 + $0x948] ss:$16 sps:$4 sm:$0xff]   ;;  %v8887_v4 = vld [vmem:[%s12036_s3 + $0x924] ss:$16 sps:$4 sm:$0xff]  }
 0x392   :  { %4120 = vmatpush2.bf16.msra.mxu0 %v8865_v51  ;;  %4173 = vmatpush2.bf16.msra.mxu1 %v8866_v5  ;;  %v8888_v51 = vld [vmem:[%s12036_s3 + $0x92c] ss:$16 sps:$4 sm:$0xff]   ;;  %v1058_v5 = vmax.f32 %v996_v36, %v998_v37 }
 0x393   :  { %4121 = vmatprep.subr.bf16.mxu0 %v8867_v39  ;;  %4174 = vmatprep.subr.bf16.mxu1 %v8868_v11  ;;  %v3695_v39 = vpop.f32.mrf.mxu0  ;;  %v3748_v11 = vpop.f32.mrf.mxu1 }
 0x396   :  { %4122 = vmatpush2.bf16.msra.mxu0 %v8869_v60  ;;  %4175 = vmatpush2.bf16.msra.mxu1 %v8870_v1  ;;  %v1046_v60 = vmax.f32 %v972_v20, %v974_v43  ;;  %v8889_v1 = vld [vmem:[%s12036_s3 + $0x920] ss:$16 sps:$4 sm:$0xff]  }
 0x397   :  { %4123 = vmatprep.subr.bf16.mxu0 %v8871_v12  ;;  %4176 = vmatprep.subr.bf16.mxu1 %v8872_v49  ;;  %v8890_v12 = vld [vmem:[%s12036_s3 + $0x928] ss:$16 sps:$4 sm:$0xff]   ;;  %v8891_v49 = vld [vmem:[%s12036_s3 + $0x904] ss:$16 sps:$4 sm:$0xff]  }
 0x39a   :  { %4124 = vmatpush2.bf16.msra.mxu0 %v8873_v47  ;;  %4177 = vmatpush2.bf16.msra.mxu1 %v8874_v25  ;;  %v8892_v47 = vld [vmem:[%s12036_s3 + $0x90c] ss:$16 sps:$4 sm:$0xff]   ;;  %v1070_v25 = vmax.f32 %v1046_v60, %v1058_v5  ;;  %v8159_v60 = vld [vmem:[#allocation2 + $0x2e0] ss:$16 sps:$4 sm:$0xff]  }
 0x39b   :  { %4125 = vmatprep.subr.bf16.mxu0 %v8875_v56  ;;  %4178 = vmatprep.subr.bf16.mxu1 %v8876_v16  ;;  %v3697_v56 = vpop.f32.mrf.mxu0  ;;  %v3750_v16 = vpop.f32.mrf.mxu1 }
 0x39c   :  { %v1090_v23 = vpack.c.bf16 %v1070_v25, %v9721_v24  ;;  %v8171_v25 = vld [vmem:[#allocation2 + $0x2a0] ss:$16 sps:$4 sm:$0xff]  }
 0x39e   :  { %4126 = vmatpush2.bf16.msra.mxu0 %v8877_v10  ;;  %4179 = vmatpush2.bf16.msra.mxu1 %v8878_v31  ;;  %v8893_v10 = vld [vmem:[%s12036_s3 + $0x900] ss:$16 sps:$4 sm:$0xff]   ;;  %v8894_v31 = vld [vmem:[%s12036_s3 + $0x908] ss:$16 sps:$4 sm:$0xff]  }
 0x39f   :  { %4127 = vmatprep.subr.bf16.mxu0 %v8879_v26  ;;  %4180 = vmatprep.subr.bf16.mxu1 %v8880_v33 }
 0x3a2   :  { %4128 = vmatpush2.bf16.msra.mxu0 %v8881_v44  ;;  %4181 = vmatpush2.bf16.msra.mxu1 %v8882_v15 }
 0x3a3   :  { %4129 = vmatprep.subr.bf16.mxu0 %v8883_v2  ;;  %4182 = vmatprep.subr.bf16.mxu1 %v8884_v35 }
 0x3a6   :  { %4130 = vmatpush2.bf16.msra.mxu0 %v8885_v28  ;;  %4183 = vmatpush2.bf16.msra.mxu1 %v8886_v3 }
 0x3a7   :  { %4131 = vmatprep.subr.bf16.mxu0 %v8887_v4  ;;  %4184 = vmatprep.subr.bf16.mxu1 %v8888_v51 }
 0x3aa   :  { %4132 = vmatpush2.bf16.msra.mxu0 %v8889_v1  ;;  %4185 = vmatpush2.bf16.msra.mxu1 %v8890_v12  ;;  %v8161_v1 = vld [vmem:[#allocation2 + $0x2e4] ss:$16 sps:$4 sm:$0xff]   ;;  %v8162_v12 = vld [vmem:[#allocation2 + $0x2e8] ss:$16 sps:$4 sm:$0xff]  }
 0x3ab   :  { %4133 = vmatprep.subr.bf16.mxu0 %v8891_v49  ;;  %4186 = vmatprep.subr.bf16.mxu1 %v8892_v47  ;;  %v8165_v49 = vld [vmem:[#allocation2 + $0x2c0] ss:$16 sps:$4 sm:$0xff]   ;;  %v8176_v47 = vld [vmem:[#allocation2 + $0x2ac] ss:$16 sps:$4 sm:$0xff]  }
 0x3ae   :  { %4134 = vmatpush2.bf16.msra.mxu0 %v8893_v10  ;;  %4187 = vmatpush2.bf16.msra.mxu1 %v8894_v31  ;;  %v3787_v26 = vpop.f32.mrf.mxu0  ;;  %v3840_v33 = vpop.f32.mrf.mxu1  ;;  %v8182_v10 = vld [vmem:[#allocation2 + $0x28c] ss:$16 sps:$4 sm:$0xff]   ;;  %v8177_v31 = vld [vmem:[#allocation2 + $0x280] ss:$16 sps:$4 sm:$0xff]  }
 0x3af   :  { %v11778_v34 = vadd.f32 %v3787_v26, %v11663_v30  ;;  %v11781_v6 = vadd.f32 %v3840_v33, %v11665_v63  ;;  %4734 = vmatprep.subr.bf16.mxu0 %v8161_v1  ;;  %v8180_v26 = vld [vmem:[#allocation2 + $0x288] ss:$16 sps:$4 sm:$0xff]   ;;  %v8185_v33 = vld [vmem:[#allocation2 + $0x264] ss:$16 sps:$4 sm:$0xff]  }
 0x3b0   :  { %v11784_v46 = vpop.f32.mrf.mxu0  ;;  %v11786_v40 = vpop.f32.mrf.mxu1  ;;  %v8198_v1 = vld [vmem:[#allocation2 + $0x228] ss:$16 sps:$4 sm:$0xff]  }
 0x3b1   :  { %4136 = vmatmul.mubr.bf16.vlgmr.msra.gmra.mxu0 %v9718_v48  ;;  %4189 = vmatmul.mubr.bf16.vlgmr.msra.gmra.mxu1 %v9718_v48 }
 0x3b2   :  { %4145 = vmatprep.mubr.bf16.mxu0 %v1090_v23  ;;  %4198 = vmatprep.mubr.bf16.mxu1 %v1090_v23  ;;  %v11790_v52 = vpop.f32.mrf.mxu0  ;;  %v11792_v44 = vpop.f32.mrf.mxu1  ;;  %v8188_v23 = vld [vmem:[#allocation2 + $0x26c] ss:$16 sps:$4 sm:$0xff]  }
 0x3b3   :  { %4735 = vmatpush1.bf16.msra.mxu0 %v8159_v60  ;;  %v8195_v60 = vld [vmem:[#allocation2 + $0x220] ss:$16 sps:$4 sm:$0xff]  }
 0x3b4   :  { %v11794_v30 = vpop.f32.mrf.mxu0  ;;  %v11796_v63 = vpop.f32.mrf.mxu1 }
 0x3b6   :  { %v3797_v15 = vpop.f32.mrf.mxu0  ;;  %v3850_v24 = vpop.f32.mrf.mxu1 }
 0x3b7   :  { %v11798_v2 = vadd.f32 %v3797_v15, %v3691_v19  ;;  %v11800_v35 = vadd.f32 %v3850_v24, %v3744_v17  ;;  %v8183_v15 = vld [vmem:[#allocation2 + $0x260] ss:$16 sps:$4 sm:$0xff]   ;;  %v8186_v24 = vld [vmem:[#allocation2 + $0x268] ss:$16 sps:$4 sm:$0xff]  }
 0x3b8   :  { %v3799_v36 = vpop.f32.mrf.mxu0  ;;  %v3852_v37 = vpop.f32.mrf.mxu1 }
 0x3b9   :  { %4146 = vmatmul.mubr.bf16.gmra.mxu0 %v9755_v18  ;;  %4199 = vmatmul.mubr.bf16.gmra.mxu1 %v9755_v18  ;;  %v11804_v48 = vadd.f32 %v3799_v36, %v3693_v27  ;;  %v11806_v20 = vadd.f32 %v3852_v37, %v3746_v42  ;;  %v8164_v18 = vld [vmem:[#allocation2 + $0x2ec] ss:$16 sps:$4 sm:$0xff]   ;;  %v8167_v27 = vld [vmem:[#allocation2 + $0x2c4] ss:$16 sps:$4 sm:$0xff]  }
 0x3ba   :  { %v3801_v43 = vpop.f32.mrf.mxu0  ;;  %v3854_v28 = vpop.f32.mrf.mxu1  ;;  %v8170_v42 = vld [vmem:[#allocation2 + $0x2cc] ss:$16 sps:$4 sm:$0xff]   ;;  %4775 = vmatprep.subr.bf16.mxu1 %v8164_v18  ;;  %4736 = vmatprep.subr.bf16.mxu0 %v8167_v27  ;;  %v8191_v36 = vld [vmem:[#allocation2 + $0x244] ss:$16 sps:$4 sm:$0xff]   ;;  %v8201_v27 = vld [vmem:[#allocation2 + $0x200] ss:$16 sps:$4 sm:$0xff]  }
 0x3bb   :  { %v11808_v3 = vadd.f32 %v3801_v43, %v3695_v39  ;;  %v11810_v4 = vadd.f32 %v3854_v28, %v3748_v11  ;;  %4776 = vmatpush1.bf16.msra.mxu1 %v8162_v12  ;;  %v8168_v39 = vld [vmem:[#allocation2 + $0x2c8] ss:$16 sps:$4 sm:$0xff]   ;;  %v8173_v11 = vld [vmem:[#allocation2 + $0x2a4] ss:$16 sps:$4 sm:$0xff]   ;;  %4737 = vmatpush1.bf16.msra.mxu0 %v8165_v49  ;;  %v8194_v37 = vld [vmem:[#allocation2 + $0x24c] ss:$16 sps:$4 sm:$0xff]  }
 0x3bc   :  { %v3803_v19 = vpop.f32.mrf.mxu0  ;;  %v3856_v51 = vpop.f32.mrf.mxu1  ;;  %4777 = vmatprep.subr.bf16.mxu1 %v8170_v42  ;;  %4738 = vmatprep.subr.bf16.mxu0 %v8173_v11  ;;  %v8189_v43 = vld [vmem:[#allocation2 + $0x240] ss:$16 sps:$4 sm:$0xff]   ;;  %v8192_v28 = vld [vmem:[#allocation2 + $0x248] ss:$16 sps:$4 sm:$0xff]   ;;  %v8203_v12 = vld [vmem:[#allocation2 + $0x204] ss:$16 sps:$4 sm:$0xff]  }
 0x3bd   :  { %v11812_v17 = vadd.f32 %v3803_v19, %v3697_v56  ;;  %v11814_v5 = vadd.f32 %v3856_v51, %v3750_v16  ;;  %v8174_v56 = vld [vmem:[#allocation2 + $0x2a8] ss:$16 sps:$4 sm:$0xff]   ;;  %v8179_v16 = vld [vmem:[#allocation2 + $0x284] ss:$16 sps:$4 sm:$0xff]   ;;  %v8200_v51 = vld [vmem:[#allocation2 + $0x22c] ss:$16 sps:$4 sm:$0xff]  }
 0x3be   :  { %v8197_v19 = vld [vmem:[#allocation2 + $0x224] ss:$16 sps:$4 sm:$0xff]   ;;  %v8206_v18 = vld [vmem:[#allocation2 + $0x20c] ss:$16 sps:$4 sm:$0xff]   ;;  %v8204_v42 = vld [vmem:[#allocation2 + $0x208] ss:$16 sps:$4 sm:$0xff]  }
 0x3bf   :  { %4778 = vmatpush1.bf16.msra.mxu1 %v8168_v39  ;;  %4739 = vmatpush1.bf16.msra.mxu0 %v8171_v25  ;;  %v8209_v49 = vld [vmem:[#allocation2 + $0x3e4] ss:$16 sps:$4 sm:$0xff]   ;;  %v8212_v39 = vld [vmem:[#allocation2 + $0x3ec] ss:$16 sps:$4 sm:$0xff]   ;;  %v8207_v11 = vld [vmem:[#allocation2 + $0x3e0] ss:$16 sps:$4 sm:$0xff]  }
 0x3c0   :  { %4779 = vmatprep.subr.bf16.mxu1 %v8176_v47  ;;  %4740 = vmatprep.subr.bf16.mxu0 %v8179_v16  ;;  %v8210_v47 = vld [vmem:[#allocation2 + $0x3e8] ss:$16 sps:$4 sm:$0xff]   ;;  %v8215_v25 = vld [vmem:[#allocation2 + $0x3c4] ss:$16 sps:$4 sm:$0xff]   ;;  %v8213_v16 = vld [vmem:[#allocation2 + $0x3c0] ss:$16 sps:$4 sm:$0xff]  }
 0x3c3   :  { %4780 = vmatpush1.bf16.msra.mxu1 %v8174_v56  ;;  %4741 = vmatpush1.bf16.msra.mxu0 %v8177_v31  ;;  %v8218_v56 = vld [vmem:[#allocation2 + $0x3cc] ss:$16 sps:$4 sm:$0xff]   ;;  %v8221_v31 = vld [vmem:[#allocation2 + $0x3a4] ss:$16 sps:$4 sm:$0xff]  }
 0x3c4   :  { %4781 = vmatprep.subr.bf16.mxu1 %v8182_v10  ;;  %4742 = vmatprep.subr.bf16.mxu0 %v8185_v33  ;;  %v8216_v10 = vld [vmem:[#allocation2 + $0x3c8] ss:$16 sps:$4 sm:$0xff]   ;;  %v8219_v33 = vld [vmem:[#allocation2 + $0x3a0] ss:$16 sps:$4 sm:$0xff]  }
 0x3c7   :  { %4782 = vmatpush1.bf16.msra.mxu1 %v8180_v26  ;;  %4743 = vmatpush1.bf16.msra.mxu0 %v8183_v15  ;;  %v8224_v26 = vld [vmem:[#allocation2 + $0x3ac] ss:$16 sps:$4 sm:$0xff]   ;;  %v8227_v15 = vld [vmem:[#allocation2 + $0x384] ss:$16 sps:$4 sm:$0xff]  }
 0x3c8   :  { %4783 = vmatprep.subr.bf16.mxu1 %v8188_v23  ;;  %4744 = vmatprep.subr.bf16.mxu0 %v8191_v36  ;;  %v8222_v23 = vld [vmem:[#allocation2 + $0x3a8] ss:$16 sps:$4 sm:$0xff]   ;;  %v8225_v36 = vld [vmem:[#allocation2 + $0x380] ss:$16 sps:$4 sm:$0xff]  }
 0x3cb   :  { %4784 = vmatpush1.bf16.msra.mxu1 %v8186_v24  ;;  %4745 = vmatpush1.bf16.msra.mxu0 %v8189_v43  ;;  %v8230_v24 = vld [vmem:[#allocation2 + $0x38c] ss:$16 sps:$4 sm:$0xff]  }
 0x3cc   :  { %4785 = vmatprep.subr.bf16.mxu1 %v8194_v37  ;;  %4746 = vmatprep.subr.bf16.mxu0 %v8197_v19  ;;  %v8228_v37 = vld [vmem:[#allocation2 + $0x388] ss:$16 sps:$4 sm:$0xff]  }
 0x3cf   :  { %4786 = vmatpush1.bf16.msra.mxu1 %v8192_v28  ;;  %4747 = vmatpush1.bf16.msra.mxu0 %v8195_v60 }
 0x3d0   :  { %4787 = vmatprep.subr.bf16.mxu1 %v8200_v51  ;;  %4748 = vmatprep.subr.bf16.mxu0 %v8203_v12  ;;  %v8233_v12 = vld [vmem:[#allocation2 + $0x364] ss:$16 sps:$4 sm:$0xff]  }
 0x3d3   :  { %4788 = vmatpush1.bf16.msra.mxu1 %v8198_v1  ;;  %4749 = vmatpush1.bf16.msra.mxu0 %v8201_v27 }
 0x3d4   :  { %4789 = vmatprep.subr.bf16.mxu1 %v8206_v18  ;;  %4750 = vmatprep.subr.bf16.mxu0 %v8209_v49  ;;  %v8236_v18 = vld [vmem:[#allocation2 + $0x36c] ss:$16 sps:$4 sm:$0xff]   ;;  %v8231_v49 = vld [vmem:[#allocation2 + $0x360] ss:$16 sps:$4 sm:$0xff]  }
 0x3d7   :  { %4790 = vmatpush1.bf16.msra.mxu1 %v8204_v42  ;;  %4751 = vmatpush2.bf16.msra.mxu0 %v8207_v11 }
 0x3d8   :  { %4791 = vmatprep.subr.bf16.mxu1 %v8212_v39  ;;  %4752 = vmatprep.subr.bf16.mxu0 %v8215_v25  ;;  %v8234_v39 = vld [vmem:[#allocation2 + $0x368] ss:$16 sps:$4 sm:$0xff]   ;;  %v8239_v25 = vld [vmem:[#allocation2 + $0x344] ss:$16 sps:$4 sm:$0xff]  }
 0x3db   :  { %4792 = vmatpush2.bf16.msra.mxu1 %v8210_v47  ;;  %4753 = vmatpush2.bf16.msra.mxu0 %v8213_v16 }
 0x3dc   :  { %4793 = vmatprep.subr.bf16.mxu1 %v8218_v56  ;;  %4754 = vmatprep.subr.bf16.mxu0 %v8221_v31  ;;  %v8242_v56 = vld [vmem:[#allocation2 + $0x34c] ss:$16 sps:$4 sm:$0xff]   ;;  %v8237_v31 = vld [vmem:[#allocation2 + $0x340] ss:$16 sps:$4 sm:$0xff]  }
 0x3df   :  { %4794 = vmatpush2.bf16.msra.mxu1 %v8216_v10  ;;  %4755 = vmatpush2.bf16.msra.mxu0 %v8219_v33 }
 0x3e0   :  { %4795 = vmatprep.subr.bf16.mxu1 %v8224_v26  ;;  %4756 = vmatprep.subr.bf16.mxu0 %v8227_v15  ;;  %v8240_v26 = vld [vmem:[#allocation2 + $0x348] ss:$16 sps:$4 sm:$0xff]  }
 0x3e3   :  { %4796 = vmatpush2.bf16.msra.mxu1 %v8222_v23  ;;  %4757 = vmatpush2.bf16.msra.mxu0 %v8225_v36 }
 0x3e4   :  { %4797 = vmatprep.subr.bf16.mxu1 %v8230_v24  ;;  %4758 = vmatprep.subr.bf16.mxu0 %v8233_v12  ;;  %v8243_v12 = vld [vmem:[#allocation2 + $0x320] ss:$16 sps:$4 sm:$0xff]  }
 0x3e7   :  { %4798 = vmatpush2.bf16.msra.mxu1 %v8228_v37  ;;  %4759 = vmatpush2.bf16.msra.mxu0 %v8231_v49 }
 0x3e8   :  { %4799 = vmatprep.subr.bf16.mxu1 %v8236_v18  ;;  %4760 = vmatprep.subr.bf16.mxu0 %v8239_v25  ;;  %v8246_v18 = vld [vmem:[#allocation2 + $0x328] ss:$16 sps:$4 sm:$0xff]   ;;  %v8249_v25 = vld [vmem:[#allocation2 + $0x300] ss:$16 sps:$4 sm:$0xff]  }
 0x3eb   :  { %4800 = vmatpush2.bf16.msra.mxu1 %v8234_v39  ;;  %4761 = vmatpush2.bf16.msra.mxu0 %v8237_v31 }
 0x3ec   :  { %4801 = vmatprep.subr.bf16.mxu1 %v8242_v56  ;;  %v8252_v56 = vld [vmem:[#allocation2 + $0x308] ss:$16 sps:$4 sm:$0xff]  }
 0x3ef   :  { %v3893_v43 = vpop.f32.mrf.mxu0  ;;  %v3946_v28 = vpop.f32.mrf.mxu1  ;;  %4802 = vmatpush2.bf16.msra.mxu1 %v8240_v26 }
 0x3f0   :  { %v3965_v19 = vadd.f32 %v3893_v43, %v11778_v34  ;;  %v3967_v51 = vadd.f32 %v3946_v28, %v11781_v6  ;;  %v8245_v43 = vld [vmem:[#allocation2 + $0x324] ss:$16 sps:$4 sm:$0xff]   ;;  %v8248_v28 = vld [vmem:[#allocation2 + $0x32c] ss:$16 sps:$4 sm:$0xff]  }
 0x3f1   :  { %v11818_v60 = vpop.f32.mrf.mxu0  ;;  %v11820_v1 = vpop.f32.mrf.mxu1  ;;  %4762 = vmatprep.subr.bf16.mxu0 %v8245_v43  ;;  %4803 = vmatprep.subr.bf16.mxu1 %v8248_v28 }
 0x3f2   :  { %4763 = vmatpush2.bf16.msra.mxu0 %v8243_v12 }
 0x3f3   :  { %v11822_v27 = vpop.f32.mrf.mxu0  ;;  %v11824_v42 = vpop.f32.mrf.mxu1  ;;  %4804 = vmatpush2.bf16.msra.mxu1 %v8246_v18 }
 0x3f5   :  { %v11826_v11 = vpop.f32.mrf.mxu0  ;;  %v11828_v47 = vpop.f32.mrf.mxu1 }
 0x3f7   :  { %v3903_v34 = vpop.f32.mrf.mxu0  ;;  %v3956_v6 = vpop.f32.mrf.mxu1 }
 0x3f8   :  { %v3973_v16 = vadd.f32 %v3903_v34, %v11798_v2  ;;  %v3975_v10 = vadd.f32 %v3956_v6, %v11800_v35  ;;  %v8251_v34 = vld [vmem:[#allocation2 + $0x304] ss:$16 sps:$4 sm:$0xff]   ;;  %v8254_v6 = vld [vmem:[#allocation2 + $0x30c] ss:$16 sps:$4 sm:$0xff]  }
 0x3f9   :  { %v3905_v33 = vpop.f32.mrf.mxu0  ;;  %v3958_v23 = vpop.f32.mrf.mxu1  ;;  %4764 = vmatprep.subr.bf16.mxu0 %v8251_v34  ;;  %4805 = vmatprep.subr.bf16.mxu1 %v8254_v6 }
 0x3fa   :  { %v3974_v15 = vadd.f32 %v3905_v33, %v11804_v48  ;;  %v3976_v24 = vadd.f32 %v3958_v23, %v11806_v20  ;;  %4765 = vmatpush2.bf16.msra.mxu0 %v8249_v25  ;;  %4806 = vmatpush2.bf16.msra.mxu1 %v8252_v56 }
 0x3fb   :  { %v3907_v36 = vpop.f32.mrf.mxu0  ;;  %v3960_v37 = vpop.f32.mrf.mxu1 }
 0x3fc   :  { %v3977_v2 = vadd.f32 %v3907_v36, %v11808_v3  ;;  %v3979_v35 = vadd.f32 %v3960_v37, %v11810_v4  ;;  %v8257_v3 = vld [vmem:[#allocation2 + $0xe4] ss:$16 sps:$4 sm:$0xff]   ;;  %v8260_v4 = vld [vmem:[#allocation2 + $0xec] ss:$16 sps:$4 sm:$0xff]  }
 0x3fd   :  { %v3909_v49 = vpop.f32.mrf.mxu0  ;;  %v3962_v39 = vpop.f32.mrf.mxu1  ;;  %5136 = vmatprep.subr.bf16.mxu0 %v8257_v3  ;;  %5177 = vmatprep.subr.bf16.mxu1 %v8260_v4 }
 0x3fe   :  { %v3978_v48 = vadd.f32 %v3909_v49, %v11812_v17  ;;  %v3980_v20 = vadd.f32 %v3962_v39, %v11814_v5 }
 0x430   :  { %v4015_v31 = vpop.f32.mrf.mxu0  ;;  %v4068_v26 = vpop.f32.mrf.mxu1 }
 0x431   :  { %v4087_v33 = vadd.f32 %v4015_v31, %v3965_v19  ;;  %v4089_v17 = vadd.f32 %v4068_v26, %v3967_v51 }
 0x432   :  { %v4017_v23 = vpop.f32.mrf.mxu0  ;;  %v4070_v5 = vpop.f32.mrf.mxu1 }
 0x434   :  { %v4019_v36 = vpop.f32.mrf.mxu0  ;;  %v4072_v37 = vpop.f32.mrf.mxu1 }
 0x436   :  { %v4021_v43 = vpop.f32.mrf.mxu0  ;;  %v4074_v28 = vpop.f32.mrf.mxu1 }
 0x438   :  { %v4025_v12 = vpop.f32.mrf.mxu0  ;;  %v4078_v18 = vpop.f32.mrf.mxu1 }
 0x439   :  { %v11838_v49 = vadd.f32 %v4025_v12, %v3973_v16  ;;  %v11840_v39 = vadd.f32 %v4078_v18, %v3975_v10  ;;  %v3790_v10 = vadd.f32 %v11784_v46, %v11679_v13 }
 0x43a   :  { %v4027_v34 = vpop.f32.mrf.mxu0  ;;  %v4080_v6 = vpop.f32.mrf.mxu1 }
 0x43b   :  { %v11842_v25 = vadd.f32 %v4027_v34, %v3974_v15  ;;  %v11844_v56 = vadd.f32 %v4080_v6, %v3976_v24  ;;  %v3843_v15 = vadd.f32 %v11786_v40, %v11681_v57  ;;  %v3966_v24 = vadd.f32 %v11818_v60, %v3790_v10 }
 0x43c   :  { %v4029_v19 = vpop.f32.mrf.mxu0  ;;  %v4082_v51 = vpop.f32.mrf.mxu1  ;;  %v3847_v57 = vadd.f32 %v11796_v63, %v11713_v61 }
 0x43d   :  { %v11846_v3 = vadd.f32 %v4029_v19, %v3977_v2  ;;  %v11848_v4 = vadd.f32 %v4082_v51, %v3979_v35  ;;  %v3968_v12 = vadd.f32 %v11820_v1, %v3843_v15  ;;  %v3792_v2 = vadd.f32 %v11790_v52, %v11695_v50 }
 0x43e   :  { %v4031_v31 = vpop.f32.mrf.mxu0  ;;  %v4084_v26 = vpop.f32.mrf.mxu1  ;;  %v3845_v35 = vadd.f32 %v11792_v44, %v11697_v0  ;;  %v4088_v34 = vadd.f32 %v4017_v23, %v3966_v24 }
 0x43f   :  { %v11850_v41 = vadd.f32 %v4031_v31, %v3978_v48  ;;  %v11852_v16 = vadd.f32 %v4084_v26, %v3980_v20  ;;  %v3794_v48 = vadd.f32 %v11794_v30, %v11711_v38  ;;  %v4090_v13 = vadd.f32 %v4070_v5, %v3968_v12 }
 0x440   :  { %v3969_v40 = vadd.f32 %v11822_v27, %v3792_v2  ;;  %v3971_v60 = vadd.f32 %v11824_v42, %v3845_v35 }
 0x441   :  { %v3970_v50 = vadd.f32 %v11826_v11, %v3794_v48 }
 0x442   :  { %v4093_v23 = vadd.f32 %v4072_v37, %v3971_v60 }
 0x443   :  { %v4092_v5 = vadd.f32 %v4021_v43, %v3970_v50 }
 0x471   :  { %v4137_v20 = vpop.f32.mrf.mxu0  ;;  %v4190_v18 = vpop.f32.mrf.mxu1 }
 0x472   :  { %v4209_v46 = vadd.f32 %v4137_v20, %v4087_v33  ;;  %v4211_v6 = vadd.f32 %v4190_v18, %v4089_v17  ;;  %v3972_v33 = vadd.f32 %v11828_v47, %v3847_v57  ;;  %v4091_v17 = vadd.f32 %v4019_v36, %v3969_v40 }
 0x473   :  { %v4139_v52 = vpop.f32.mrf.mxu0  ;;  %v4192_v0 = vpop.f32.mrf.mxu1 }
 0x474   :  { %v4225_v44 = vadd.f32 %v4209_v46, %v11288_v45  ;;  %v4227_v38 = vadd.f32 %v4211_v6, %v11291_v7  ;;  %v4210_v30 = vadd.f32 %v4139_v52, %v4088_v34  ;;  %v4212_v1 = vadd.f32 %v4192_v0, %v4090_v13 }
 0x475   :  { %v4141_v61 = vpop.f32.mrf.mxu0  ;;  %v4194_v63 = vpop.f32.mrf.mxu1  ;;  %v4094_v51 = vadd.f32 %v4074_v28, %v3972_v33 }
 0x476   :  { %v4241_v27 = vmax.f32 %v4225_v44, 0.0  ;;  %v4243_v19 = vmax.f32 %v4227_v38, 0.0  ;;  %v4226_v42 = vadd.f32 %v4210_v30, %v11308_v55  ;;  %v4228_v11 = vadd.f32 %v4212_v1, %v11311_v59 }
 0x477   :  { %v4213_v31 = vadd.f32 %v4141_v61, %v4091_v17  ;;  %v4215_v26 = vadd.f32 %v4194_v63, %v4093_v23  ;;  %v4143_v10 = vpop.f32.mrf.mxu0  ;;  %v4196_v15 = vpop.f32.mrf.mxu1 }
 0x478   :  { %v4265_v24 = vmax.f32 %v4241_v27, %v4243_v19  ;;  %v4242_v12 = vmax.f32 %v4226_v42, 0.0  ;;  %v4244_v2 = vmax.f32 %v4228_v11, 0.0  ;;  %v4214_v47 = vadd.f32 %v4143_v10, %v4092_v5 }
 0x479   :  { %v4229_v36 = vadd.f32 %v4213_v31, %v11288_v45  ;;  %v4231_v37 = vadd.f32 %v4215_v26, %v11291_v7  ;;  %v4216_v43 = vadd.f32 %v4196_v15, %v4094_v51  ;;  %v4147_v35 = vpop.f32.mrf.mxu0  ;;  %v4200_v48 = vpop.f32.mrf.mxu1 }
 0x47a   :  { %v11879_v20 = vmax.f32 %v11337_v53, %v4265_v24  ;;  %v4266_v18 = vmax.f32 %v4242_v12, %v4244_v2  ;;  %v4230_v28 = vadd.f32 %v4214_v47, %v11308_v55  ;;  %v4217_v34 = vadd.f32 %v4147_v35, %v11838_v49 }
 0x47b   :  { %v4245_v13 = vmax.f32 %v4229_v36, 0.0  ;;  %v4247_v46 = vmax.f32 %v4231_v37, 0.0  ;;  %v4232_v6 = vadd.f32 %v4216_v43, %v11311_v59  ;;  %v4219_v57 = vadd.f32 %v4200_v48, %v11840_v39  ;;  %v4149_v40 = vpop.f32.mrf.mxu0  ;;  %v4202_v60 = vpop.f32.mrf.mxu1  ;;  %v8255_v36 = vld [vmem:[#allocation2 + $0xe0] ss:$16 sps:$4 sm:$0xff]   ;;  %v8258_v37 = vld [vmem:[#allocation2 + $0xe8] ss:$16 sps:$4 sm:$0xff]  }
 0x47c   :  { %v4246_v50 = vmax.f32 %v4230_v28, 0.0  ;;  %v4233_v52 = vadd.f32 %v4217_v34, %v11288_v45  ;;  %v4218_v0 = vadd.f32 %v4149_v40, %v11842_v25  ;;  %v4220_v30 = vadd.f32 %v4202_v60, %v11844_v56  ;;  %v8261_v48 = vld [vmem:[#allocation2 + $0xc0] ss:$16 sps:$4 sm:$0xff]   ;;  %v8269_v28 = vld [vmem:[#allocation2 + $0xa4] ss:$16 sps:$4 sm:$0xff]  }
 0x47d   :  { %v4267_v53 = vmax.f32 %v4245_v13, %v4247_v46  ;;  %v4248_v44 = vmax.f32 %v4232_v6, 0.0  ;;  %v4235_v38 = vadd.f32 %v4219_v57, %v11291_v7  ;;  %v4151_v49 = vpop.f32.mrf.mxu0  ;;  %v4204_v1 = vpop.f32.mrf.mxu1  ;;  %v8270_v13 = vld [vmem:[#allocation2 + $0xa8] ss:$16 sps:$4 sm:$0xff]   ;;  %v8275_v46 = vld [vmem:[#allocation2 + $0x84] ss:$16 sps:$4 sm:$0xff]  }
 0x47e   :  { %v4249_v33 = vmax.f32 %v4233_v52, 0.0  ;;  %v4234_v17 = vadd.f32 %v4218_v0, %v11308_v55  ;;  %v4221_v39 = vadd.f32 %v4151_v49, %v11846_v3  ;;  %v4223_v23 = vadd.f32 %v4204_v1, %v11848_v4  ;;  %v8278_v6 = vld [vmem:[#allocation2 + $0x8c] ss:$16 sps:$4 sm:$0xff]   ;;  %v8273_v57 = vld [vmem:[#allocation2 + $0x80] ss:$16 sps:$4 sm:$0xff]  }
 0x47f   :  { %v4268_v5 = vmax.f32 %v4246_v50, %v4248_v44  ;;  %v4251_v61 = vmax.f32 %v4235_v38, 0.0  ;;  %v4236_v63 = vadd.f32 %v4220_v30, %v11311_v59  ;;  %v4153_v25 = vpop.f32.mrf.mxu0  ;;  %v4206_v27 = vpop.f32.mrf.mxu1  ;;  %v4275_v51 = vmax.f32 %v11366_v21, %v4267_v53  ;;  %v8276_v40 = vld [vmem:[#allocation2 + $0x88] ss:$16 sps:$4 sm:$0xff]   ;;  %v8281_v60 = vld [vmem:[#allocation2 + $0x64] ss:$16 sps:$4 sm:$0xff]  }
 0x480   :  { %v4250_v19 = vmax.f32 %v4234_v17, 0.0  ;;  %v4237_v42 = vadd.f32 %v4221_v39, %v11288_v45  ;;  %v4239_v56 = vadd.f32 %v4223_v23, %v11291_v7  ;;  %v4222_v11 = vadd.f32 %v4153_v25, %v11850_v41  ;;  %v8284_v50 = vld [vmem:[#allocation2 + $0x6c] ss:$16 sps:$4 sm:$0xff]   ;;  %v8282_v52 = vld [vmem:[#allocation2 + $0x68] ss:$16 sps:$4 sm:$0xff]  }
 0x481   :  { %v4269_v31 = vmax.f32 %v4249_v33, %v4251_v61  ;;  %v4252_v26 = vmax.f32 %v4236_v63, 0.0  ;;  %v4224_v3 = vadd.f32 %v4206_v27, %v11852_v16  ;;  %v4276_v24 = vmax.f32 %v11379_v62, %v4268_v5  ;;  %v8263_v62 = vld [vmem:[#allocation2 + $0xc4] ss:$16 sps:$4 sm:$0xff]   ;;  %v8290_v53 = vld [vmem:[#allocation2 + $0x4c] ss:$16 sps:$4 sm:$0xff]  }
 0x482   :  { %v4253_v4 = vmax.f32 %v4237_v42, 0.0  ;;  %v4255_v10 = vmax.f32 %v4239_v56, 0.0  ;;  %v4238_v15 = vadd.f32 %v4222_v11, %v11308_v55  ;;  %v4274_v41 = vmax.f32 %v11352_v22, %v4266_v18  ;;  %v8264_v18 = vld [vmem:[#allocation2 + $0xc8] ss:$16 sps:$4 sm:$0xff]   ;;  %v8287_v0 = vld [vmem:[#allocation2 + $0x44] ss:$16 sps:$4 sm:$0xff]  }
 0x483   :  { %v11901_v12 = vmax.f32 %v11389_v32, %v4269_v31  ;;  %v4270_v45 = vmax.f32 %v4250_v19, %v4252_v26  ;;  %v4240_v7 = vadd.f32 %v4224_v3, %v11311_v59  ;;  %v4348_v47 = vpack.c.bf16 %v4276_v24, %v4276_v24  ;;  %v8266_v32 = vld [vmem:[#allocation2 + $0xcc] ss:$16 sps:$4 sm:$0xff]   ;;  %v8285_v44 = vld [vmem:[#allocation2 + $0x40] ss:$16 sps:$4 sm:$0xff]   ;;  %v8288_v38 = vld [vmem:[#allocation2 + $0x48] ss:$16 sps:$4 sm:$0xff]  }
 0x484   :  { %v4271_v2 = vmax.f32 %v4253_v4, %v4255_v10  ;;  %v4254_v21 = vmax.f32 %v4238_v15, 0.0  ;;  %v4347_v16 = vpack.c.bf16 %v4275_v51, %v4275_v51  ;;  %v4282_v22 = vpack.c.bf16 %v4274_v41, %v4274_v41  ;;  %v8293_v30 = vld [vmem:[#allocation2 + $0x24] ss:$16 sps:$4 sm:$0xff]   ;;  %v8296_v49 = vld [vmem:[#allocation2 + $0x2c] ss:$16 sps:$4 sm:$0xff]  }
 0x485   :  { %v4256_v43 = vmax.f32 %v4240_v7, 0.0  ;;  %v11906_v35 = vmax.f32 %v11402_v8, %v4270_v45  ;;  %4766 = vmatprep.mubr.bf16.mxu0 %v4348_v47  ;;  %4807 = vmatprep.mubr.bf16.mxu1 %v4348_v47  ;;  %v8272_v8 = vld [vmem:[#allocation2 + $0xac] ss:$16 sps:$4 sm:$0xff]   ;;  %v8291_v1 = vld [vmem:[#allocation2 + $0x20] ss:$16 sps:$4 sm:$0xff]  }
 0x486   :  { %v11909_v55 = vmax.f32 %v11411_v58, %v4271_v2  ;;  %4767 = vmatmul.mubr.bf16.vlgmr.msra.gmra.mxu0 %v4347_v16  ;;  %4808 = vmatmul.mubr.bf16.vlgmr.msra.gmra.mxu1 %v4347_v16  ;;  %v8267_v58 = vld [vmem:[#allocation2 + $0xa0] ss:$16 sps:$4 sm:$0xff]   ;;  %v8294_v33 = vld [vmem:[#allocation2 + $0x28] ss:$16 sps:$4 sm:$0xff]   ;;  %v8299_v17 = vld [vmem:[#allocation2 + $0x4] ss:$16 sps:$4 sm:$0xff]  }
 0x487   :  { %v4272_v59 = vmax.f32 %v4254_v21, %v4256_v43  ;;  %5137 = vmatpush1.bf16.msra.mxu0 %v8255_v36  ;;  %5178 = vmatpush1.bf16.msra.mxu1 %v8258_v37  ;;  %v8302_v39 = vld [vmem:[#allocation2 + $0xc] ss:$16 sps:$4 sm:$0xff]   ;;  %v8297_v23 = vld [vmem:[#allocation2] ss:$16 sps:$4 sm:$0xff]   ;;  %v8300_v5 = vld [vmem:[#allocation2 + $0x8] ss:$16 sps:$4 sm:$0xff]  }
 0x488   :  { %5168 = vmatprep.mubr.bf16.mxu0 %v4282_v22  ;;  %5209 = vmatprep.mubr.bf16.mxu1 %v4282_v22  ;;  %v8305_v61 = vld [vmem:[#allocation2 + $0x1e4] ss:$16 sps:$4 sm:$0xff]   ;;  %v8308_v63 = vld [vmem:[#allocation2 + $0x1ec] ss:$16 sps:$4 sm:$0xff]   ;;  %v8303_v25 = vld [vmem:[#allocation2 + $0x1e0] ss:$16 sps:$4 sm:$0xff]  }
 0x489   :  { %v11912_v34 = vmax.f32 %v11419_v14, %v4272_v59  ;;  %5138 = vmatprep.subr.bf16.mxu0 %v8263_v62  ;;  %5179 = vmatprep.subr.bf16.mxu1 %v8266_v32  ;;  %v8279_v14 = vld [vmem:[#allocation2 + $0x60] ss:$16 sps:$4 sm:$0xff]   ;;  %v8306_v27 = vld [vmem:[#allocation2 + $0x1e8] ss:$16 sps:$4 sm:$0xff]   ;;  %v8311_v19 = vld [vmem:[#allocation2 + $0x1c4] ss:$16 sps:$4 sm:$0xff]  }
 0x48a   :  { %v8314_v42 = vld [vmem:[#allocation2 + $0x1cc] ss:$16 sps:$4 sm:$0xff]   ;;  %v8309_v56 = vld [vmem:[#allocation2 + $0x1c0] ss:$16 sps:$4 sm:$0xff]   ;;  %v8312_v11 = vld [vmem:[#allocation2 + $0x1c8] ss:$16 sps:$4 sm:$0xff]  }
 0x48b   :  { %5139 = vmatpush1.bf16.msra.mxu0 %v8261_v48  ;;  %5180 = vmatpush1.bf16.msra.mxu1 %v8264_v18  ;;  %v8317_v51 = vld [vmem:[#allocation2 + $0x1a4] ss:$16 sps:$4 sm:$0xff]   ;;  %v8320_v31 = vld [vmem:[#allocation2 + $0x1ac] ss:$16 sps:$4 sm:$0xff]   ;;  %v8315_v26 = vld [vmem:[#allocation2 + $0x1a0] ss:$16 sps:$4 sm:$0xff]  }
 0x48c   :  { %5140 = vmatprep.subr.bf16.mxu0 %v8269_v28  ;;  %5181 = vmatprep.subr.bf16.mxu1 %v8272_v8  ;;  %v8318_v3 = vld [vmem:[#allocation2 + $0x1a8] ss:$16 sps:$4 sm:$0xff]   ;;  %v8323_v4 = vld [vmem:[#allocation2 + $0x184] ss:$16 sps:$4 sm:$0xff]   ;;  %v8326_v10 = vld [vmem:[#allocation2 + $0x18c] ss:$16 sps:$4 sm:$0xff]  }
 0x48d   :  { %v8321_v15 = vld [vmem:[#allocation2 + $0x180] ss:$16 sps:$4 sm:$0xff]   ;;  %v8324_v24 = vld [vmem:[#allocation2 + $0x188] ss:$16 sps:$4 sm:$0xff]   ;;  %v8329_v45 = vld [vmem:[#allocation2 + $0x164] ss:$16 sps:$4 sm:$0xff]  }
 0x48e   :  { %v8332_v7 = vld [vmem:[#allocation2 + $0x16c] ss:$16 sps:$4 sm:$0xff]   ;;  %v8327_v41 = vld [vmem:[#allocation2 + $0x160] ss:$16 sps:$4 sm:$0xff]   ;;  %v8330_v2 = vld [vmem:[#allocation2 + $0x168] ss:$16 sps:$4 sm:$0xff]  }
 0x48f   :  { %5141 = vmatpush1.bf16.msra.mxu0 %v8267_v58  ;;  %5182 = vmatpush1.bf16.msra.mxu1 %v8270_v13  ;;  %v8335_v21 = vld [vmem:[#allocation2 + $0x144] ss:$16 sps:$4 sm:$0xff]   ;;  %v8338_v47 = vld [vmem:[#allocation2 + $0x14c] ss:$16 sps:$4 sm:$0xff]   ;;  %v8333_v36 = vld [vmem:[#allocation2 + $0x140] ss:$16 sps:$4 sm:$0xff]   ;;  %v4281_v13 = vpack.c.bf16 %v11879_v20, %v11879_v20 }
 0x490   :  { %5142 = vmatprep.subr.bf16.mxu0 %v8275_v46  ;;  %5183 = vmatprep.subr.bf16.mxu1 %v8278_v6  ;;  %v8336_v37 = vld [vmem:[#allocation2 + $0x148] ss:$16 sps:$4 sm:$0xff]   ;;  %v8341_v16 = vld [vmem:[#allocation2 + $0x124] ss:$16 sps:$4 sm:$0xff]   ;;  %v8344_v43 = vld [vmem:[#allocation2 + $0x12c] ss:$16 sps:$4 sm:$0xff]   ;;  %v5219_v6 = vpack.c.bf16 %v11906_v35, %v11906_v35 }
 0x491   :  { %v8339_v62 = vld [vmem:[#allocation2 + $0x120] ss:$16 sps:$4 sm:$0xff]   ;;  %v8342_v32 = vld [vmem:[#allocation2 + $0x128] ss:$16 sps:$4 sm:$0xff]   ;;  %v8347_v59 = vld [vmem:[#allocation2 + $0x104] ss:$16 sps:$4 sm:$0xff]  }
 0x492   :  { %v8350_v22 = vld [vmem:[#allocation2 + $0x10c] ss:$16 sps:$4 sm:$0xff]   ;;  %v8345_v48 = vld [vmem:[#allocation2 + $0x100] ss:$16 sps:$4 sm:$0xff]   ;;  %v8348_v18 = vld [vmem:[#allocation2 + $0x108] ss:$16 sps:$4 sm:$0xff]  }
 0x493   :  { %5143 = vmatpush1.bf16.msra.mxu0 %v8273_v57  ;;  %5184 = vmatpush1.bf16.msra.mxu1 %v8276_v40  ;;  %v8353_v28 = vld [vmem:[#allocation2 + $0x4e4] ss:$16 sps:$4 sm:$0xff]   ;;  %v8356_v8 = vld [vmem:[#allocation2 + $0x4ec] ss:$16 sps:$4 sm:$0xff]   ;;  %v8351_v58 = vld [vmem:[#allocation2 + $0x4e0] ss:$16 sps:$4 sm:$0xff]  }
 0x494   :  { %5144 = vmatprep.subr.bf16.mxu0 %v8281_v60  ;;  %5185 = vmatprep.subr.bf16.mxu1 %v8284_v50  ;;  %v8354_v46 = vld [vmem:[#allocation2 + $0x4e8] ss:$16 sps:$4 sm:$0xff]   ;;  %v8359_v57 = vld [vmem:[#allocation2 + $0x4c4] ss:$16 sps:$4 sm:$0xff]   ;;  %v8362_v40 = vld [vmem:[#allocation2 + $0x4cc] ss:$16 sps:$4 sm:$0xff]  }
 0x495   :  { %v8357_v60 = vld [vmem:[#allocation2 + $0x4c0] ss:$16 sps:$4 sm:$0xff]   ;;  %v8360_v50 = vld [vmem:[#allocation2 + $0x4c8] ss:$16 sps:$4 sm:$0xff]   ;;  %v8368_v20 = vld [vmem:[#allocation2 + $0x4ac] ss:$16 sps:$4 sm:$0xff]  }
 0x496   :  { %v8371_v35 = vld [vmem:[#allocation2 + $0x484] ss:$16 sps:$4 sm:$0xff]  }
 0x497   :  { %5145 = vmatpush1.bf16.msra.mxu0 %v8279_v14  ;;  %5186 = vmatpush1.bf16.msra.mxu1 %v8282_v52  ;;  %v8365_v14 = vld [vmem:[#allocation2 + $0x4a4] ss:$16 sps:$4 sm:$0xff]   ;;  %v8363_v52 = vld [vmem:[#allocation2 + $0x4a0] ss:$16 sps:$4 sm:$0xff]  }
 0x498   :  { %5146 = vmatprep.subr.bf16.mxu0 %v8287_v0  ;;  %5187 = vmatprep.subr.bf16.mxu1 %v8290_v53  ;;  %v8366_v0 = vld [vmem:[#allocation2 + $0x4a8] ss:$16 sps:$4 sm:$0xff]   ;;  %v8374_v53 = vld [vmem:[#allocation2 + $0x48c] ss:$16 sps:$4 sm:$0xff]  }
 0x49b   :  { %5147 = vmatpush1.bf16.msra.mxu0 %v8285_v44  ;;  %5188 = vmatpush1.bf16.msra.mxu1 %v8288_v38  ;;  %v8369_v44 = vld [vmem:[#allocation2 + $0x480] ss:$16 sps:$4 sm:$0xff]   ;;  %v8372_v38 = vld [vmem:[#allocation2 + $0x488] ss:$16 sps:$4 sm:$0xff]  }
 0x49c   :  { %5148 = vmatprep.subr.bf16.mxu0 %v8293_v30  ;;  %5189 = vmatprep.subr.bf16.mxu1 %v8296_v49  ;;  %v8377_v30 = vld [vmem:[#allocation2 + $0x464] ss:$16 sps:$4 sm:$0xff]   ;;  %v8380_v49 = vld [vmem:[#allocation2 + $0x46c] ss:$16 sps:$4 sm:$0xff]  }
 0x49f   :  { %5149 = vmatpush1.bf16.msra.mxu0 %v8291_v1  ;;  %5190 = vmatpush1.bf16.msra.mxu1 %v8294_v33  ;;  %v8375_v1 = vld [vmem:[#allocation2 + $0x460] ss:$16 sps:$4 sm:$0xff]   ;;  %v8378_v33 = vld [vmem:[#allocation2 + $0x468] ss:$16 sps:$4 sm:$0xff]  }
 0x4a0   :  { %5150 = vmatprep.subr.bf16.mxu0 %v8299_v17  ;;  %5191 = vmatprep.subr.bf16.mxu1 %v8302_v39  ;;  %v8383_v17 = vld [vmem:[#allocation2 + $0x444] ss:$16 sps:$4 sm:$0xff]   ;;  %v8386_v39 = vld [vmem:[#allocation2 + $0x44c] ss:$16 sps:$4 sm:$0xff]  }
 0x4a3   :  { %5151 = vmatpush1.bf16.msra.mxu0 %v8297_v23  ;;  %5192 = vmatpush1.bf16.msra.mxu1 %v8300_v5  ;;  %v8381_v23 = vld [vmem:[#allocation2 + $0x440] ss:$16 sps:$4 sm:$0xff]   ;;  %v8384_v5 = vld [vmem:[#allocation2 + $0x448] ss:$16 sps:$4 sm:$0xff]  }
 0x4a4   :  { %5152 = vmatprep.subr.bf16.mxu0 %v8305_v61  ;;  %5193 = vmatprep.subr.bf16.mxu1 %v8308_v63  ;;  %v8389_v61 = vld [vmem:[#allocation2 + $0x424] ss:$16 sps:$4 sm:$0xff]   ;;  %v8392_v63 = vld [vmem:[#allocation2 + $0x42c] ss:$16 sps:$4 sm:$0xff]  }
 0x4a7   :  { %5153 = vmatpush2.bf16.msra.mxu0 %v8303_v25  ;;  %5194 = vmatpush2.bf16.msra.mxu1 %v8306_v27  ;;  %v8387_v25 = vld [vmem:[#allocation2 + $0x420] ss:$16 sps:$4 sm:$0xff]   ;;  %v8390_v27 = vld [vmem:[#allocation2 + $0x428] ss:$16 sps:$4 sm:$0xff]  }
 0x4a8   :  { %5154 = vmatprep.subr.bf16.mxu0 %v8311_v19  ;;  %5195 = vmatprep.subr.bf16.mxu1 %v8314_v42  ;;  %v8395_v19 = vld [vmem:[#allocation2 + $0x404] ss:$16 sps:$4 sm:$0xff]   ;;  %v8398_v42 = vld [vmem:[#allocation2 + $0x40c] ss:$16 sps:$4 sm:$0xff]  }
 0x4ab   :  { %5155 = vmatpush2.bf16.msra.mxu0 %v8309_v56  ;;  %5196 = vmatpush2.bf16.msra.mxu1 %v8312_v11  ;;  %v8393_v56 = vld [vmem:[#allocation2 + $0x400] ss:$16 sps:$4 sm:$0xff]   ;;  %v8396_v11 = vld [vmem:[#allocation2 + $0x408] ss:$16 sps:$4 sm:$0xff]  }
 0x4ac   :  { %5156 = vmatprep.subr.bf16.mxu0 %v8317_v51  ;;  %5197 = vmatprep.subr.bf16.mxu1 %v8320_v31  ;;  %v8401_v51 = vld [vmem:[#allocation2 + $0x5e4] ss:$16 sps:$4 sm:$0xff]   ;;  %v8404_v31 = vld [vmem:[#allocation2 + $0x5ec] ss:$16 sps:$4 sm:$0xff]  }
 0x4af   :  { %5157 = vmatpush2.bf16.msra.mxu0 %v8315_v26  ;;  %5198 = vmatpush2.bf16.msra.mxu1 %v8318_v3  ;;  %v8399_v26 = vld [vmem:[#allocation2 + $0x5e0] ss:$16 sps:$4 sm:$0xff]   ;;  %v8402_v3 = vld [vmem:[#allocation2 + $0x5e8] ss:$16 sps:$4 sm:$0xff]  }
 0x4b0   :  { %5158 = vmatprep.subr.bf16.mxu0 %v8323_v4  ;;  %5199 = vmatprep.subr.bf16.mxu1 %v8326_v10  ;;  %v8407_v4 = vld [vmem:[#allocation2 + $0x5c4] ss:$16 sps:$4 sm:$0xff]   ;;  %v8410_v10 = vld [vmem:[#allocation2 + $0x5cc] ss:$16 sps:$4 sm:$0xff]  }
 0x4b3   :  { %5159 = vmatpush2.bf16.msra.mxu0 %v8321_v15  ;;  %5200 = vmatpush2.bf16.msra.mxu1 %v8324_v24  ;;  %v8405_v15 = vld [vmem:[#allocation2 + $0x5c0] ss:$16 sps:$4 sm:$0xff]   ;;  %v8408_v24 = vld [vmem:[#allocation2 + $0x5c8] ss:$16 sps:$4 sm:$0xff]  }
 0x4b4   :  { %5160 = vmatprep.subr.bf16.mxu0 %v8329_v45  ;;  %5201 = vmatprep.subr.bf16.mxu1 %v8332_v7  ;;  %v8413_v45 = vld [vmem:[#allocation2 + $0x5a4] ss:$16 sps:$4 sm:$0xff]   ;;  %v8416_v7 = vld [vmem:[#allocation2 + $0x5ac] ss:$16 sps:$4 sm:$0xff]  }
 0x4b7   :  { %5161 = vmatpush2.bf16.msra.mxu0 %v8327_v41  ;;  %5202 = vmatpush2.bf16.msra.mxu1 %v8330_v2  ;;  %v8411_v41 = vld [vmem:[#allocation2 + $0x5a0] ss:$16 sps:$4 sm:$0xff]   ;;  %v8414_v2 = vld [vmem:[#allocation2 + $0x5a8] ss:$16 sps:$4 sm:$0xff]  }
 0x4b8   :  { %5162 = vmatprep.subr.bf16.mxu0 %v8335_v21  ;;  %5203 = vmatprep.subr.bf16.mxu1 %v8338_v47  ;;  %v8419_v21 = vld [vmem:[#allocation2 + $0x584] ss:$16 sps:$4 sm:$0xff]   ;;  %v8422_v47 = vld [vmem:[#allocation2 + $0x58c] ss:$16 sps:$4 sm:$0xff]  }
 0x4bb   :  { %5163 = vmatpush2.bf16.msra.mxu0 %v8333_v36  ;;  %5204 = vmatpush2.bf16.msra.mxu1 %v8336_v37  ;;  %v8417_v36 = vld [vmem:[#allocation2 + $0x580] ss:$16 sps:$4 sm:$0xff]   ;;  %v8420_v37 = vld [vmem:[#allocation2 + $0x588] ss:$16 sps:$4 sm:$0xff]  }
 0x4bc   :  { %5164 = vmatprep.subr.bf16.mxu0 %v8341_v16  ;;  %5205 = vmatprep.subr.bf16.mxu1 %v8344_v43  ;;  %v8425_v16 = vld [vmem:[#allocation2 + $0x564] ss:$16 sps:$4 sm:$0xff]   ;;  %v8428_v43 = vld [vmem:[#allocation2 + $0x56c] ss:$16 sps:$4 sm:$0xff]  }
 0x4bf   :  { %5165 = vmatpush2.bf16.msra.mxu0 %v8339_v62  ;;  %5206 = vmatpush2.bf16.msra.mxu1 %v8342_v32  ;;  %v8423_v62 = vld [vmem:[#allocation2 + $0x560] ss:$16 sps:$4 sm:$0xff]   ;;  %v8426_v32 = vld [vmem:[#allocation2 + $0x568] ss:$16 sps:$4 sm:$0xff]  }
 0x4c0   :  { %5166 = vmatprep.subr.bf16.mxu0 %v8347_v59  ;;  %5207 = vmatprep.subr.bf16.mxu1 %v8350_v22  ;;  %v8431_v59 = vld [vmem:[#allocation2 + $0x544] ss:$16 sps:$4 sm:$0xff]   ;;  %v8434_v22 = vld [vmem:[#allocation2 + $0x54c] ss:$16 sps:$4 sm:$0xff]  }
 0x4c3   :  { %5167 = vmatpush2.bf16.msra.mxu0 %v8345_v48  ;;  %5208 = vmatpush2.bf16.msra.mxu1 %v8348_v18  ;;  %v8429_v48 = vld [vmem:[#allocation2 + $0x540] ss:$16 sps:$4 sm:$0xff]   ;;  %v8432_v18 = vld [vmem:[#allocation2 + $0x548] ss:$16 sps:$4 sm:$0xff]  }
 0x4c4   :  { %5605 = vmatprep.subr.bf16.mxu0 %v8353_v28  ;;  %5646 = vmatprep.subr.bf16.mxu1 %v8356_v8  ;;  %v8437_v28 = vld [vmem:[#allocation2 + $0x524] ss:$16 sps:$4 sm:$0xff]   ;;  %v8440_v8 = vld [vmem:[#allocation2 + $0x52c] ss:$16 sps:$4 sm:$0xff]  }
 0x4c6   :  { %5169 = vmatmul.mubr.bf16.vlgmr.msra.gmra.mxu0 %v4281_v13  ;;  %5210 = vmatmul.mubr.bf16.vlgmr.msra.gmra.mxu1 %v4281_v13  ;;  %v8438_v13 = vld [vmem:[#allocation2 + $0x528] ss:$16 sps:$4 sm:$0xff]  }
 0x4c7   :  { %5606 = vmatpush1.bf16.msra.mxu0 %v8351_v58  ;;  %5637 = vmatprep.mubr.bf16.mxu0 %v5219_v6  ;;  %v8435_v58 = vld [vmem:[#allocation2 + $0x520] ss:$16 sps:$4 sm:$0xff]  }
 0x4c8   :  { %5647 = vmatpush1.bf16.msra.mxu1 %v8354_v46  ;;  %5678 = vmatprep.mubr.bf16.mxu1 %v5219_v6  ;;  %v8443_v46 = vld [vmem:[#allocation2 + $0x504] ss:$16 sps:$4 sm:$0xff]   ;;  %v8446_v6 = vld [vmem:[#allocation2 + $0x50c] ss:$16 sps:$4 sm:$0xff]  }
 0x4c9   :  { %5607 = vmatprep.subr.bf16.mxu0 %v8359_v57  ;;  %5648 = vmatprep.subr.bf16.mxu1 %v8362_v40  ;;  %v8441_v57 = vld [vmem:[#allocation2 + $0x500] ss:$16 sps:$4 sm:$0xff]   ;;  %v8444_v40 = vld [vmem:[#allocation2 + $0x508] ss:$16 sps:$4 sm:$0xff]  }
 0x4cb   :  { %5608 = vmatpush1.bf16.msra.mxu0 %v8357_v60  ;;  %v8449_v60 = vld [vmem:[#allocation2 + $0x6e4] ss:$16 sps:$4 sm:$0xff]  }
 0x4cc   :  { %5649 = vmatpush1.bf16.msra.mxu1 %v8360_v50  ;;  %5609 = vmatprep.subr.bf16.mxu0 %v8365_v14  ;;  %v8452_v50 = vld [vmem:[#allocation2 + $0x6ec] ss:$16 sps:$4 sm:$0xff]   ;;  %v8447_v14 = vld [vmem:[#allocation2 + $0x6e0] ss:$16 sps:$4 sm:$0xff]  }
 0x4cd   :  { %5650 = vmatprep.subr.bf16.mxu1 %v8368_v20  ;;  %v5218_v20 = vpack.c.bf16 %v11901_v12, %v11901_v12  ;;  %v8464_v12 = vld [vmem:[#allocation2 + $0x6ac] ss:$16 sps:$4 sm:$0xff]  }
 0x4cf   :  { %5610 = vmatpush1.bf16.msra.mxu0 %v8363_v52  ;;  %v8450_v52 = vld [vmem:[#allocation2 + $0x6e8] ss:$16 sps:$4 sm:$0xff]  }
 0x4d0   :  { %5651 = vmatpush1.bf16.msra.mxu1 %v8366_v0  ;;  %5611 = vmatprep.subr.bf16.mxu0 %v8371_v35  ;;  %v8455_v0 = vld [vmem:[#allocation2 + $0x6c4] ss:$16 sps:$4 sm:$0xff]   ;;  %v5692_v35 = vpack.c.bf16 %v11912_v34, %v11912_v34  ;;  %v8470_v34 = vld [vmem:[#allocation2 + $0x68c] ss:$16 sps:$4 sm:$0xff]  }
 0x4d1   :  { %5652 = vmatprep.subr.bf16.mxu1 %v8374_v53  ;;  %v8458_v53 = vld [vmem:[#allocation2 + $0x6cc] ss:$16 sps:$4 sm:$0xff]  }
 0x4d3   :  { %5612 = vmatpush1.bf16.msra.mxu0 %v8369_v44  ;;  %v8453_v44 = vld [vmem:[#allocation2 + $0x6c0] ss:$16 sps:$4 sm:$0xff]  }
 0x4d4   :  { %5653 = vmatpush1.bf16.msra.mxu1 %v8372_v38  ;;  %5613 = vmatprep.subr.bf16.mxu0 %v8377_v30  ;;  %v8456_v38 = vld [vmem:[#allocation2 + $0x6c8] ss:$16 sps:$4 sm:$0xff]   ;;  %v8461_v30 = vld [vmem:[#allocation2 + $0x6a4] ss:$16 sps:$4 sm:$0xff]  }
 0x4d5   :  { %5654 = vmatprep.subr.bf16.mxu1 %v8380_v49  ;;  %v8459_v49 = vld [vmem:[#allocation2 + $0x6a0] ss:$16 sps:$4 sm:$0xff]  }
 0x4d7   :  { %5614 = vmatpush1.bf16.msra.mxu0 %v8375_v1  ;;  %v8462_v1 = vld [vmem:[#allocation2 + $0x6a8] ss:$16 sps:$4 sm:$0xff]  }
 0x4d8   :  { %5655 = vmatpush1.bf16.msra.mxu1 %v8378_v33  ;;  %5615 = vmatprep.subr.bf16.mxu0 %v8383_v17  ;;  %v8467_v33 = vld [vmem:[#allocation2 + $0x684] ss:$16 sps:$4 sm:$0xff]   ;;  %v8465_v17 = vld [vmem:[#allocation2 + $0x680] ss:$16 sps:$4 sm:$0xff]  }
 0x4d9   :  { %5656 = vmatprep.subr.bf16.mxu1 %v8386_v39  ;;  %v8468_v39 = vld [vmem:[#allocation2 + $0x688] ss:$16 sps:$4 sm:$0xff]  }
 0x4db   :  { %5616 = vmatpush1.bf16.msra.mxu0 %v8381_v23  ;;  %v8473_v23 = vld [vmem:[#allocation2 + $0x664] ss:$16 sps:$4 sm:$0xff]  }
 0x4dc   :  { %5657 = vmatpush1.bf16.msra.mxu1 %v8384_v5  ;;  %5617 = vmatprep.subr.bf16.mxu0 %v8389_v61  ;;  %v8476_v5 = vld [vmem:[#allocation2 + $0x66c] ss:$16 sps:$4 sm:$0xff]   ;;  %v8471_v61 = vld [vmem:[#allocation2 + $0x660] ss:$16 sps:$4 sm:$0xff]  }
 0x4dd   :  { %5658 = vmatprep.subr.bf16.mxu1 %v8392_v63  ;;  %v8474_v63 = vld [vmem:[#allocation2 + $0x668] ss:$16 sps:$4 sm:$0xff]  }
 0x4df   :  { %5618 = vmatpush1.bf16.msra.mxu0 %v8387_v25  ;;  %v8479_v25 = vld [vmem:[#allocation2 + $0x644] ss:$16 sps:$4 sm:$0xff]  }
 0x4e0   :  { %5659 = vmatpush1.bf16.msra.mxu1 %v8390_v27  ;;  %5619 = vmatprep.subr.bf16.mxu0 %v8395_v19  ;;  %v8482_v27 = vld [vmem:[#allocation2 + $0x64c] ss:$16 sps:$4 sm:$0xff]   ;;  %v8477_v19 = vld [vmem:[#allocation2 + $0x640] ss:$16 sps:$4 sm:$0xff]  }
 0x4e1   :  { %5660 = vmatprep.subr.bf16.mxu1 %v8398_v42  ;;  %v8480_v42 = vld [vmem:[#allocation2 + $0x648] ss:$16 sps:$4 sm:$0xff]  }
 0x4e3   :  { %5620 = vmatpush1.bf16.msra.mxu0 %v8393_v56  ;;  %v8485_v56 = vld [vmem:[#allocation2 + $0x624] ss:$16 sps:$4 sm:$0xff]  }
 0x4e4   :  { %5661 = vmatpush1.bf16.msra.mxu1 %v8396_v11  ;;  %5621 = vmatprep.subr.bf16.mxu0 %v8401_v51  ;;  %v8488_v11 = vld [vmem:[#allocation2 + $0x62c] ss:$16 sps:$4 sm:$0xff]   ;;  %v8483_v51 = vld [vmem:[#allocation2 + $0x620] ss:$16 sps:$4 sm:$0xff]  }
 0x4e5   :  { %5662 = vmatprep.subr.bf16.mxu1 %v8404_v31  ;;  %v8486_v31 = vld [vmem:[#allocation2 + $0x628] ss:$16 sps:$4 sm:$0xff]  }
 0x4e7   :  { %5622 = vmatpush2.bf16.msra.mxu0 %v8399_v26  ;;  %v8491_v26 = vld [vmem:[#allocation2 + $0x604] ss:$16 sps:$4 sm:$0xff]  }
 0x4e8   :  { %5663 = vmatpush2.bf16.msra.mxu1 %v8402_v3  ;;  %5623 = vmatprep.subr.bf16.mxu0 %v8407_v4  ;;  %v8494_v3 = vld [vmem:[#allocation2 + $0x60c] ss:$16 sps:$4 sm:$0xff]   ;;  %v8489_v4 = vld [vmem:[#allocation2 + $0x600] ss:$16 sps:$4 sm:$0xff]  }
 0x4e9   :  { %5664 = vmatprep.subr.bf16.mxu1 %v8410_v10  ;;  %v8492_v10 = vld [vmem:[#allocation2 + $0x608] ss:$16 sps:$4 sm:$0xff]  }
 0x4eb   :  { %5624 = vmatpush2.bf16.msra.mxu0 %v8405_v15  ;;  %v8497_v15 = vld [vmem:[#allocation2 + $0x7e4] ss:$16 sps:$4 sm:$0xff]  }
 0x4ec   :  { %5665 = vmatpush2.bf16.msra.mxu1 %v8408_v24  ;;  %5625 = vmatprep.subr.bf16.mxu0 %v8413_v45  ;;  %v8500_v24 = vld [vmem:[#allocation2 + $0x7ec] ss:$16 sps:$4 sm:$0xff]   ;;  %v8495_v45 = vld [vmem:[#allocation2 + $0x7e0] ss:$16 sps:$4 sm:$0xff]  }
 0x4ed   :  { %5666 = vmatprep.subr.bf16.mxu1 %v8416_v7  ;;  %v8498_v7 = vld [vmem:[#allocation2 + $0x7e8] ss:$16 sps:$4 sm:$0xff]  }
 0x4ef   :  { %5626 = vmatpush2.bf16.msra.mxu0 %v8411_v41  ;;  %v8503_v41 = vld [vmem:[#allocation2 + $0x7c4] ss:$16 sps:$4 sm:$0xff]  }
 0x4f0   :  { %5667 = vmatpush2.bf16.msra.mxu1 %v8414_v2  ;;  %5627 = vmatprep.subr.bf16.mxu0 %v8419_v21  ;;  %v8506_v2 = vld [vmem:[#allocation2 + $0x7cc] ss:$16 sps:$4 sm:$0xff]   ;;  %v8501_v21 = vld [vmem:[#allocation2 + $0x7c0] ss:$16 sps:$4 sm:$0xff]  }
 0x4f1   :  { %5668 = vmatprep.subr.bf16.mxu1 %v8422_v47  ;;  %v8504_v47 = vld [vmem:[#allocation2 + $0x7c8] ss:$16 sps:$4 sm:$0xff]  }
 0x4f3   :  { %5628 = vmatpush2.bf16.msra.mxu0 %v8417_v36  ;;  %v8509_v36 = vld [vmem:[#allocation2 + $0x7a4] ss:$16 sps:$4 sm:$0xff]  }
 0x4f4   :  { %5669 = vmatpush2.bf16.msra.mxu1 %v8420_v37  ;;  %5629 = vmatprep.subr.bf16.mxu0 %v8425_v16  ;;  %v8512_v37 = vld [vmem:[#allocation2 + $0x7ac] ss:$16 sps:$4 sm:$0xff]   ;;  %v8507_v16 = vld [vmem:[#allocation2 + $0x7a0] ss:$16 sps:$4 sm:$0xff]  }
 0x4f5   :  { %5670 = vmatprep.subr.bf16.mxu1 %v8428_v43  ;;  %v8510_v43 = vld [vmem:[#allocation2 + $0x7a8] ss:$16 sps:$4 sm:$0xff]  }
 0x4f7   :  { %5630 = vmatpush2.bf16.msra.mxu0 %v8423_v62  ;;  %v8515_v62 = vld [vmem:[#allocation2 + $0x784] ss:$16 sps:$4 sm:$0xff]  }
 0x4f8   :  { %5671 = vmatpush2.bf16.msra.mxu1 %v8426_v32  ;;  %5631 = vmatprep.subr.bf16.mxu0 %v8431_v59  ;;  %v8518_v32 = vld [vmem:[#allocation2 + $0x78c] ss:$16 sps:$4 sm:$0xff]   ;;  %v8513_v59 = vld [vmem:[#allocation2 + $0x780] ss:$16 sps:$4 sm:$0xff]  }
 0x4f9   :  { %5672 = vmatprep.subr.bf16.mxu1 %v8434_v22  ;;  %v8516_v22 = vld [vmem:[#allocation2 + $0x788] ss:$16 sps:$4 sm:$0xff]  }
 0x4fb   :  { %5632 = vmatpush2.bf16.msra.mxu0 %v8429_v48  ;;  %v8521_v48 = vld [vmem:[#allocation2 + $0x764] ss:$16 sps:$4 sm:$0xff]  }
 0x4fc   :  { %5673 = vmatpush2.bf16.msra.mxu1 %v8432_v18  ;;  %5633 = vmatprep.subr.bf16.mxu0 %v8437_v28  ;;  %v8524_v18 = vld [vmem:[#allocation2 + $0x76c] ss:$16 sps:$4 sm:$0xff]   ;;  %v8519_v28 = vld [vmem:[#allocation2 + $0x760] ss:$16 sps:$4 sm:$0xff]  }
 0x4fd   :  { %5674 = vmatprep.subr.bf16.mxu1 %v8440_v8  ;;  %v8522_v8 = vld [vmem:[#allocation2 + $0x768] ss:$16 sps:$4 sm:$0xff]  }
 0x4ff   :  { %5634 = vmatpush2.bf16.msra.mxu0 %v8435_v58  ;;  %v8527_v58 = vld [vmem:[#allocation2 + $0x744] ss:$16 sps:$4 sm:$0xff]  }
 0x500   :  { %5675 = vmatpush2.bf16.msra.mxu1 %v8438_v13  ;;  %5635 = vmatprep.subr.bf16.mxu0 %v8443_v46  ;;  %v8530_v13 = vld [vmem:[#allocation2 + $0x74c] ss:$16 sps:$4 sm:$0xff]   ;;  %v8525_v46 = vld [vmem:[#allocation2 + $0x740] ss:$16 sps:$4 sm:$0xff]  }
 0x501   :  { %5676 = vmatprep.subr.bf16.mxu1 %v8446_v6  ;;  %v8528_v6 = vld [vmem:[#allocation2 + $0x748] ss:$16 sps:$4 sm:$0xff]  }
 0x503   :  { %5636 = vmatpush2.bf16.msra.mxu0 %v8441_v57  ;;  %v8533_v57 = vld [vmem:[#allocation2 + $0x724] ss:$16 sps:$4 sm:$0xff]  }
 0x504   :  { %5677 = vmatpush2.bf16.msra.mxu1 %v8444_v40  ;;  %6078 = vmatprep.subr.bf16.mxu0 %v8449_v60  ;;  %v8536_v40 = vld [vmem:[#allocation2 + $0x72c] ss:$16 sps:$4 sm:$0xff]   ;;  %v8531_v60 = vld [vmem:[#allocation2 + $0x720] ss:$16 sps:$4 sm:$0xff]  }
 0x505   :  { %6119 = vmatprep.subr.bf16.mxu1 %v8452_v50  ;;  %v8534_v50 = vld [vmem:[#allocation2 + $0x728] ss:$16 sps:$4 sm:$0xff]  }
 0x506   :  { %5638 = vmatmul.mubr.bf16.vlgmr.msra.gmra.mxu0 %v5218_v20 }
 0x507   :  { %5679 = vmatmul.mubr.bf16.vlgmr.msra.gmra.mxu1 %v5218_v20  ;;  %6079 = vmatpush1.bf16.msra.mxu0 %v8447_v14  ;;  %v8539_v14 = vld [vmem:[#allocation2 + $0x704] ss:$16 sps:$4 sm:$0xff]   ;;  %v8542_v20 = vld [vmem:[#allocation2 + $0x70c] ss:$16 sps:$4 sm:$0xff]  }
 0x508   :  { %6110 = vmatprep.mubr.bf16.mxu0 %v5692_v35  ;;  %6120 = vmatpush1.bf16.msra.mxu1 %v8450_v52  ;;  %v8537_v52 = vld [vmem:[#allocation2 + $0x700] ss:$16 sps:$4 sm:$0xff]  }
 0x509   :  { %6151 = vmatprep.mubr.bf16.mxu1 %v5692_v35  ;;  %6080 = vmatprep.subr.bf16.mxu0 %v8455_v0  ;;  %v8540_v0 = vld [vmem:[#allocation2 + $0x708] ss:$16 sps:$4 sm:$0xff]   ;;  %v5691_v35 = vpack.c.bf16 %v11909_v55, %v11909_v55 }
 0x50a   :  { %6121 = vmatprep.subr.bf16.mxu1 %v8458_v53  ;;  %v8545_v55 = vld [vmem:[%s12040_s7 + $0x38] sm:$0xff]  }
 0x50b   :  { %6081 = vmatpush1.bf16.msra.mxu0 %v8453_v44 }
 0x50c   :  { %6122 = vmatpush1.bf16.msra.mxu1 %v8456_v38  ;;  %6082 = vmatprep.subr.bf16.mxu0 %v8461_v30 }
 0x50d   :  { %6123 = vmatprep.subr.bf16.mxu1 %v8464_v12 }
 0x50f   :  { %6083 = vmatpush1.bf16.msra.mxu0 %v8459_v49 }
 0x510   :  { %6124 = vmatpush1.bf16.msra.mxu1 %v8462_v1  ;;  %6084 = vmatprep.subr.bf16.mxu0 %v8467_v33 }
 0x511   :  { %6125 = vmatprep.subr.bf16.mxu1 %v8470_v34  ;;  %v8543_v34 = vld [vmem:[%s12040_s7 + $0x78] sm:$0xff]  }
 0x513   :  { %6085 = vmatpush1.bf16.msra.mxu0 %v8465_v17  ;;  %v8544_v17 = vld [vmem:[%s12040_s7 + $0xf8] sm:$0xff]  }
 0x514   :  { %6126 = vmatpush1.bf16.msra.mxu1 %v8468_v39  ;;  %6086 = vmatprep.subr.bf16.mxu0 %v8473_v23  ;;  %v8546_v39 = vld [vmem:[%s12040_s7 + $0xb8] sm:$0xff]   ;;  %v8547_v23 = vld [vmem:[%s12040_s7 + $0x70] sm:$0xff]  }
 0x515   :  { %6127 = vmatprep.subr.bf16.mxu1 %v8476_v5  ;;  %v8548_v5 = vld [vmem:[%s12040_s7 + $0xf0] sm:$0xff]  }
 0x517   :  { %6087 = vmatpush1.bf16.msra.mxu0 %v8471_v61  ;;  %v8549_v61 = vld [vmem:[%s12040_s7 + $0x30] sm:$0xff]  }
 0x518   :  { %6128 = vmatpush1.bf16.msra.mxu1 %v8474_v63  ;;  %6088 = vmatprep.subr.bf16.mxu0 %v8479_v25  ;;  %v8550_v63 = vld [vmem:[%s12040_s7 + $0xb0] sm:$0xff]   ;;  %v8551_v25 = vld [vmem:[%s12040_s7 + $0x68] sm:$0xff]  }
 0x519   :  { %6129 = vmatprep.subr.bf16.mxu1 %v8482_v27  ;;  %v8552_v27 = vld [vmem:[%s12040_s7 + $0xe8] sm:$0xff]  }
 0x51b   :  { %6089 = vmatpush1.bf16.msra.mxu0 %v8477_v19  ;;  %v8553_v19 = vld [vmem:[%s12040_s7 + $0x28] sm:$0xff]  }
 0x51c   :  { %6130 = vmatpush1.bf16.msra.mxu1 %v8480_v42  ;;  %6090 = vmatprep.subr.bf16.mxu0 %v8485_v56  ;;  %v8554_v42 = vld [vmem:[%s12040_s7 + $0xa8] sm:$0xff]   ;;  %v8555_v56 = vld [vmem:[%s12040_s7 + $0x60] sm:$0xff]  }
 0x51d   :  { %6131 = vmatprep.subr.bf16.mxu1 %v8488_v11  ;;  %v8556_v11 = vld [vmem:[%s12040_s7 + $0xe0] sm:$0xff]  }
 0x51f   :  { %6091 = vmatpush1.bf16.msra.mxu0 %v8483_v51  ;;  %v8557_v51 = vld [vmem:[%s12040_s7 + $0x20] sm:$0xff]  }
 0x520   :  { %6132 = vmatpush1.bf16.msra.mxu1 %v8486_v31  ;;  %6092 = vmatprep.subr.bf16.mxu0 %v8491_v26  ;;  %v8558_v31 = vld [vmem:[%s12040_s7 + $0xa0] sm:$0xff]   ;;  %v8559_v26 = vld [vmem:[%s12040_s7 + $0x58] sm:$0xff]  }
 0x521   :  { %6133 = vmatprep.subr.bf16.mxu1 %v8494_v3  ;;  %v8560_v3 = vld [vmem:[%s12040_s7 + $0xd8] sm:$0xff]  }
 0x523   :  { %6093 = vmatpush1.bf16.msra.mxu0 %v8489_v4  ;;  %v8561_v4 = vld [vmem:[%s12040_s7 + $0x18] sm:$0xff]  }
 0x524   :  { %6134 = vmatpush1.bf16.msra.mxu1 %v8492_v10  ;;  %6094 = vmatprep.subr.bf16.mxu0 %v8497_v15  ;;  %v8562_v10 = vld [vmem:[%s12040_s7 + $0x98] sm:$0xff]  }
 0x525   :  { %6135 = vmatprep.subr.bf16.mxu1 %v8500_v24 }
 0x527   :  { %6095 = vmatpush2.bf16.msra.mxu0 %v8495_v45 }
 0x528   :  { %6136 = vmatpush2.bf16.msra.mxu1 %v8498_v7  ;;  %6096 = vmatprep.subr.bf16.mxu0 %v8503_v41 }
 0x529   :  { %6137 = vmatprep.subr.bf16.mxu1 %v8506_v2 }
 0x52b   :  { %6097 = vmatpush2.bf16.msra.mxu0 %v8501_v21  ;;  %v8563_v21 = vld [vmem:[%s12040_s7 + $0x50] sm:$0xff]  }
 0x52c   :  { %6138 = vmatpush2.bf16.msra.mxu1 %v8504_v47  ;;  %6098 = vmatprep.subr.bf16.mxu0 %v8509_v36  ;;  %v8564_v47 = vld [vmem:[%s12040_s7 + $0xd0] sm:$0xff]  }
 0x52d   :  { %6139 = vmatprep.subr.bf16.mxu1 %v8512_v37 }
 0x52f   :  { %6099 = vmatpush2.bf16.msra.mxu0 %v8507_v16  ;;  %v8565_v16 = vld [vmem:[%s12040_s7 + $0x10] sm:$0xff]  }
 0x530   :  { %6140 = vmatpush2.bf16.msra.mxu1 %v8510_v43  ;;  %6100 = vmatprep.subr.bf16.mxu0 %v8515_v62  ;;  %v8566_v43 = vld [vmem:[%s12040_s7 + $0x90] sm:$0xff]  }
 0x531   :  { %6141 = vmatprep.subr.bf16.mxu1 %v8518_v32 }
 0x533   :  { %6101 = vmatpush2.bf16.msra.mxu0 %v8513_v59 }
 0x534   :  { %6142 = vmatpush2.bf16.msra.mxu1 %v8516_v22  ;;  %6102 = vmatprep.subr.bf16.mxu0 %v8521_v48  ;;  %v8567_v48 = vld [vmem:[%s12040_s7 + $0x48] sm:$0xff]  }
 0x535   :  { %6143 = vmatprep.subr.bf16.mxu1 %v8524_v18  ;;  %v8568_v18 = vld [vmem:[%s12040_s7 + $0xc8] sm:$0xff]  }
 0x537   :  { %6103 = vmatpush2.bf16.msra.mxu0 %v8519_v28  ;;  %v8569_v28 = vld [vmem:[%s12040_s7 + $0x8] sm:$0xff]  }
 0x538   :  { %6144 = vmatpush2.bf16.msra.mxu1 %v8522_v8  ;;  %6104 = vmatprep.subr.bf16.mxu0 %v8527_v58  ;;  %v8570_v8 = vld [vmem:[%s12040_s7 + $0x88] sm:$0xff]   ;;  %v8571_v58 = vld [vmem:[%s12040_s7 + $0x40] sm:$0xff]  }
 0x539   :  { %6145 = vmatprep.subr.bf16.mxu1 %v8530_v13  ;;  %v8572_v13 = vld [vmem:[%s12040_s7 + $0xc0] sm:$0xff]  }
 0x53b   :  { %6105 = vmatpush2.bf16.msra.mxu0 %v8525_v46  ;;  %v8573_v46 = vld [vmem:[%s12040_s7] sm:$0xff]  }
 0x53c   :  { %6146 = vmatpush2.bf16.msra.mxu1 %v8528_v6  ;;  %6106 = vmatprep.subr.bf16.mxu0 %v8533_v57  ;;  %v8574_v6 = vld [vmem:[%s12040_s7 + $0x80] sm:$0xff]  }
 0x53d   :  { %6147 = vmatprep.subr.bf16.mxu1 %v8536_v40 }
 0x53f   :  { %6107 = vmatpush2.bf16.msra.mxu0 %v8531_v60 }
 0x540   :  { %6148 = vmatpush2.bf16.msra.mxu1 %v8534_v50  ;;  %6108 = vmatprep.subr.bf16.mxu0 %v8539_v14 }
 0x541   :  { %6149 = vmatprep.subr.bf16.mxu1 %v8542_v20 }
 0x543   :  { %6109 = vmatpush2.bf16.msra.mxu0 %v8537_v52 }
 0x544   :  { %6150 = vmatpush2.bf16.msra.mxu1 %v8540_v0  ;;  %7500 = vmatprep.subr.bf16.mxu0 %v8543_v34 }
 0x545   :  { %7522 = vmatprep.subr.bf16.mxu1 %v8544_v17 }
 0x546   :  { %6111 = vmatmul.mubr.bf16.vlgmr.msra.gmra.mxu0 %v5691_v35  ;;  %v4768_v53 = vpop.f32.mrf.mxu0  ;;  %v4809_v44 = vpop.f32.mrf.mxu1 }
 0x547   :  { %6152 = vmatmul.mubr.bf16.vlgmr.msra.gmra.mxu1 %v5691_v35  ;;  %7501 = vmatpush3.bf16.msra.mxu0 %v8545_v55 }
 0x548   :  { %v4770_v38 = vpop.f32.mrf.mxu0  ;;  %v4811_v30 = vpop.f32.mrf.mxu1  ;;  %7523 = vmatpush3.bf16.msra.mxu1 %v8546_v39  ;;  %7502 = vmatprep.subr.bf16.mxu0 %v8547_v23  ;;  %v12064_v23 = vld [vmem:[#allocation7_spill] sm:$0xff] }
 0x549   :  { %7524 = vmatprep.subr.bf16.mxu1 %v8548_v5 }
 0x54a   :  { %v4772_v12 = vpop.f32.mrf.mxu0  ;;  %v4813_v49 = vpop.f32.mrf.mxu1 }
 0x54b   :  { %7503 = vmatpush3.bf16.msra.mxu0 %v8549_v61 }
 0x54c   :  { %v4773_v1 = vpop.f32.mrf.mxu0  ;;  %v4814_v33 = vpop.f32.mrf.mxu1  ;;  %7525 = vmatpush3.bf16.msra.mxu1 %v8550_v63  ;;  %7504 = vmatprep.subr.bf16.mxu0 %v8551_v25 }
 0x54d   :  { %7526 = vmatprep.subr.bf16.mxu1 %v8552_v27 }
 0x54f   :  { %7505 = vmatpush3.bf16.msra.mxu0 %v8553_v19 }
 0x550   :  { %7527 = vmatpush3.bf16.msra.mxu1 %v8554_v42  ;;  %7506 = vmatprep.subr.bf16.mxu0 %v8555_v56 }
 0x551   :  { %7528 = vmatprep.subr.bf16.mxu1 %v8556_v11 }
 0x553   :  { %7507 = vmatpush3.bf16.msra.mxu0 %v8557_v51 }
 0x554   :  { %7529 = vmatpush3.bf16.msra.mxu1 %v8558_v31  ;;  %7508 = vmatprep.subr.bf16.mxu0 %v8559_v26 }
 0x555   :  { %7530 = vmatprep.subr.bf16.mxu1 %v8560_v3 }
 0x557   :  { %7509 = vmatpush3.bf16.msra.mxu0 %v8561_v4 }
 0x558   :  { %7531 = vmatpush3.bf16.msra.mxu1 %v8562_v10  ;;  %7510 = vmatprep.subr.bf16.mxu0 %v8563_v21 }
 0x559   :  { %7532 = vmatprep.subr.bf16.mxu1 %v8564_v47 }
 0x55b   :  { %7511 = vmatpush3.bf16.msra.mxu0 %v8565_v16 }
 0x55c   :  { %7533 = vmatpush3.bf16.msra.mxu1 %v8566_v43  ;;  %7512 = vmatprep.subr.bf16.mxu0 %v8567_v48 }
 0x55d   :  { %7534 = vmatprep.subr.bf16.mxu1 %v8568_v18 }
 0x55f   :  { %7513 = vmatpush3.bf16.msra.mxu0 %v8569_v28 }
 0x560   :  { %7535 = vmatpush3.bf16.msra.mxu1 %v8570_v8  ;;  %7514 = vmatprep.subr.bf16.mxu0 %v8571_v58 }
 0x561   :  { %7536 = vmatprep.subr.bf16.mxu1 %v8572_v13 }
 0x563   :  { %7515 = vmatpush3.bf16.msra.mxu0 %v8573_v46 }
 0x564   :  { %7537 = vmatpush3.bf16.msra.mxu1 %v8574_v6 }
 0x586   :  { %v5170_v15 = vpop.f32.mrf.mxu0  ;;  %v5211_v24 = vpop.f32.mrf.mxu1 }
 0x587   :  { %v5171_v45 = vadd.f32 %v5170_v15, %v4768_v53  ;;  %v5212_v7 = vadd.f32 %v5211_v24, %v4809_v44  ;;  %v6164_v44 = vld [vmem:[%s12039_s6] sm:$0xf] }
 0x588   :  { %v5172_v41 = vpop.f32.mrf.mxu0  ;;  %v5213_v2 = vpop.f32.mrf.mxu1  ;;  %v6177_v12 = vrot.slane %v6164_v44, %v12059_v9  ;;  %v6173_v34 = vrot.slane %v6164_v44, %v12060_v54  ;;  %v6181_v5 = vrot.slane %v6164_v44, %v12064_v23 }
 0x589   :  { %v5173_v36 = vadd.f32 %v5172_v41, %v4770_v38  ;;  %v5214_v37 = vadd.f32 %v5213_v2, %v4811_v30  ;;  %v6169_v38 = vrot.slane %v6164_v44, %v9438_v29  ;;  %v7467_v41 = vld [vmem:[%s12041_s8] ss:$0 sm:$0xff] }
 0x58a   :  { %v5174_v62 = vpop.f32.mrf.mxu0  ;;  %v5215_v32 = vpop.f32.mrf.mxu1 }
 0x58c   :  { %v5175_v59 = vpop.f32.mrf.mxu0  ;;  %v5216_v22 = vpop.f32.mrf.mxu1 }
 0x5c6   :  { %v5639_v57 = vpop.f32.mrf.mxu0 }
 0x5c7   :  { %v5687_v40 = vadd.f32 %v5639_v57, %v5171_v45  ;;  %v5680_v60 = vpop.f32.mrf.mxu1 }
 0x5c8   :  { %v5689_v50 = vadd.f32 %v5680_v60, %v5212_v7  ;;  %v5641_v14 = vpop.f32.mrf.mxu0 }
 0x5c9   :  { %v5682_v20 = vpop.f32.mrf.mxu1  ;;  %v5688_v49 = vadd.f32 %v5641_v14, %v5173_v36 }
 0x5ca   :  { %v5643_v52 = vpop.f32.mrf.mxu0  ;;  %v5690_v17 = vadd.f32 %v5682_v20, %v5214_v37 }
 0x5cb   :  { %v5684_v0 = vpop.f32.mrf.mxu1 }
 0x5cc   :  { %v5644_v35 = vpop.f32.mrf.mxu0 }
 0x5cd   :  { %v5685_v53 = vpop.f32.mrf.mxu1 }
 0x606   :  { %v6112_v30 = vpop.f32.mrf.mxu0 }
 0x607   :  { %v6160_v1 = vadd.f32 %v6112_v30, %v5687_v40  ;;  %v6153_v33 = vpop.f32.mrf.mxu1 }
 0x608   :  { %v6162_v55 = vadd.f32 %v6153_v33, %v5689_v50  ;;  %v6114_v39 = vpop.f32.mrf.mxu0 }
 0x609   :  { %v6186_v61 = vadd.f32 %v6169_v38, %v6160_v1  ;;  %v6161_v63 = vadd.f32 %v6114_v39, %v5688_v49  ;;  %v6155_v25 = vpop.f32.mrf.mxu1 }
 0x60a   :  { %v6188_v27 = vadd.f32 %v6177_v12, %v6162_v55  ;;  %v6163_v19 = vadd.f32 %v6155_v25, %v5690_v17  ;;  %v6116_v42 = vpop.f32.mrf.mxu0 }
 0x60b   :  { %v6187_v29 = vadd.f32 %v6173_v34, %v6161_v63  ;;  %v6157_v56 = vpop.f32.mrf.mxu1  ;;  %v6190_v11 = vmax.f32 %v6186_v61, 0.0 }
 0x60c   :  { %v6189_v9 = vadd.f32 %v6181_v5, %v6163_v19  ;;  %v6117_v51 = vpop.f32.mrf.mxu0  ;;  %v6192_v31 = vmax.f32 %v6188_v27, 0.0 }
 0x60d   :  { %v6191_v26 = vmax.f32 %v6187_v29, 0.0  ;;  %v6158_v3 = vpop.f32.mrf.mxu1  ;;  %v6194_v10 = vpack.c.bf16 %v6190_v11, %v6190_v11 }
 0x60e   :  { %v6193_v54 = vmax.f32 %v6189_v9, 0.0  ;;  %v6196_v24 = vpack.c.bf16 %v6192_v31, %v6192_v31 }
 0x60f   :  { %v6195_v4 = vpack.c.bf16 %v6191_v26, %v6191_v26 }
 0x610   :  { %v6197_v15 = vpack.c.bf16 %v6193_v54, %v6193_v54 }
 0x611   :  { %6493 = vmatprep.mubr.bf16.mxu0 %v6195_v4 }
 0x612   :  { %6533 = vmatprep.mubr.bf16.mxu1 %v6197_v15  ;;  %6494 = vmatmul.mubr.bf16.vlgmr.msra.gmra.mxu0 %v6194_v10 }
 0x613   :  { %6534 = vmatmul.mubr.bf16.vlgmr.msra.gmra.mxu1 %v6196_v24 }
 0x6d2   :  { %v7516_v45 = vpop.f32.mrf.mxu0 }
 0x6d3   :  { %v7538_v7 = vpop.f32.mrf.mxu1 }
 0x6d4   :  { %v7517_v2 = vpop.f32.mrf.mxu0 }
 0x6d5   :  { %v7518_v21 = vadd.f32 %v7517_v2, %v7516_v45  ;;  %v7539_v47 = vpop.f32.mrf.mxu1 }
 0x6d6   :  { %v7519_v36 = vpop.f32.mrf.mxu0  ;;  %v7540_v16 = vadd.f32 %v7539_v47, %v7538_v7 }
 0x6d7   :  { %v6496_v37 = vadd.f32 %v7518_v21, %v7467_v41  ;;  %v7541_v43 = vpop.f32.mrf.mxu1 }
 0x6d8   :  { %v7520_v62 = vpop.f32.mrf.mxu0 }
 0x6d9   :  { %v6536_v32 = vadd.f32 %v7540_v16, %v6496_v37  ;;  %v7542_v59 = vpop.f32.mrf.mxu1 }
 0x6db   :  { %6541 = vst [vmem:[%s12042_s9] sm:$0xff] %v6536_v32 }
 0x6dc   :  { %6546 = vsyncpa [#allocation3], 1 }

</bundles_post_ra>
